<compile_context>
chip_gen: v5e
topology: v5e:2x2
jax: 0.10.0
libtpu: 0.0.40
codegen_flags: <defaults>
</compile_context>

<pallas_src>
import functools

import jax
import jax.numpy as jnp
from jax.experimental import pallas as pl
from jax.experimental.pallas import tpu as pltpu

LANE = 128
VMEM_LIMIT = 32 * 1024 * 1024


def _round_up(x, m):
    return (x + m - 1) // m * m


# ----------------------------------------------------------------------------- Pallas kernels

def _conv3x3_kernel(x_ref, w_ref, scale_ref, shift_ref, o_ref, *, H, W):
    """Fused 3x3 conv (stride 1, pad 1) + per-channel scale/shift + ReLU.

    x_ref:     (1, H+2, W+2, Cin)  bf16, spatially zero-padded, channel-padded
    w_ref:     (9, Cin, Cout)      bf16, taps ordered (dh, dw)
    scale_ref: (1, Cout)           f32
    shift_ref: (1, Cout)           f32
    o_ref:     (1, H*W, Cout)
    Keeps the haloed tile in VMEM and runs 9 accumulated MXU dots instead of
    materializing an im2col patch matrix in HBM.
    """
    cin = w_ref.shape[1]
    cout = w_ref.shape[2]
    x = x_ref[0].astype(jnp.float32)
    acc = jnp.zeros((H * W, cout), jnp.float32)
    for dh in range(3):
        for dw in range(3):
            patch = x[dh:dh + H, dw:dw + W, :].reshape(H * W, cin)
            acc = acc + jnp.dot(patch.astype(jnp.bfloat16), w_ref[dh * 3 + dw],
                                preferred_element_type=jnp.float32)
    out = jnp.maximum(acc * scale_ref[...] + shift_ref[...], 0.0)
    o_ref[0] = out.astype(o_ref.dtype)


def _mtf_inner_kernel(f0_ref, f1_ref, wc_ref, we_ref, wi_ref, bi_ref, o_ref, *, H, W):
    """Fused MTF ('iade', kernel 3) + FPN inner 1x1 conv + bias + ReLU.

    Uses the exact identity res(relu(f0-f1)) + res(relu(f1-f0)) + exch(|f0-f1|)
    == (res+exch)(|f0-f1|), so only 2 conv branches are evaluated and the
    elementwise pre-combine never touches HBM.
    """
    cp = wc_ref.shape[1]
    f0 = f0_ref[0].astype(jnp.float32)
    f1 = f1_ref[0].astype(jnp.float32)
    s = f0 + f1                 # info branch input
    e = jnp.abs(f0 - f1)        # fused disappear/appear/exchange branch input
    acc = jnp.zeros((H * W, cp), jnp.float32)
    for dh in range(3):
        for dw in range(3):
            k = dh * 3 + dw
            sp = s[dh:dh + H, dw:dw + W, :].reshape(H * W, cp)
            ep = e[dh:dh + H, dw:dw + W, :].reshape(H * W, cp)
            acc = acc + jnp.dot(sp.astype(jnp.bfloat16), wc_ref[k],
                                preferred_element_type=jnp.float32)
            acc = acc + jnp.dot(ep.astype(jnp.bfloat16), we_ref[k],
                                preferred_element_type=jnp.float32)
    mtf = jnp.maximum(acc, 0.0)                                    # MTF ReLU
    inner = jnp.dot(mtf.astype(jnp.bfloat16), wi_ref[...],
                    preferred_element_type=jnp.float32)
    inner = jnp.maximum(inner + bi_ref[...], 0.0)                  # inner 1x1 + bias + ReLU
    o_ref[0] = inner.astype(o_ref.dtype)


# ----------------------------------------------------------------------------- wrappers

def conv3x3(x, w9, scale, shift, out_dtype=jnp.bfloat16):
    """x: (N,H,W,Cp) channel-padded; w9: (9,Cp,CoutP); scale/shift: (1,CoutP) f32."""
    n, h, w, cp = x.shape
    cout = w9.shape[-1]
    xp = jnp.pad(x.astype(jnp.bfloat16), ((0, 0), (1, 1), (1, 1), (0, 0)))
    out = pl.pallas_call(
        functools.partial(_conv3x3_kernel, H=h, W=w),
        out_shape=jax.ShapeDtypeStruct((n, h * w, cout), out_dtype),
        grid=(n,),
        in_specs=[
            pl.BlockSpec((1, h + 2, w + 2, cp), lambda b: (b, 0, 0, 0)),
            pl.BlockSpec((9, cp, cout), lambda b: (0, 0, 0)),
            pl.BlockSpec((1, cout), lambda b: (0, 0)),
            pl.BlockSpec((1, cout), lambda b: (0, 0)),
        ],
        out_specs=pl.BlockSpec((1, h * w, cout), lambda b: (b, 0, 0)),
        compiler_params=pltpu.CompilerParams(
            dimension_semantics=("parallel",),
            vmem_limit_bytes=VMEM_LIMIT),
    )(xp, w9, scale, shift)
    return out.reshape(n, h, w, cout)


def mtf_inner(f0, f1, wc9, we9, wi, bi):
    """f0/f1: (N,H,W,C) unpadded; returns (N,H,W,Fp) bf16 (channel-padded)."""
    n, h, w, c = f0.shape
    cp = wc9.shape[1]
    fp = wi.shape[1]
    pad = ((0, 0), (1, 1), (1, 1), (0, cp - c))
    f0p = jnp.pad(f0.astype(jnp.bfloat16), pad)
    f1p = jnp.pad(f1.astype(jnp.bfloat16), pad)
    out = pl.pallas_call(
        functools.partial(_mtf_inner_kernel, H=h, W=w),
        out_shape=jax.ShapeDtypeStruct((n, h * w, fp), jnp.bfloat16),
        grid=(n,),
        in_specs=[
            pl.BlockSpec((1, h + 2, w + 2, cp), lambda b: (b, 0, 0, 0)),
            pl.BlockSpec((1, h + 2, w + 2, cp), lambda b: (b, 0, 0, 0)),
            pl.BlockSpec((9, cp, cp), lambda b: (0, 0, 0)),
            pl.BlockSpec((9, cp, cp), lambda b: (0, 0, 0)),
            pl.BlockSpec((cp, fp), lambda b: (0, 0)),
            pl.BlockSpec((1, fp), lambda b: (0, 0)),
        ],
        out_specs=pl.BlockSpec((1, h * w, fp), lambda b: (b, 0, 0)),
        compiler_params=pltpu.CompilerParams(
            dimension_semantics=("parallel",),
            vmem_limit_bytes=VMEM_LIMIT),
    )(f0p, f1p, wc9, we9, wi, bi)
    return out.reshape(n, h, w, fp)


# ----------------------------------------------------------------------------- interpolation glue

def nearest_resize(x, size):
    """F.interpolate(mode='nearest'); integer upscale = reshape+broadcast (no gathers)."""
    n, h, w, c = x.shape
    oh, ow = size
    if (oh, ow) == (h, w):
        return x
    if oh % h == 0 and ow % w == 0:
        rh, rw = oh // h, ow // w
        y = jnp.broadcast_to(x[:, :, None, :, None, :], (n, h, rh, w, rw, c))
        return y.reshape(n, oh, ow, c)
    hi = (jnp.arange(oh) * h) // oh     # exact PyTorch fallback: src = floor(dst*in/out)
    wi = (jnp.arange(ow) * w) // ow
    return x[:, hi][:, :, wi]


def bilinear_resize(x, size):
    """F.interpolate(mode='bilinear', align_corners=False) — exact PyTorch index math."""
    n, h, w, c = x.shape
    oh, ow = size
    if (oh, ow) == (h, w):
        return x

    def coords(out_size, in_size):
        src = (jnp.arange(out_size, dtype=jnp.float32) + 0.5) * (in_size / out_size) - 0.5
        src = jnp.clip(src, 0.0, in_size - 1)
        lo = jnp.floor(src).astype(jnp.int32)
        hi = jnp.minimum(lo + 1, in_size - 1)
        lam = src - lo.astype(jnp.float32)
        return lo, hi, lam

    h0, h1, lh = coords(oh, h)
    w0, w1, lw = coords(ow, w)
    xf = x.astype(jnp.float32)
    top, bot = xf[:, h0], xf[:, h1]
    xh = top * (1.0 - lh)[None, :, None, None] + bot * lh[None, :, None, None]
    left, right = xh[:, :, w0], xh[:, :, w1]
    out = left * (1.0 - lw)[None, None, :, None] + right * lw[None, None, :, None]
    return out.astype(x.dtype)


# ----------------------------------------------------------------------------- MSF forward

def msf_forward(pp, t0_fs, t1_fs):
    num_f = pp["num_f"]
    total_f = pp["total_f"]

    # Fused MTF + FPN inner 1x1 per scale (one Pallas kernel per scale).
    inners = []
    for i in range(num_f):
        k = i + total_f - num_f
        m = pp["mtf_inner"][i]
        inners.append(mtf_inner(t0_fs[k], t1_fs[k], m["wc"], m["we"], m["wi"], m["bi"]))

    resize_shape = inners[0].shape[1:3]
    final_list = []
    last_inner = None
    for i in range(num_f - 1, -1, -1):
        cf = inners[i]
        if last_inner is None:
            last_inner = cf
        else:
            last_inner = cf + nearest_resize(last_inner, cf.shape[1:3])
        pli = pp["layer"][i]
        final_list.append(conv3x3(last_inner, pli["w"], pli["scale"], pli["shift"]))

    final_list = [bilinear_resize(y, resize_shape) for y in final_list]
    cf = jnp.concatenate(final_list, axis=-1)
    # reduce conv (no bias) + BatchNorm (eval, folded) + ReLU in one Pallas kernel.
    out = conv3x3(cf, pp["reduce_w"], pp["bn_scale"], pp["bn_shift"],
                  out_dtype=jnp.float32)
    return out[..., :pp["fpn_channel"]]


# ----------------------------------------------------------------------------- params

def init_params(key, channels, total_f, fpn_channel):
    """Random params mirroring the PyTorch module (real, unpadded shapes)."""
    num_f = len(channels)
    params = {"num_f": num_f, "total_f": total_f, "fpn_channel": fpn_channel,
              "mtf": [], "inner": [], "layer": []}

    def nrm(k, shape, scale=0.1):
        return scale * jax.random.normal(k, shape, dtype=jnp.float32)

    for c in channels:
        key, k1, k2, k3, k4, k5, k6, k7 = jax.random.split(key, 8)
        params["mtf"].append({
            "wc": nrm(k1, (3, 3, c, c)),   # MTF.conv      (bias=False)
            "wr": nrm(k2, (3, 3, c, c)),   # MTF.res       (bias=False, shared a/d)
            "we": nrm(k3, (3, 3, c, c)),   # MTF.exchange  (bias=False)
        })
        params["inner"].append({"w": nrm(k4, (c, fpn_channel)),
                                "b": nrm(k5, (fpn_channel,))})
        params["layer"].append({"w": nrm(k6, (3, 3, fpn_channel, fpn_channel)),
                                "b": nrm(k7, (fpn_channel,))})

    key, kr, kg, kb, km, kv = jax.random.split(key, 6)
    params["reduce_w"] = nrm(kr, (3, 3, fpn_channel * num_f, fpn_channel))
    gamma = 1.0 + nrm(kg, (fpn_channel,), 0.05)
    beta = nrm(kb, (fpn_channel,), 0.05)
    run_mean = nrm(km, (fpn_channel,), 0.05)
    run_var = 1.0 + jnp.abs(nrm(kv, (fpn_channel,), 0.05))
    eps = 1e-5
    params["bn_scale"] = gamma / jnp.sqrt(run_var + eps)
    params["bn_shift"] = beta - run_mean * params["bn_scale"]
    return params


def prepare_params(params):
    """Fold/pad params into the lane-dense kernel layout (channels -> multiple of 128):
       * MTF res + exchange weights summed (exact 2-branch fusion)
       * conv weights as (9, CinP, CoutP) bf16, biases / folded BN as f32 (1, CoutP).
    """
    num_f = params["num_f"]
    fpn = params["fpn_channel"]
    fp = _round_up(fpn, LANE)

    def pad_w(w, cin_p, cout_p):
        kh, kw, cin, cout = w.shape
        wp = jnp.pad(w, ((0, 0), (0, 0), (0, cin_p - cin), (0, cout_p - cout)))
        return wp.reshape(kh * kw, cin_p, cout_p).astype(jnp.bfloat16)

    def pad_v(v, cout_p):
        return jnp.pad(v, (0, cout_p - v.shape[0])).reshape(1, cout_p).astype(jnp.float32)

    pp = {"num_f": num_f, "total_f": params["total_f"], "fpn_channel": fpn,
          "mtf_inner": [], "layer": []}
    for i in range(num_f):
        pm = params["mtf"][i]
        c = pm["wc"].shape[-1]
        cp = _round_up(c, LANE)
        pi = params["inner"][i]
        pp["mtf_inner"].append({
            "wc": pad_w(pm["wc"], cp, cp),
            "we": pad_w(pm["wr"] + pm["we"], cp, cp),     # exact algebraic fusion
            "wi": jnp.pad(pi["w"], ((0, cp - c), (0, fp - fpn))).astype(jnp.bfloat16),
            "bi": pad_v(pi["b"], fp),
        })
        plr = params["layer"][i]
        pp["layer"].append({
            "w": pad_w(plr["w"], fp, fp),
            "scale": jnp.ones((1, fp), jnp.float32),
            "shift": pad_v(plr["b"], fp),
        })

    # Reduce conv weight: inputs arrive channel-padded per scale (fp each), so scatter
    # the real (fpn*num_f) input rows into the padded (fp*num_f) layout.
    rw = params["reduce_w"]
    rwp = jnp.zeros((3, 3, fp * num_f, fp), jnp.float32)
    for j in range(num_f):
        rwp = rwp.at[:, :, j * fp:j * fp + fpn, :fpn].set(rw[:, :, j * fpn:(j + 1) * fpn, :])
    pp["reduce_w"] = rwp.reshape(9, fp * num_f, fp).astype(jnp.bfloat16)
    pp["bn_scale"] = pad_v(params["bn_scale"], fp)
    pp["bn_shift"] = pad_v(params["bn_shift"], fp)
    return pp


# ----------------------------------------------------------------------------- main

if __name__ == "__main__":
    channels = [4, 8]          # per-scale channels (finest -> coarsest)
    total_f = 5
    num_f = len(channels)
    fpn_channel = 16
    batch = 2
    spatials = [(16, 16), (8, 8)]   # spatial sizes for the num_f scales actually used

    key = jax.random.PRNGKey(0)
    key, kp = jax.random.split(key)
    params = init_params(kp, channels, total_f, fpn_channel)
    pp = prepare_params(params)

    # Build t0_fs / t1_fs lists of length total_f; only the last num_f entries are used.
    t0_fs, t1_fs = [], []
    for k in range(total_f):
        i = k - (total_f - num_f)
        if i < 0:
            t0_fs.append(jnp.zeros((1, 1, 1, 1), jnp.float32))   # unused placeholder
            t1_fs.append(jnp.zeros((1, 1, 1, 1), jnp.float32))
        else:
            h, w = spatials[i]
            c = channels[i]
            key, ka, kb = jax.random.split(key, 3)
            t0_fs.append(jax.random.normal(ka, (batch, h, w, c), dtype=jnp.float32))
            t1_fs.append(jax.random.normal(kb, (batch, h, w, c), dtype=jnp.float32))

    out = msf_forward(pp, t0_fs, t1_fs)
    out = jax.block_until_ready(out)
    assert out.shape == (batch, spatials[0][0], spatials[0][1], fpn_channel), out.shape
    assert bool(jnp.all(jnp.isfinite(out)))
    print("KERNEL_OK")
</pallas_src>

<mosaic_0001>
module attributes {stable_mosaic.version = 11 : i64} {
  func.func @_mtf_inner_kernel(%arg0: i32, %arg1: memref<1x18x18x128xbf16, #tpu.memory_space<vmem>>, %arg2: memref<1x18x18x128xbf16, #tpu.memory_space<vmem>>, %arg3: memref<9x128x128xbf16, #tpu.memory_space<vmem>>, %arg4: memref<9x128x128xbf16, #tpu.memory_space<vmem>>, %arg5: memref<128x128xbf16, #tpu.memory_space<vmem>>, %arg6: memref<1x128xf32, #tpu.memory_space<vmem>>, %arg7: memref<1x256x128xbf16, #tpu.memory_space<vmem>>) attributes {dimension_semantics = [#tpu.dimension_semantics<parallel>], iteration_bounds = array<i64: 2>, scalar_prefetch = 0 : i64, scratch_operands = 0 : i64, tpu.core_type = #tpu.core_type<tc>, window_params = [{transform_indices = @transform_0, window_bounds = array<i64: 1, 18, 18, 128>}, {transform_indices = @transform_1, window_bounds = array<i64: 1, 18, 18, 128>}, {pipeline_mode = #tpu.pipeline_mode<synchronous>, transform_indices = @transform_2, window_bounds = array<i64: 9, 128, 128>}, {pipeline_mode = #tpu.pipeline_mode<synchronous>, transform_indices = @transform_3, window_bounds = array<i64: 9, 128, 128>}, {pipeline_mode = #tpu.pipeline_mode<synchronous>, transform_indices = @transform_4, window_bounds = array<i64: 128, 128>}, {pipeline_mode = #tpu.pipeline_mode<synchronous>, transform_indices = @transform_5, window_bounds = array<i64: 1, 128>}, {transform_indices = @transform_6, window_bounds = array<i64: 1, 256, 128>}]} {
    %c0 = arith.constant 0 : index
    %c0_0 = arith.constant 0 : index
    %c0_1 = arith.constant 0 : index
    %c0_2 = arith.constant 0 : index
    %0 = vector.load %arg1[%c0, %c0_0, %c0_1, %c0_2] : memref<1x18x18x128xbf16, #tpu.memory_space<vmem>>, vector<1x18x18x128xbf16>
    %1 = vector.shape_cast %0 : vector<1x18x18x128xbf16> to vector<18x18x128xbf16>
    %2 = arith.extf %1 : vector<18x18x128xbf16> to vector<18x18x128xf32>
    %c0_3 = arith.constant 0 : index
    %c0_4 = arith.constant 0 : index
    %c0_5 = arith.constant 0 : index
    %c0_6 = arith.constant 0 : index
    %3 = vector.load %arg2[%c0_3, %c0_4, %c0_5, %c0_6] : memref<1x18x18x128xbf16, #tpu.memory_space<vmem>>, vector<1x18x18x128xbf16>
    %4 = vector.shape_cast %3 : vector<1x18x18x128xbf16> to vector<18x18x128xbf16>
    %5 = arith.extf %4 : vector<18x18x128xbf16> to vector<18x18x128xf32>
    %6 = arith.addf %2, %5 : vector<18x18x128xf32>
    %7 = arith.subf %2, %5 : vector<18x18x128xf32>
    %8 = math.absf %7 : vector<18x18x128xf32>
    %cst = arith.constant 0.000000e+00 : f32
    %9 = vector.broadcast %cst : f32 to vector<256x128xf32>
    %10 = vector.extract_strided_slice %6 {offsets = [0, 0, 0], sizes = [16, 16, 128], strides = [1, 1, 1]} : vector<18x18x128xf32> to vector<16x16x128xf32>
    %11 = vector.shape_cast %10 : vector<16x16x128xf32> to vector<256x128xf32>
    %12 = vector.extract_strided_slice %8 {offsets = [0, 0, 0], sizes = [16, 16, 128], strides = [1, 1, 1]} : vector<18x18x128xf32> to vector<16x16x128xf32>
    %13 = vector.shape_cast %12 : vector<16x16x128xf32> to vector<256x128xf32>
    %14 = arith.truncf %11 : vector<256x128xf32> to vector<256x128xbf16>
    %c0_7 = arith.constant 0 : index
    %c0_8 = arith.constant 0 : index
    %c0_9 = arith.constant 0 : index
    %15 = vector.load %arg3[%c0_7, %c0_8, %c0_9] : memref<9x128x128xbf16, #tpu.memory_space<vmem>>, vector<1x128x128xbf16>
    %16 = vector.shape_cast %15 : vector<1x128x128xbf16> to vector<128x128xbf16>
    %cst_10 = arith.constant dense<0.000000e+00> : vector<256x128xf32>
    %17 = tpu.matmul %14, %16, %cst_10 {dimension_numbers = #tpu.dot_dimension_numbers<[1], [0], [0], [1], [0, 0, 1, 1], [], []>} : vector<256x128xbf16>, vector<128x128xbf16>, vector<256x128xf32> -> vector<256x128xf32>
    %18 = arith.addf %9, %17 : vector<256x128xf32>
    %19 = arith.truncf %13 : vector<256x128xf32> to vector<256x128xbf16>
    %c0_11 = arith.constant 0 : index
    %c0_12 = arith.constant 0 : index
    %c0_13 = arith.constant 0 : index
    %20 = vector.load %arg4[%c0_11, %c0_12, %c0_13] : memref<9x128x128xbf16, #tpu.memory_space<vmem>>, vector<1x128x128xbf16>
    %21 = vector.shape_cast %20 : vector<1x128x128xbf16> to vector<128x128xbf16>
    %cst_14 = arith.constant dense<0.000000e+00> : vector<256x128xf32>
    %22 = tpu.matmul %19, %21, %cst_14 {dimension_numbers = #tpu.dot_dimension_numbers<[1], [0], [0], [1], [0, 0, 1, 1], [], []>} : vector<256x128xbf16>, vector<128x128xbf16>, vector<256x128xf32> -> vector<256x128xf32>
    %23 = arith.addf %18, %22 : vector<256x128xf32>
    %24 = vector.extract_strided_slice %6 {offsets = [0, 1, 0], sizes = [16, 16, 128], strides = [1, 1, 1]} : vector<18x18x128xf32> to vector<16x16x128xf32>
    %25 = vector.shape_cast %24 : vector<16x16x128xf32> to vector<256x128xf32>
    %26 = vector.extract_strided_slice %8 {offsets = [0, 1, 0], sizes = [16, 16, 128], strides = [1, 1, 1]} : vector<18x18x128xf32> to vector<16x16x128xf32>
    %27 = vector.shape_cast %26 : vector<16x16x128xf32> to vector<256x128xf32>
    %28 = arith.truncf %25 : vector<256x128xf32> to vector<256x128xbf16>
    %c1 = arith.constant 1 : index
    %c0_15 = arith.constant 0 : index
    %c0_16 = arith.constant 0 : index
    %29 = vector.load %arg3[%c1, %c0_15, %c0_16] : memref<9x128x128xbf16, #tpu.memory_space<vmem>>, vector<1x128x128xbf16>
    %30 = vector.shape_cast %29 : vector<1x128x128xbf16> to vector<128x128xbf16>
    %cst_17 = arith.constant dense<0.000000e+00> : vector<256x128xf32>
    %31 = tpu.matmul %28, %30, %cst_17 {dimension_numbers = #tpu.dot_dimension_numbers<[1], [0], [0], [1], [0, 0, 1, 1], [], []>} : vector<256x128xbf16>, vector<128x128xbf16>, vector<256x128xf32> -> vector<256x128xf32>
    %32 = arith.addf %23, %31 : vector<256x128xf32>
    %33 = arith.truncf %27 : vector<256x128xf32> to vector<256x128xbf16>
    %c1_18 = arith.constant 1 : index
    %c0_19 = arith.constant 0 : index
    %c0_20 = arith.constant 0 : index
    %34 = vector.load %arg4[%c1_18, %c0_19, %c0_20] : memref<9x128x128xbf16, #tpu.memory_space<vmem>>, vector<1x128x128xbf16>
    %35 = vector.shape_cast %34 : vector<1x128x128xbf16> to vector<128x128xbf16>
    %cst_21 = arith.constant dense<0.000000e+00> : vector<256x128xf32>
    %36 = tpu.matmul %33, %35, %cst_21 {dimension_numbers = #tpu.dot_dimension_numbers<[1], [0], [0], [1], [0, 0, 1, 1], [], []>} : vector<256x128xbf16>, vector<128x128xbf16>, vector<256x128xf32> -> vector<256x128xf32>
    %37 = arith.addf %32, %36 : vector<256x128xf32>
    %38 = vector.extract_strided_slice %6 {offsets = [0, 2, 0], sizes = [16, 16, 128], strides = [1, 1, 1]} : vector<18x18x128xf32> to vector<16x16x128xf32>
    %39 = vector.shape_cast %38 : vector<16x16x128xf32> to vector<256x128xf32>
    %40 = vector.extract_strided_slice %8 {offsets = [0, 2, 0], sizes = [16, 16, 128], strides = [1, 1, 1]} : vector<18x18x128xf32> to vector<16x16x128xf32>
    %41 = vector.shape_cast %40 : vector<16x16x128xf32> to vector<256x128xf32>
    %42 = arith.truncf %39 : vector<256x128xf32> to vector<256x128xbf16>
    %c2 = arith.constant 2 : index
    %c0_22 = arith.constant 0 : index
    %c0_23 = arith.constant 0 : index
    %43 = vector.load %arg3[%c2, %c0_22, %c0_23] : memref<9x128x128xbf16, #tpu.memory_space<vmem>>, vector<1x128x128xbf16>
    %44 = vector.shape_cast %43 : vector<1x128x128xbf16> to vector<128x128xbf16>
    %cst_24 = arith.constant dense<0.000000e+00> : vector<256x128xf32>
    %45 = tpu.matmul %42, %44, %cst_24 {dimension_numbers = #tpu.dot_dimension_numbers<[1], [0], [0], [1], [0, 0, 1, 1], [], []>} : vector<256x128xbf16>, vector<128x128xbf16>, vector<256x128xf32> -> vector<256x128xf32>
    %46 = arith.addf %37, %45 : vector<256x128xf32>
    %47 = arith.truncf %41 : vector<256x128xf32> to vector<256x128xbf16>
    %c2_25 = arith.constant 2 : index
    %c0_26 = arith.constant 0 : index
    %c0_27 = arith.constant 0 : index
    %48 = vector.load %arg4[%c2_25, %c0_26, %c0_27] : memref<9x128x128xbf16, #tpu.memory_space<vmem>>, vector<1x128x128xbf16>
    %49 = vector.shape_cast %48 : vector<1x128x128xbf16> to vector<128x128xbf16>
    %cst_28 = arith.constant dense<0.000000e+00> : vector<256x128xf32>
    %50 = tpu.matmul %47, %49, %cst_28 {dimension_numbers = #tpu.dot_dimension_numbers<[1], [0], [0], [1], [0, 0, 1, 1], [], []>} : vector<256x128xbf16>, vector<128x128xbf16>, vector<256x128xf32> -> vector<256x128xf32>
    %51 = arith.addf %46, %50 : vector<256x128xf32>
    %52 = vector.extract_strided_slice %6 {offsets = [1, 0, 0], sizes = [16, 16, 128], strides = [1, 1, 1]} : vector<18x18x128xf32> to vector<16x16x128xf32>
    %53 = vector.shape_cast %52 : vector<16x16x128xf32> to vector<256x128xf32>
    %54 = vector.extract_strided_slice %8 {offsets = [1, 0, 0], sizes = [16, 16, 128], strides = [1, 1, 1]} : vector<18x18x128xf32> to vector<16x16x128xf32>
    %55 = vector.shape_cast %54 : vector<16x16x128xf32> to vector<256x128xf32>
    %56 = arith.truncf %53 : vector<256x128xf32> to vector<256x128xbf16>
    %c3 = arith.constant 3 : index
    %c0_29 = arith.constant 0 : index
    %c0_30 = arith.constant 0 : index
    %57 = vector.load %arg3[%c3, %c0_29, %c0_30] : memref<9x128x128xbf16, #tpu.memory_space<vmem>>, vector<1x128x128xbf16>
    %58 = vector.shape_cast %57 : vector<1x128x128xbf16> to vector<128x128xbf16>
    %cst_31 = arith.constant dense<0.000000e+00> : vector<256x128xf32>
    %59 = tpu.matmul %56, %58, %cst_31 {dimension_numbers = #tpu.dot_dimension_numbers<[1], [0], [0], [1], [0, 0, 1, 1], [], []>} : vector<256x128xbf16>, vector<128x128xbf16>, vector<256x128xf32> -> vector<256x128xf32>
    %60 = arith.addf %51, %59 : vector<256x128xf32>
    %61 = arith.truncf %55 : vector<256x128xf32> to vector<256x128xbf16>
    %c3_32 = arith.constant 3 : index
    %c0_33 = arith.constant 0 : index
    %c0_34 = arith.constant 0 : index
    %62 = vector.load %arg4[%c3_32, %c0_33, %c0_34] : memref<9x128x128xbf16, #tpu.memory_space<vmem>>, vector<1x128x128xbf16>
    %63 = vector.shape_cast %62 : vector<1x128x128xbf16> to vector<128x128xbf16>
    %cst_35 = arith.constant dense<0.000000e+00> : vector<256x128xf32>
    %64 = tpu.matmul %61, %63, %cst_35 {dimension_numbers = #tpu.dot_dimension_numbers<[1], [0], [0], [1], [0, 0, 1, 1], [], []>} : vector<256x128xbf16>, vector<128x128xbf16>, vector<256x128xf32> -> vector<256x128xf32>
    %65 = arith.addf %60, %64 : vector<256x128xf32>
    %66 = vector.extract_strided_slice %6 {offsets = [1, 1, 0], sizes = [16, 16, 128], strides = [1, 1, 1]} : vector<18x18x128xf32> to vector<16x16x128xf32>
    %67 = vector.shape_cast %66 : vector<16x16x128xf32> to vector<256x128xf32>
    %68 = vector.extract_strided_slice %8 {offsets = [1, 1, 0], sizes = [16, 16, 128], strides = [1, 1, 1]} : vector<18x18x128xf32> to vector<16x16x128xf32>
    %69 = vector.shape_cast %68 : vector<16x16x128xf32> to vector<256x128xf32>
    %70 = arith.truncf %67 : vector<256x128xf32> to vector<256x128xbf16>
    %c4 = arith.constant 4 : index
    %c0_36 = arith.constant 0 : index
    %c0_37 = arith.constant 0 : index
    %71 = vector.load %arg3[%c4, %c0_36, %c0_37] : memref<9x128x128xbf16, #tpu.memory_space<vmem>>, vector<1x128x128xbf16>
    %72 = vector.shape_cast %71 : vector<1x128x128xbf16> to vector<128x128xbf16>
    %cst_38 = arith.constant dense<0.000000e+00> : vector<256x128xf32>
    %73 = tpu.matmul %70, %72, %cst_38 {dimension_numbers = #tpu.dot_dimension_numbers<[1], [0], [0], [1], [0, 0, 1, 1], [], []>} : vector<256x128xbf16>, vector<128x128xbf16>, vector<256x128xf32> -> vector<256x128xf32>
    %74 = arith.addf %65, %73 : vector<256x128xf32>
    %75 = arith.truncf %69 : vector<256x128xf32> to vector<256x128xbf16>
    %c4_39 = arith.constant 4 : index
    %c0_40 = arith.constant 0 : index
    %c0_41 = arith.constant 0 : index
    %76 = vector.load %arg4[%c4_39, %c0_40, %c0_41] : memref<9x128x128xbf16, #tpu.memory_space<vmem>>, vector<1x128x128xbf16>
    %77 = vector.shape_cast %76 : vector<1x128x128xbf16> to vector<128x128xbf16>
    %cst_42 = arith.constant dense<0.000000e+00> : vector<256x128xf32>
    %78 = tpu.matmul %75, %77, %cst_42 {dimension_numbers = #tpu.dot_dimension_numbers<[1], [0], [0], [1], [0, 0, 1, 1], [], []>} : vector<256x128xbf16>, vector<128x128xbf16>, vector<256x128xf32> -> vector<256x128xf32>
    %79 = arith.addf %74, %78 : vector<256x128xf32>
    %80 = vector.extract_strided_slice %6 {offsets = [1, 2, 0], sizes = [16, 16, 128], strides = [1, 1, 1]} : vector<18x18x128xf32> to vector<16x16x128xf32>
    %81 = vector.shape_cast %80 : vector<16x16x128xf32> to vector<256x128xf32>
    %82 = vector.extract_strided_slice %8 {offsets = [1, 2, 0], sizes = [16, 16, 128], strides = [1, 1, 1]} : vector<18x18x128xf32> to vector<16x16x128xf32>
    %83 = vector.shape_cast %82 : vector<16x16x128xf32> to vector<256x128xf32>
    %84 = arith.truncf %81 : vector<256x128xf32> to vector<256x128xbf16>
    %c5 = arith.constant 5 : index
    %c0_43 = arith.constant 0 : index
    %c0_44 = arith.constant 0 : index
    %85 = vector.load %arg3[%c5, %c0_43, %c0_44] : memref<9x128x128xbf16, #tpu.memory_space<vmem>>, vector<1x128x128xbf16>
    %86 = vector.shape_cast %85 : vector<1x128x128xbf16> to vector<128x128xbf16>
    %cst_45 = arith.constant dense<0.000000e+00> : vector<256x128xf32>
    %87 = tpu.matmul %84, %86, %cst_45 {dimension_numbers = #tpu.dot_dimension_numbers<[1], [0], [0], [1], [0, 0, 1, 1], [], []>} : vector<256x128xbf16>, vector<128x128xbf16>, vector<256x128xf32> -> vector<256x128xf32>
    %88 = arith.addf %79, %87 : vector<256x128xf32>
    %89 = arith.truncf %83 : vector<256x128xf32> to vector<256x128xbf16>
    %c5_46 = arith.constant 5 : index
    %c0_47 = arith.constant 0 : index
    %c0_48 = arith.constant 0 : index
    %90 = vector.load %arg4[%c5_46, %c0_47, %c0_48] : memref<9x128x128xbf16, #tpu.memory_space<vmem>>, vector<1x128x128xbf16>
    %91 = vector.shape_cast %90 : vector<1x128x128xbf16> to vector<128x128xbf16>
    %cst_49 = arith.constant dense<0.000000e+00> : vector<256x128xf32>
    %92 = tpu.matmul %89, %91, %cst_49 {dimension_numbers = #tpu.dot_dimension_numbers<[1], [0], [0], [1], [0, 0, 1, 1], [], []>} : vector<256x128xbf16>, vector<128x128xbf16>, vector<256x128xf32> -> vector<256x128xf32>
    %93 = arith.addf %88, %92 : vector<256x128xf32>
    %94 = vector.extract_strided_slice %6 {offsets = [2, 0, 0], sizes = [16, 16, 128], strides = [1, 1, 1]} : vector<18x18x128xf32> to vector<16x16x128xf32>
    %95 = vector.shape_cast %94 : vector<16x16x128xf32> to vector<256x128xf32>
    %96 = vector.extract_strided_slice %8 {offsets = [2, 0, 0], sizes = [16, 16, 128], strides = [1, 1, 1]} : vector<18x18x128xf32> to vector<16x16x128xf32>
    %97 = vector.shape_cast %96 : vector<16x16x128xf32> to vector<256x128xf32>
    %98 = arith.truncf %95 : vector<256x128xf32> to vector<256x128xbf16>
    %c6 = arith.constant 6 : index
    %c0_50 = arith.constant 0 : index
    %c0_51 = arith.constant 0 : index
    %99 = vector.load %arg3[%c6, %c0_50, %c0_51] : memref<9x128x128xbf16, #tpu.memory_space<vmem>>, vector<1x128x128xbf16>
    %100 = vector.shape_cast %99 : vector<1x128x128xbf16> to vector<128x128xbf16>
    %cst_52 = arith.constant dense<0.000000e+00> : vector<256x128xf32>
    %101 = tpu.matmul %98, %100, %cst_52 {dimension_numbers = #tpu.dot_dimension_numbers<[1], [0], [0], [1], [0, 0, 1, 1], [], []>} : vector<256x128xbf16>, vector<128x128xbf16>, vector<256x128xf32> -> vector<256x128xf32>
    %102 = arith.addf %93, %101 : vector<256x128xf32>
    %103 = arith.truncf %97 : vector<256x128xf32> to vector<256x128xbf16>
    %c6_53 = arith.constant 6 : index
    %c0_54 = arith.constant 0 : index
    %c0_55 = arith.constant 0 : index
    %104 = vector.load %arg4[%c6_53, %c0_54, %c0_55] : memref<9x128x128xbf16, #tpu.memory_space<vmem>>, vector<1x128x128xbf16>
    %105 = vector.shape_cast %104 : vector<1x128x128xbf16> to vector<128x128xbf16>
    %cst_56 = arith.constant dense<0.000000e+00> : vector<256x128xf32>
    %106 = tpu.matmul %103, %105, %cst_56 {dimension_numbers = #tpu.dot_dimension_numbers<[1], [0], [0], [1], [0, 0, 1, 1], [], []>} : vector<256x128xbf16>, vector<128x128xbf16>, vector<256x128xf32> -> vector<256x128xf32>
    %107 = arith.addf %102, %106 : vector<256x128xf32>
    %108 = vector.extract_strided_slice %6 {offsets = [2, 1, 0], sizes = [16, 16, 128], strides = [1, 1, 1]} : vector<18x18x128xf32> to vector<16x16x128xf32>
    %109 = vector.shape_cast %108 : vector<16x16x128xf32> to vector<256x128xf32>
    %110 = vector.extract_strided_slice %8 {offsets = [2, 1, 0], sizes = [16, 16, 128], strides = [1, 1, 1]} : vector<18x18x128xf32> to vector<16x16x128xf32>
    %111 = vector.shape_cast %110 : vector<16x16x128xf32> to vector<256x128xf32>
    %112 = arith.truncf %109 : vector<256x128xf32> to vector<256x128xbf16>
    %c7 = arith.constant 7 : index
    %c0_57 = arith.constant 0 : index
    %c0_58 = arith.constant 0 : index
    %113 = vector.load %arg3[%c7, %c0_57, %c0_58] : memref<9x128x128xbf16, #tpu.memory_space<vmem>>, vector<1x128x128xbf16>
    %114 = vector.shape_cast %113 : vector<1x128x128xbf16> to vector<128x128xbf16>
    %cst_59 = arith.constant dense<0.000000e+00> : vector<256x128xf32>
    %115 = tpu.matmul %112, %114, %cst_59 {dimension_numbers = #tpu.dot_dimension_numbers<[1], [0], [0], [1], [0, 0, 1, 1], [], []>} : vector<256x128xbf16>, vector<128x128xbf16>, vector<256x128xf32> -> vector<256x128xf32>
    %116 = arith.addf %107, %115 : vector<256x128xf32>
    %117 = arith.truncf %111 : vector<256x128xf32> to vector<256x128xbf16>
    %c7_60 = arith.constant 7 : index
    %c0_61 = arith.constant 0 : index
    %c0_62 = arith.constant 0 : index
    %118 = vector.load %arg4[%c7_60, %c0_61, %c0_62] : memref<9x128x128xbf16, #tpu.memory_space<vmem>>, vector<1x128x128xbf16>
    %119 = vector.shape_cast %118 : vector<1x128x128xbf16> to vector<128x128xbf16>
    %cst_63 = arith.constant dense<0.000000e+00> : vector<256x128xf32>
    %120 = tpu.matmul %117, %119, %cst_63 {dimension_numbers = #tpu.dot_dimension_numbers<[1], [0], [0], [1], [0, 0, 1, 1], [], []>} : vector<256x128xbf16>, vector<128x128xbf16>, vector<256x128xf32> -> vector<256x128xf32>
    %121 = arith.addf %116, %120 : vector<256x128xf32>
    %122 = vector.extract_strided_slice %6 {offsets = [2, 2, 0], sizes = [16, 16, 128], strides = [1, 1, 1]} : vector<18x18x128xf32> to vector<16x16x128xf32>
    %123 = vector.shape_cast %122 : vector<16x16x128xf32> to vector<256x128xf32>
    %124 = vector.extract_strided_slice %8 {offsets = [2, 2, 0], sizes = [16, 16, 128], strides = [1, 1, 1]} : vector<18x18x128xf32> to vector<16x16x128xf32>
    %125 = vector.shape_cast %124 : vector<16x16x128xf32> to vector<256x128xf32>
    %126 = arith.truncf %123 : vector<256x128xf32> to vector<256x128xbf16>
    %c8 = arith.constant 8 : index
    %c0_64 = arith.constant 0 : index
    %c0_65 = arith.constant 0 : index
    %127 = vector.load %arg3[%c8, %c0_64, %c0_65] : memref<9x128x128xbf16, #tpu.memory_space<vmem>>, vector<1x128x128xbf16>
    %128 = vector.shape_cast %127 : vector<1x128x128xbf16> to vector<128x128xbf16>
    %cst_66 = arith.constant dense<0.000000e+00> : vector<256x128xf32>
    %129 = tpu.matmul %126, %128, %cst_66 {dimension_numbers = #tpu.dot_dimension_numbers<[1], [0], [0], [1], [0, 0, 1, 1], [], []>} : vector<256x128xbf16>, vector<128x128xbf16>, vector<256x128xf32> -> vector<256x128xf32>
    %130 = arith.addf %121, %129 : vector<256x128xf32>
    %131 = arith.truncf %125 : vector<256x128xf32> to vector<256x128xbf16>
    %c8_67 = arith.constant 8 : index
    %c0_68 = arith.constant 0 : index
    %c0_69 = arith.constant 0 : index
    %132 = vector.load %arg4[%c8_67, %c0_68, %c0_69] : memref<9x128x128xbf16, #tpu.memory_space<vmem>>, vector<1x128x128xbf16>
    %133 = vector.shape_cast %132 : vector<1x128x128xbf16> to vector<128x128xbf16>
    %cst_70 = arith.constant dense<0.000000e+00> : vector<256x128xf32>
    %134 = tpu.matmul %131, %133, %cst_70 {dimension_numbers = #tpu.dot_dimension_numbers<[1], [0], [0], [1], [0, 0, 1, 1], [], []>} : vector<256x128xbf16>, vector<128x128xbf16>, vector<256x128xf32> -> vector<256x128xf32>
    %135 = arith.addf %130, %134 : vector<256x128xf32>
    %cst_71 = arith.constant 0.000000e+00 : f32
    %136 = vector.broadcast %cst_71 : f32 to vector<256x128xf32>
    %137 = arith.maximumf %135, %136 : vector<256x128xf32>
    %138 = arith.truncf %137 : vector<256x128xf32> to vector<256x128xbf16>
    %c0_72 = arith.constant 0 : index
    %c0_73 = arith.constant 0 : index
    %139 = vector.load %arg5[%c0_72, %c0_73] : memref<128x128xbf16, #tpu.memory_space<vmem>>, vector<128x128xbf16>
    %cst_74 = arith.constant dense<0.000000e+00> : vector<256x128xf32>
    %140 = tpu.matmul %138, %139, %cst_74 {dimension_numbers = #tpu.dot_dimension_numbers<[1], [0], [0], [1], [0, 0, 1, 1], [], []>} : vector<256x128xbf16>, vector<128x128xbf16>, vector<256x128xf32> -> vector<256x128xf32>
    %c0_75 = arith.constant 0 : index
    %c0_76 = arith.constant 0 : index
    %141 = vector.load %arg6[%c0_75, %c0_76] : memref<1x128xf32, #tpu.memory_space<vmem>>, vector<1x128xf32>
    %142 = vector.broadcast %141 : vector<1x128xf32> to vector<256x128xf32>
    %143 = arith.addf %140, %142 : vector<256x128xf32>
    %cst_77 = arith.constant 0.000000e+00 : f32
    %144 = vector.broadcast %cst_77 : f32 to vector<256x128xf32>
    %145 = arith.maximumf %143, %144 : vector<256x128xf32>
    %146 = arith.truncf %145 : vector<256x128xf32> to vector<256x128xbf16>
    %c0_78 = arith.constant 0 : index
    %c0_79 = arith.constant 0 : index
    %c0_80 = arith.constant 0 : index
    %147 = vector.load %arg7[%c0_78, %c0_79, %c0_80] : memref<1x256x128xbf16, #tpu.memory_space<vmem>>, vector<1x256x128xbf16>
    %148 = vector.shape_cast %147 : vector<1x256x128xbf16> to vector<256x128xbf16>
    %149 = vector.shape_cast %146 : vector<256x128xbf16> to vector<1x256x128xbf16>
    tpu.vector_store %arg7[%c0_78, %c0_79, %c0_80], %149 {strides = array<i32>} : memref<1x256x128xbf16, #tpu.memory_space<vmem>>, vector<1x256x128xbf16>,
    return
  }
  func.func @transform_0(%arg0: i32) -> (i32, i32, i32, i32) {
    %c0_i32 = arith.constant 0 : i32
    %c0_i32_0 = arith.constant 0 : i32
    %c0_i32_1 = arith.constant 0 : i32
    %c0_i32_2 = arith.constant 0 : i32
    return %arg0, %c0_i32, %c0_i32_0, %c0_i32_1 : i32, i32, i32, i32
  }
  func.func @transform_1(%arg0: i32) -> (i32, i32, i32, i32) {
    %c0_i32 = arith.constant 0 : i32
    %c0_i32_0 = arith.constant 0 : i32
    %c0_i32_1 = arith.constant 0 : i32
    %c0_i32_2 = arith.constant 0 : i32
    return %arg0, %c0_i32, %c0_i32_0, %c0_i32_1 : i32, i32, i32, i32
  }
  func.func @transform_2(%arg0: i32) -> (i32, i32, i32) {
    %c0_i32 = arith.constant 0 : i32
    %c0_i32_0 = arith.constant 0 : i32
    %c0_i32_1 = arith.constant 0 : i32
    %c0_i32_2 = arith.constant 0 : i32
    return %c0_i32, %c0_i32_0, %c0_i32_1 : i32, i32, i32
  }
  func.func @transform_3(%arg0: i32) -> (i32, i32, i32) {
    %c0_i32 = arith.constant 0 : i32
    %c0_i32_0 = arith.constant 0 : i32
    %c0_i32_1 = arith.constant 0 : i32
    %c0_i32_2 = arith.constant 0 : i32
    return %c0_i32, %c0_i32_0, %c0_i32_1 : i32, i32, i32
  }
  func.func @transform_4(%arg0: i32) -> (i32, i32) {
    %c0_i32 = arith.constant 0 : i32
    %c0_i32_0 = arith.constant 0 : i32
    %c0_i32_1 = arith.constant 0 : i32
    return %c0_i32, %c0_i32_0 : i32, i32
  }
  func.func @transform_5(%arg0: i32) -> (i32, i32) {
    %c0_i32 = arith.constant 0 : i32
    %c0_i32_0 = arith.constant 0 : i32
    %c0_i32_1 = arith.constant 0 : i32
    return %c0_i32, %c0_i32_0 : i32, i32
  }
  func.func @transform_6(%arg0: i32) -> (i32, i32, i32) {
    %c0_i32 = arith.constant 0 : i32
    %c0_i32_0 = arith.constant 0 : i32
    %c0_i32_1 = arith.constant 0 : i32
    return %arg0, %c0_i32, %c0_i32_0 : i32, i32, i32
  }
}

</mosaic_0001>

<bundles_post_ra>
// kernel: tpu_custom_call.1
= control target key start
LH: loop header
LB: loop body
LE: loop exit
PB: predicated region body
PF: predicated region fallthrough
CT: control target
= control target key end

     0   :  { %11 = vsyncpa [#allocation3], 0  ;;  %s9120_s0 = inlined_call_operand.vmem [shape: bf16[2,18,18,128], index: 0, kind: input, shape index: {}]   ;;  %s9121_s1 = inlined_call_operand.vmem [shape: bf16[2,18,18,128], index: 1, kind: input, shape index: {}]   ;;  %s9122_s2 = inlined_call_operand.vmem [shape: bf16[9,128,128], index: 2, kind: input, shape index: {}]   ;;  %s9123_s3 = inlined_call_operand.vmem [shape: bf16[9,128,128], index: 3, kind: input, shape index: {}]   ;;  %s9124_s4 = inlined_call_operand.hbm [shape: bf16[128,128], index: 4, kind: input, shape index: {}]   ;;  %s9125_s5 = inlined_call_operand.vmem [shape: f32[1,128], index: 5, kind: input, shape index: {}]   ;;  %s9126_s6 = inlined_call_operand.hbm [shape: bf16[2,256,128], index: 6, kind: output, shape index: {}]  }
   0x1   :  { %12 = vsyncpa [#allocation4], 0 }
   0x2   :  { %14 = vsyncpa [#allocation4 + $0x1], 0  ;;  %s6504_s21 = smov 0   ;;  %s6506_s22 = smov 0  }
   0x3   :  { %s6508_s23 = smov 0   ;;  %s6510_s24 = smov 0  }
   0x4 LB: > { %s6525_s25 = sadd.s32 4294967295, %s6462_s24   ;;  %s5072_s26 = sadd.s32 4294967294, %s6462_s24   ;;  %s6462_s24 = sphi %s6510_s24, %s9938_s24   ;;  %s6458_s23 = sphi %s6508_s23, %s9937_s23   ;;  %s6454_s22 = sphi %s6506_s22, %s9936_s22   ;;  %s6450_s21 = sphi %s6504_s21, %s9935_s21  }
   0x5   : > { %s6529_s27 = sadd.s32 1, %s6462_s24   ;;  %s163_s28 = sadd.s32 1, %s6458_s23 }
   0x6   : > { %s160_s29 = ssub.s32 %s6462_s24, %s6529_s27  ;;  %p173_p0 = scmp.ne.s32.totalorder %s6458_s23, %s6454_s22 }
   0x7   : > { %p161_p1 = scmp.eq.s32.totalorder %s160_s29, 0  ;;  %p174_p2 = scmp.eq.s32.totalorder %s6525_s25, 1 }
   0x8   : > { %p179_p3 = scmp.ne.s32.totalorder %s6454_s22, %s6450_s21  ;;  %p180_p4 = scmp.eq.s32.totalorder %s5072_s26, 1 }
   0x9   : > { %s6540_s30 = scalar_select %p161_p1, %s6458_s23, %s163_s28  }
   0xa   : > { %p6542_p5 = por %p174_p2, %p173_p0  ;;  %p6546_p6 = por %p180_p4, %p179_p3 }
   0xb   : > { %p5073_p7 = scmp.ge.s32.totalorder %s6462_s24, 1  ;;  %p187_p8 = scmp.lt.s32.totalorder %s6462_s24, 3 }
   0xc   : > { %p6325_p9 = scmp.eq.s32.totalorder %s6525_s25, 0  ;;  %s204_s11 = sshll.u32 %s9124_s4, 4  ;;  %s205_s11 = int_to_ptr.hbm [resolvable:$true] %s204_s11 }
   0xd   : > { %p188_p10 = pnand %p5073_p7, %p187_p8  ;;  %s6464_s12 = smov [#allocation2]  }
   0xe   : > { %s206_s13 = sshll.u32 %s6464_s12, 4  ;;  %s6465_s14 = smov 64   ;;  %s207_s13 = int_to_ptr.vmem [resolvable:$true] %s206_s13 }
   0xf   : > { %p6317_p11 = pneg %p188_p10  ;;  %s6466_s15 = smov 4  }
  0x10   : > { %241 = sbr.rel (%p188_p10) target bundleno = 1554 (0x612), region = 44 }
  0x11   : > { %p6318_p12 = pnand %p6325_p9, %p6317_p11 }
  0x13   : > { %6320 = dma.hbm_to_vmem [thread:$0]  (!%p6318_p12), %s205_s11, 1024, %s207_s13, [#allocation3], %s6465_s14, %s6465_s14, %s6466_s15  }
  0x15   : > { %6441 = dma.done.wait (%p6325_p9), [#allocation3], 1024  }
  0x16   : > { %6443 = vsyncadd (%p6325_p9), [#allocation3], 4294966272  ;;  %p277_p13 = scmp.lt.s32.totalorder %s6525_s25, 1  ;;  %v5965_v0 = vld [vmem:[%s9123_s3 + $0x38] sm:$0xff]  ;;  %v5964_v3 = vld [vmem:[%s9123_s3 + $0x30] sm:$0xff]  ;;  %vm1051_vm0 = vcmask 1046528  }
  0x17   : > { %v6569_v1 = vld [vmem:[%s9122_s2 + $0x38] sm:$0xff]  ;;  %777 = vmatpush.bf16.msra.mxu0 %v5965_v0  ;;  %6286 = vmatpush.bf16.msra.mxu3 %v5965_v0  ;;  %v6585_v4 = vld [vmem:[%s9122_s2 + $0x30] sm:$0xff]  ;;  %v5963_v6 = vld [vmem:[%s9123_s3 + $0x28] sm:$0xff]  ;;  %vm1728_vm1 = vcmask 1045504   ;;  %s6102_s12 = sshll.u32 %s6525_s25, 7 }
  0x18   : > { %v6574_v2 = vld [vmem:[%s9122_s2 + $0x78] sm:$0xff]  ;;  %s278_s28 = scalar_select %p277_p13, %s6525_s25, 1  ;;  %914 = vmatpush.bf16.msra.mxu1 %v6569_v1  ;;  %v6590_v5 = vld [vmem:[%s9122_s2 + $0x70] sm:$0xff]  ;;  %v6600_v7 = vld [vmem:[%s9122_s2 + $0x28] sm:$0xff] }
  0x19   : > { %1405 = vmatpush.bf16.msra.mxu2 %v6574_v2  ;;  %v6605_v8 = vld [vmem:[%s9122_s2 + $0x68] sm:$0xff]  ;;  %v5962_v9 = vld [vmem:[%s9123_s3 + $0x20] sm:$0xff]  ;;  %v5961_v16 = vld [vmem:[%s9123_s3 + $0x18] sm:$0xff]  ;;  %s4982_s16 = scalar_lea.hbm %s9126_s6, %s6102_s12 }
  0x1a   : > { %s6310_s14 = smul.u32 216, %s278_s28  ;;  %v6623_v10 = vld [vmem:[%s9122_s2 + $0x20] sm:$0xff]  ;;  %v6650_v21 = vld [vmem:[%s9122_s2 + $0x18] sm:$0xff]  ;;  %v5960_v32 = vld [vmem:[%s9123_s3 + $0x10] sm:$0xff]  ;;  %s274_s28 = sand.u32 1, %s6454_s22  }
  0x1b   : > { %778 = vmatpush.bf16.msra.mxu0 %v5964_v3  ;;  %6287 = vmatpush.bf16.msra.mxu3 %v5964_v3  ;;  %v6630_v11 = vld [vmem:[%s9122_s2 + $0x60] sm:$0xff]  ;;  %v6655_v22 = vld [vmem:[%s9122_s2 + $0x58] sm:$0xff]  ;;  %v6671_v33 = vld [vmem:[%s9122_s2 + $0x10] sm:$0xff]  ;;  %s5078_s9 = sshll.u32 %s274_s28, 7  ;;  %s4985_s17 = sshll.u32 %s4982_s16, 4  ;;  %s4986_s17 = int_to_ptr.hbm [resolvable:$true] %s4985_s17 }
  0x1c   : > { %915 = vmatpush.bf16.msra.mxu1 %v6585_v4  ;;  %s6610_s29 = scalar_lea.vmem %s9120_s0, %s6310_s14  ;;  %s6615_s11 = scalar_lea.vmem %s9121_s1, %s6310_s14  ;;  %v6676_v34 = vld [vmem:[%s9122_s2 + $0x50] sm:$0xff]  ;;  %v5959_v42 = vld [vmem:[%s9123_s3 + $0x8] sm:$0xff]  ;;  %v5958_v52 = vld [vmem:[%s9123_s3] sm:$0xff] }
  0x1d   : > { %1406 = vmatpush.bf16.msra.mxu2 %v6590_v5  ;;  %v289_v12 = vld [vmem:[%s6610_s29 + $0x8] sm:$0x1]  ;;  %v6104_v14 = vld [vmem:[%s6610_s29] sm:$0xff]   ;;  %v6640_v17 = vld [vmem:[%s6610_s29 + $0x90] sm:$0xff]   ;;  %s9021_s10 = scalar_lea.vmem [#allocation5], %s5078_s9  ;;  %s4971_s25 = scalar_lea.sflag [#allocation4], %s274_s28 }
  0x1e   : > { %v397_v13 = vld [vmem:[%s6615_s11 + $0x8] sm:$0x1]  ;;  %v6140_v15 = vld [vmem:[%s6615_s11] sm:$0xff]   ;;  %v6643_v18 = vld [vmem:[%s6615_s11 + $0x90] sm:$0xff]   ;;  %v343_v19 = vunpack.c.l.bf16 %v289_v12  ;;  %v6105_v23 = vunpack.c.l.bf16 %v6104_v14  ;;  %v6106_v24 = vunpack.c.h.bf16 %v6104_v14  ;;  %v9142_v28 = vunpack.c.l.bf16 %v6640_v17  ;;  %s4983_s14 = sshll.u32 %s9021_s10, 4  ;;  %s6410_s18 = sshra.s32 %s4986_s17, 4  ;;  %s4984_s14 = int_to_ptr.vmem [resolvable:$true] %s4983_s14  ;;  %s6411_s18 = int_to_ptr.hbm [resolvable:$true] %s6410_s18 }
  0x1f   : > { %779 = vmatpush.bf16.msra.mxu0 %v5963_v6  ;;  %6288 = vmatpush.bf16.msra.mxu3 %v5963_v6  ;;  %v451_v20 = vunpack.c.l.bf16 %v397_v13  ;;  %v6141_v25 = vunpack.c.l.bf16 %v6140_v15  ;;  %v6142_v26 = vunpack.c.h.bf16 %v6140_v15  ;;  %v9140_v29 = vunpack.c.h.bf16 %v6640_v17  ;;  %v6700_v43 = vld [vmem:[%s9122_s2 + $0x8] sm:$0xff]  ;;  %v6724_v53 = vld [vmem:[%s9122_s2] sm:$0xff]  ;;  %v5989_v57 = vld [vmem:[%s9122_s2 + $0xb8] sm:$0xff]  ;;  %s6412_s19 = scalar_lea.hbm %s6411_s18, 128  ;;  %p6417_p3 = scmp.lt.s32.totalorder %s6411_s18, %s9126_s6 }
  0x20   : > { %916 = vmatpush.bf16.msra.mxu1 %v6600_v7  ;;  %v9141_v30 = vunpack.c.l.bf16 %v6643_v18  ;;  %v9139_v31 = vunpack.c.h.bf16 %v6643_v18  ;;  %v6705_v44 = vld [vmem:[%s9122_s2 + $0x48] sm:$0xff]  ;;  %v6731_v54 = vld [vmem:[%s9122_s2 + $0x40] sm:$0xff]  ;;  %v6741_v60 = vld [vmem:[%s6610_s29 + $0x14] sm:$0x1]  ;;  %p6413_p0 = scmp.ne.s32.totalorder %s6411_s18, %s6412_s19 }
  0x21   : > { %1407 = vmatpush.bf16.msra.mxu2 %v6605_v8  ;;  %v6657_v27 = vsub.f32 %v343_v19, %v451_v20  ;;  %v6678_v35 = vadd.f32 %v6141_v25, %v6105_v23  ;;  %v6680_v36 = vadd.f32 %v6142_v26, %v6106_v24  ;;  %v6682_v37 = vadd.f32 %v451_v20, %v343_v19  ;;  %v290_v58 = vld [vmem:[%s6610_s29 + $0xc] sm:$0xff]   ;;  %v6744_v61 = vld [vmem:[%s6615_s11 + $0x14] sm:$0x1]  ;;  %v6755_v12 = vld [vmem:[%s6610_s29 + $0x9c] sm:$0xff]  }
  0x22   : > { %v557_v38 = vsub.f32 %v6105_v23, %v6141_v25  ;;  %v558_v39 = vsub.f32 %v6106_v24, %v6142_v26  ;;  %v593_v40 = vsub.f32 %v9142_v28, %v9141_v30  ;;  %v594_v41 = vsub.f32 %v9140_v29, %v9139_v31  ;;  %v398_v59 = vld [vmem:[%s6615_s11 + $0xc] sm:$0xff]   ;;  %v6758_v13 = vld [vmem:[%s6615_s11 + $0x9c] sm:$0xff]   ;;  %v6909_v29 = vld [vmem:[%s6610_s29 + $0xb4] sm:$0xff]   ;;  %p6414_p1 = pnand %p6413_p0, %p6542_p5 }
  0x23   : > { %780 = vmatpush.bf16.msra.mxu0 %v5962_v9  ;;  %6289 = vmatpush.bf16.msra.mxu3 %v5962_v9  ;;  %v1052_v45 = vrot.slane %v6678_v35, 1  ;;  %v1053_v46 = vrot.slane %v6680_v36, 1  ;;  %v1055_v47 = vrot.slane %v6682_v37, 1  ;;  %v665_v0 = vpack.c.bf16 %v6680_v36, %v6678_v35  ;;  %v5997_v14 = vld [vmem:[%s9123_s3 + $0xb8] sm:$0xff] }
  0x24   : > { %917 = vmatpush.bf16.msra.mxu1 %v6623_v10  ;;  %v6710_v48 = vand.u32 2147483647, %v557_v38  ;;  %v6712_v49 = vand.u32 2147483647, %v558_v39  ;;  %v6714_v50 = vand.u32 2147483647, %v593_v40  ;;  %v344_v6 = vunpack.c.l.bf16 %v290_v58  ;;  %p6415_p2 = pneg %p6414_p1 }
  0x25   : > { %1408 = vmatpush.bf16.msra.mxu2 %v6630_v11  ;;  %v6716_v51 = vand.u32 2147483647, %v594_v41  ;;  %v1054_v55 = vsel %vm1051_vm0, %v1052_v45, %v1053_v46  ;;  %v1056_v56 = vsel %vm1051_vm0, %v1053_v46, %v1055_v47  ;;  %v345_v9 = vunpack.c.h.bf16 %v290_v58  ;;  %v5996_v40 = vld [vmem:[%s9123_s3 + $0xb0] sm:$0xff] }
  0x26   : > { %9422 = vst [vmem:[#allocation8_spill] sm:$0xff] %v6714_v50  ;;  %v697_v62 = vpack.c.bf16 %v6712_v49, %v6710_v48  ;;  %v1324_v3 = vpack.c.bf16 %v1056_v56, %v1054_v55  ;;  %v452_v15 = vunpack.c.l.bf16 %v398_v59  ;;  %v9127_v19 = vunpack.c.l.bf16 %v6741_v60  ;;  %v6912_v30 = vld [vmem:[%s6615_s11 + $0xb4] sm:$0xff]  }
  0x27   : > { %781 = vmatpush.bf16.msra.mxu0 %v5961_v16  ;;  %6290 = vmatpush.bf16.msra.mxu3 %v5961_v16  ;;  %9423 = vst [vmem:[#allocation9_spill] sm:$0xff] %v6716_v51  ;;  %v6750_v63 = vpack.c.bf16 %v6716_v51, %v6714_v50  ;;  %v453_v16 = vunpack.c.h.bf16 %v398_v59  ;;  %v9128_v20 = vunpack.c.l.bf16 %v6744_v61  ;;  %v9138_v23 = vunpack.c.l.bf16 %v6755_v12 }
  0x28   : > { %918 = vmatpush.bf16.msra.mxu1 %v6650_v21  ;;  %v9130_v24 = vunpack.c.h.bf16 %v6755_v12  ;;  %v9131_v25 = vunpack.c.l.bf16 %v6758_v13  ;;  %v9129_v26 = vunpack.c.h.bf16 %v6758_v13  ;;  %v560_v41 = vsub.f32 %v344_v6, %v452_v15 }
  0x29   : > { %1409 = vmatpush.bf16.msra.mxu2 %v6655_v22  ;;  %9424 = vst [vmem:[#allocation10_spill] sm:$0xff] %v6750_v63  ;;  %v6778_v38 = vadd.f32 %v453_v16, %v345_v9  ;;  %v6784_v39 = vadd.f32 %v9128_v20, %v9127_v19 }
  0x2a   : > { %v596_v45 = vsub.f32 %v9138_v23, %v9131_v25  ;;  %v597_v46 = vsub.f32 %v9130_v24, %v9129_v26  ;;  %v6801_v55 = vand.u32 2147483647, %v560_v41 }
  0x2b   : > { %782 = vmatpush.bf16.msra.mxu0 %v5960_v32  ;;  %6291 = vmatpush.bf16.msra.mxu3 %v5960_v32  ;;  %v5988_v32 = vld [vmem:[%s9122_s2 + $0xb0] sm:$0xff] }
  0x2c   : > { %919 = vmatpush.bf16.msra.mxu1 %v6671_v33  ;;  %v6808_v58 = vand.u32 2147483647, %v597_v46 }
  0x2d   : > { %1410 = vmatpush.bf16.msra.mxu2 %v6676_v34 }
  0x2e   : > { %9426 = vst [vmem:[#allocation12_spill] sm:$0xff] %v6808_v58 }
  0x2f   : > { %783 = vmatpush.bf16.msra.mxu0 %v5959_v42  ;;  %6292 = vmatpush.bf16.msra.mxu3 %v5959_v42  ;;  %v561_v42 = vsub.f32 %v345_v9, %v453_v16  ;;  %v6819_v9 = vld [vmem:[%s6615_s11 + $0x20] sm:$0x1]  ;;  %v6833_v16 = vld [vmem:[%s6615_s11 + $0xa8] sm:$0xff]  }
  0x30   : > { %920 = vmatpush.bf16.msra.mxu1 %v6700_v43  ;;  %v9134_v19 = vunpack.c.l.bf16 %v6833_v16  ;;  %v9136_v20 = vunpack.c.h.bf16 %v6833_v16  ;;  %v9473_v51 = vunpack.c.h.bf16 %v6833_v16 }
  0x31   : > { %1411 = vmatpush.bf16.msra.mxu2 %v6705_v44  ;;  %v6804_v56 = vand.u32 2147483647, %v561_v42 }
  0x33   : > { %784 = vmatpush.bf16.msra.mxu0 %v5958_v52  ;;  %6293 = vmatpush.bf16.msra.mxu3 %v5958_v52  ;;  %v1060_v52 = vrot.slane %v6784_v39, 1 }
  0x34   : > { %921 = vmatpush.bf16.msra.mxu1 %v6724_v53 }
  0x35   : > { %1412 = vmatpush.bf16.msra.mxu2 %v6731_v54 }
  0x36   : > { %785 = vmatmul.bf16.vlgmr.msra.gmra.mxu0 %v697_v62  ;;  %845 = vmatmul.bf16.vlgmr.msra.gmra.mxu3 %v6750_v63 }
  0x37   : > { %6294 = vmatpush.bf16.msrb.mxu3 %v6569_v1  ;;  %2034 = vmatpush.bf16.msrb.mxu0 %v5989_v57  ;;  %v6776_v1 = vadd.f32 %v452_v15, %v344_v6  ;;  %v6806_v57 = vand.u32 2147483647, %v596_v45  ;;  %v6816_v6 = vld [vmem:[%s6610_s29 + $0x20] sm:$0x1]  ;;  %v6830_v15 = vld [vmem:[%s6610_s29 + $0xa8] sm:$0xff]  }
  0x38   : > { %922 = vmatmul.bf16.vlgmr.msra.gmra.mxu1 %v665_v0  ;;  %1413 = vmatmul.bf16.vlgmr.msra.gmra.mxu2 %v1324_v3  ;;  %v6255_v0 = vld [vmem:[%s6610_s29 + $0x18] sm:$0xff]   ;;  %v9132_v46 = vunpack.c.l.bf16 %v6816_v6 }
  0x39   : > { %2236 = vmatpush.bf16.msrb.mxu1 %v5997_v14  ;;  %v1057_v47 = vrot.slane %v6776_v1, 1  ;;  %9425 = vst [vmem:[#allocation11_spill] sm:$0xff] %v6806_v57  ;;  %v6263_v3 = vld [vmem:[%s6615_s11 + $0x18] sm:$0xff]   ;;  %v6827_v14 = vpack.c.bf16 %v6808_v58, %v6806_v57  ;;  %v6110_v41 = vunpack.c.h.bf16 %v6255_v0  ;;  %v9456_v58 = vunpack.c.l.bf16 %v6758_v13 }
  0x3a   : > { %v6145_v42 = vunpack.c.l.bf16 %v6263_v3  ;;  %v6146_v45 = vunpack.c.h.bf16 %v6263_v3  ;;  %v9459_v57 = vunpack.c.h.bf16 %v6758_v13  ;;  %v5994_v13 = vld [vmem:[%s9123_s3 + $0xa0] sm:$0xff] }
  0x3b   : > { %6295 = vmatpush.bf16.msrb.mxu3 %v6585_v4  ;;  %2035 = vmatpush.bf16.msrb.mxu0 %v5988_v32  ;;  %v1058_v4 = vrot.slane %v6778_v38, 1  ;;  %9428 = vst [vmem:[#allocation14_spill] sm:$0xff] %v6827_v14 }
  0x3c   : > { %v564_v24 = vsub.f32 %v6110_v41, %v6146_v45 }
  0x3d   : > { %2237 = vmatpush.bf16.msrb.mxu1 %v5996_v40  ;;  %v1059_v59 = vsel %vm1051_vm0, %v1057_v47, %v1058_v4  ;;  %v1061_v62 = vsel %vm1051_vm0, %v1058_v4, %v1060_v52  ;;  %v6109_v40 = vunpack.c.l.bf16 %v6255_v0  ;;  %v9133_v47 = vunpack.c.l.bf16 %v6819_v9 }
  0x3e   : > { %v6839_v32 = vpack.c.bf16 %v1061_v62, %v1059_v59  ;;  %v9135_v4 = vunpack.c.l.bf16 %v6830_v15  ;;  %v9137_v52 = vunpack.c.h.bf16 %v6830_v15  ;;  %v5987_v59 = vld [vmem:[%s9122_s2 + $0xa8] sm:$0xff] }
  0x3f   : > { %6296 = vmatpush.bf16.msrb.mxu3 %v6600_v7  ;;  %v6823_v7 = vpack.c.bf16 %v6804_v56, %v6801_v55  ;;  %v5995_v62 = vld [vmem:[%s9123_s3 + $0xa8] sm:$0xff]  ;;  %v563_v0 = vsub.f32 %v6109_v40, %v6145_v42  ;;  %v6858_v3 = vadd.f32 %v6145_v42, %v6109_v40  ;;  %v6866_v26 = vadd.f32 %v9133_v47, %v9132_v46 }
  0x40   : > { %9429 = vst [vmem:[#allocation15_spill] sm:$0xff] %v6839_v32  ;;  %v599_v25 = vsub.f32 %v9135_v4, %v9134_v19  ;;  %v600_v40 = vsub.f32 %v9137_v52, %v9136_v20  ;;  %2036 = vmatpush.bf16.msrb.mxu0 %v5987_v59  ;;  %v6882_v47 = vand.u32 2147483647, %v564_v24  ;;  %v404_v59 = vld [vmem:[%s6615_s11 + $0x24] sm:$0xff]  }
  0x41   : > { %9427 = vst [vmem:[#allocation13_spill] sm:$0xff] %v6823_v7  ;;  %2238 = vmatpush.bf16.msrb.mxu1 %v5995_v62  ;;  %v6877_v42 = vand.u32 2147483647, %v563_v0  ;;  %v1065_v46 = vrot.slane %v6866_v26, 1  ;;  %v6892_v62 = vld [vmem:[%s6610_s29 + $0x2c] sm:$0x1]  ;;  %v458_v23 = vunpack.c.l.bf16 %v404_v59  ;;  %v459_v31 = vunpack.c.h.bf16 %v404_v59 }
  0x42   : > { %v6884_v19 = vand.u32 2147483647, %v599_v25  ;;  %v6886_v4 = vand.u32 2147483647, %v600_v40  ;;  %v6895_v0 = vld [vmem:[%s6615_s11 + $0x2c] sm:$0x1] }
  0x43   : > { %6297 = vmatpush.bf16.msrb.mxu3 %v6623_v10  ;;  %v6837_v10 = vpack.c.bf16 %v6778_v38, %v6776_v1  ;;  %v6901_v24 = vpack.c.bf16 %v6882_v47, %v6877_v42 }
  0x44   : > { %9430 = vst [vmem:[#allocation16_spill] sm:$0xff] %v6884_v19  ;;  %v6905_v25 = vpack.c.bf16 %v6886_v4, %v6884_v19  ;;  %v9455_v19 = vunpack.c.l.bf16 %v6755_v12 }
  0x45   : > { %9431 = vst [vmem:[#allocation17_spill] sm:$0xff] %v6886_v4  ;;  %2239 = vmatpush.bf16.msrb.mxu1 %v5994_v13 }
  0x46   : > { %790 = vmatmul.bf16.gmra.mxu0 %v6823_v7  ;;  %850 = vmatmul.bf16.gmra.mxu3 %v6827_v14  ;;  %9432 = vst [vmem:[#allocation18_spill] sm:$0xff] %v6901_v24  ;;  %v9439_v14 = vunpack.c.h.bf16 %v6640_v17  ;;  %v6982_v7 = vld [vmem:[%s6615_s11 + $0x38] sm:$0x1] }
  0x47   : > { %6298 = vmatpush.bf16.msrb.mxu3 %v6650_v21  ;;  %v6860_v21 = vadd.f32 %v6146_v45, %v6110_v41  ;;  %v1062_v41 = vrot.slane %v6858_v3, 1  ;;  %9433 = vst [vmem:[#allocation19_spill] sm:$0xff] %v6905_v25  ;;  %v9171_v4 = vunpack.c.l.bf16 %v6982_v7 }
  0x48   : > { %927 = vmatmul.bf16.gmra.mxu1 %v6837_v10  ;;  %1418 = vmatmul.bf16.gmra.mxu2 %v6839_v32  ;;  %v9150_v32 = vunpack.c.l.bf16 %v6912_v30  ;;  %9450 = vst [vmem:[#allocation29_spill] sm:$0xff] %v6982_v7 }
  0x49   : > { %v1063_v45 = vrot.slane %v6860_v21, 1 }
  0x4b   : > { %6299 = vmatpush.bf16.msrb.mxu3 %v6671_v33  ;;  %v296_v33 = vld [vmem:[%s6610_s29 + $0x24] sm:$0xff]   ;;  %v1064_v20 = vsel %vm1051_vm0, %v1062_v41, %v1063_v45  ;;  %v1066_v52 = vsel %vm1051_vm0, %v1063_v45, %v1065_v46  ;;  %v6919_v45 = vpack.c.bf16 %v6860_v21, %v6858_v3  ;;  %v9440_v46 = vunpack.c.h.bf16 %v6643_v18 }
  0x4c   : > { %v350_v40 = vunpack.c.l.bf16 %v296_v33  ;;  %v6921_v28 = vpack.c.bf16 %v1066_v52, %v1064_v20  ;;  %v9152_v20 = vunpack.c.h.bf16 %v6912_v30 }
  0x4d   : > { %9434 = vst [vmem:[#allocation20_spill] sm:$0xff] %v6919_v45  ;;  %v6933_v63 = vadd.f32 %v9440_v46, %v9439_v14 }
  0x4e   : > { %9435 = vst [vmem:[#allocation21_spill] sm:$0xff] %v6921_v28  ;;  %v6941_v52 = vadd.f32 %v458_v23, %v350_v40  ;;  %v566_v46 = vsub.f32 %v350_v40, %v458_v23 }
  0x4f   : > { %6300 = vmatpush.bf16.msrb.mxu3 %v6700_v43  ;;  %v351_v43 = vunpack.c.h.bf16 %v296_v33  ;;  %v9437_v33 = vunpack.c.l.bf16 %v6643_v18  ;;  %9441 = vst [vmem:[#allocation23_spill] sm:$0xff] %v6933_v63  ;;  %v9444_v18 = vunpack.c.l.bf16 %v6895_v0 }
  0x53   : > { %6301 = vmatpush.bf16.msrb.mxu3 %v6724_v53  ;;  %v9436_v53 = vunpack.c.l.bf16 %v6640_v17  ;;  %v9443_v17 = vunpack.c.l.bf16 %v6892_v62 }
  0x55   : > { %v6927_v59 = vadd.f32 %v9437_v33, %v9436_v53  ;;  %v6943_v53 = vadd.f32 %v459_v31, %v351_v43  ;;  %v6949_v14 = vadd.f32 %v9444_v18, %v9443_v17  ;;  %v567_v33 = vsub.f32 %v351_v43, %v459_v31 }
  0x56   : > { %795 = vmatmul.bf16.gmra.mxu0 %v6901_v24  ;;  %855 = vmatmul.bf16.gmra.mxu3 %v6905_v25  ;;  %v9446_v17 = vunpack.c.h.bf16 %v6909_v29  ;;  %v1067_v25 = vrot.slane %v6941_v52, 1  ;;  %v6979_v24 = vld [vmem:[%s6610_s29 + $0x38] sm:$0x1] }
  0x57   : > { %6302 = vmatpush.bf16.msra.mxu3 %v6574_v2  ;;  %9438 = vst [vmem:[#allocation22_spill] sm:$0xff] %v6927_v59  ;;  %v9151_v2 = vunpack.c.l.bf16 %v6909_v29  ;;  %v1068_v23 = vrot.slane %v6943_v53, 1  ;;  %v1070_v40 = vrot.slane %v6949_v14, 1  ;;  %v6968_v31 = vand.u32 2147483647, %v567_v33 }
  0x58   : > { %9442 = vst [vmem:[#allocation24_spill] sm:$0xff] %v6943_v53  ;;  %932 = vmatmul.bf16.gmra.mxu1 %v6919_v45  ;;  %1423 = vmatmul.bf16.gmra.mxu2 %v6921_v28  ;;  %v603_v18 = vsub.f32 %v9446_v17, %v9152_v20  ;;  %v6256_v20 = vld [vmem:[%s6610_s29 + $0x30] sm:$0xff]   ;;  %v7064_v13 = vpack.c.bf16 %v6933_v63, %v6927_v59 }
  0x59   : > { %9445 = vst [vmem:[#allocation25_spill] sm:$0xff] %v6949_v14  ;;  %v602_v41 = vsub.f32 %v9151_v2, %v9150_v32  ;;  %v1069_v2 = vsel %vm1051_vm0, %v1067_v25, %v1068_v23  ;;  %v1071_v17 = vsel %vm1051_vm0, %v1068_v23, %v1070_v40  ;;  %v6264_v28 = vld [vmem:[%s6615_s11 + $0x30] sm:$0xff]   ;;  %v6995_v25 = vpack.c.bf16 %v6943_v53, %v6941_v52 }
  0x5a   : > { %v6972_v32 = vand.u32 2147483647, %v603_v18  ;;  %9449 = vst [vmem:[#allocation28_spill] sm:$0xff] %v6979_v24  ;;  %v6113_v33 = vunpack.c.l.bf16 %v6256_v20  ;;  %v6114_v18 = vunpack.c.h.bf16 %v6256_v20  ;;  %v6149_v23 = vunpack.c.l.bf16 %v6264_v28 }
  0x5b   : > { %6303 = vmatpush.bf16.msra.mxu3 %v6590_v5  ;;  %v6965_v5 = vand.u32 2147483647, %v566_v46  ;;  %v6970_v43 = vand.u32 2147483647, %v602_v41  ;;  %9453 = vst [vmem:[#allocation32_spill] sm:$0xff] %v6995_v25  ;;  %v6997_v46 = vpack.c.bf16 %v1071_v17, %v1069_v2  ;;  %v6150_v40 = vunpack.c.h.bf16 %v6264_v28 }
  0x5c   : > { %9448 = vst [vmem:[#allocation27_spill] sm:$0xff] %v6972_v32  ;;  %v7018_v28 = vadd.f32 %v6149_v23, %v6113_v33 }
  0x5d   : > { %9447 = vst [vmem:[#allocation26_spill] sm:$0xff] %v6970_v43  ;;  %v6991_v41 = vpack.c.bf16 %v6972_v32, %v6970_v43  ;;  %v7005_v32 = vadd.f32 %v9456_v58, %v9455_v19  ;;  %v9458_v43 = vunpack.c.h.bf16 %v6755_v12  ;;  %v7020_v19 = vadd.f32 %v6150_v40, %v6114_v18 }
  0x5e   : > { %9454 = vst [vmem:[#allocation33_spill] sm:$0xff] %v6997_v46  ;;  %v570_v58 = vsub.f32 %v6114_v18, %v6150_v40  ;;  %v1072_v20 = vrot.slane %v7018_v28, 1  ;;  %v410_v18 = vld [vmem:[%s6615_s11 + $0x3c] sm:$0xff]   ;;  %v7051_v40 = vld [vmem:[%s6615_s11 + $0x44] sm:$0x1] }
  0x5f   : > { %6304 = vmatpush.bf16.msra.mxu3 %v6605_v8  ;;  %v6987_v8 = vpack.c.bf16 %v6968_v31, %v6965_v5  ;;  %9452 = vst [vmem:[#allocation31_spill] sm:$0xff] %v6991_v41  ;;  %v7011_v2 = vadd.f32 %v9459_v57, %v9458_v43  ;;  %v569_v57 = vsub.f32 %v6113_v33, %v6149_v23  ;;  %v1073_v43 = vrot.slane %v7020_v19, 1  ;;  %v302_v33 = vld [vmem:[%s6610_s29 + $0x3c] sm:$0xff]   ;;  %v7048_v23 = vld [vmem:[%s6610_s29 + $0x44] sm:$0x1] }
  0x60   : > { %9457 = vst [vmem:[#allocation34_spill] sm:$0xff] %v7005_v32 }
  0x61   : > { %9451 = vst [vmem:[#allocation30_spill] sm:$0xff] %v6987_v8 }
  0x62   : > { %9460 = vst [vmem:[#allocation35_spill] sm:$0xff] %v7011_v2 }
  0x63   : > { %6305 = vmatpush.bf16.msra.mxu3 %v6630_v11  ;;  %v9170_v11 = vunpack.c.l.bf16 %v6979_v24  ;;  %9461 = vst [vmem:[#allocation36_spill] sm:$0xff] %v7018_v28 }
  0x64   : > { %9462 = vst [vmem:[#allocation37_spill] sm:$0xff] %v7020_v19 }
  0x65   : > { %v7026_v12 = vadd.f32 %v9171_v4, %v9170_v11  ;;  %v7039_v11 = vand.u32 2147483647, %v569_v57  ;;  %v7041_v4 = vand.u32 2147483647, %v570_v58  ;;  %9466 = vst [vmem:[#allocation41_spill] sm:$0xff] %v7048_v23  ;;  %v356_v58 = vunpack.c.l.bf16 %v302_v33 }
  0x66   : > { %800 = vmatmul.bf16.gmra.mxu0 %v6987_v8  ;;  %860 = vmatmul.bf16.gmra.mxu3 %v6991_v41  ;;  %v1074_v41 = vsel %vm1051_vm0, %v1072_v20, %v1073_v43  ;;  %9467 = vst [vmem:[#allocation42_spill] sm:$0xff] %v7051_v40  ;;  %v357_v20 = vunpack.c.h.bf16 %v302_v33  ;;  %v9472_v8 = vunpack.c.h.bf16 %v6830_v15  ;;  %v5993_v33 = vld [vmem:[%s9123_s3 + $0x98] sm:$0xff] }
  0x67   : > { %6306 = vmatpush.bf16.msra.mxu3 %v6655_v22  ;;  %9463 = vst [vmem:[#allocation38_spill] sm:$0xff] %v7026_v12  ;;  %v5986_v22 = vld [vmem:[%s9122_s2 + $0xa0] sm:$0xff]  ;;  %v1075_v17 = vrot.slane %v7026_v12, 1  ;;  %2240 = vmatpush.bf16.msrb.mxu1 %v5993_v33 }
  0x68   : > { %937 = vmatmul.bf16.gmra.mxu1 %v6995_v25  ;;  %1428 = vmatmul.bf16.gmra.mxu2 %v6997_v46  ;;  %9464 = vst [vmem:[#allocation39_spill] sm:$0xff] %v7039_v11  ;;  %v9189_v46 = vunpack.c.l.bf16 %v7051_v40  ;;  %v7074_v50 = vadd.f32 %v9473_v51, %v9472_v8  ;;  %v5985_v8 = vld [vmem:[%s9122_s2 + $0x98] sm:$0xff] }
  0x69   : > { %2037 = vmatpush.bf16.msrb.mxu0 %v5986_v22  ;;  %9465 = vst [vmem:[#allocation40_spill] sm:$0xff] %v7041_v4  ;;  %v7056_v22 = vpack.c.bf16 %v7041_v4, %v7039_v11 }
  0x6a   : > { %9470 = vst [vmem:[#allocation45_spill] sm:$0xff] %v7064_v13 }
  0x6b   : > { %6307 = vmatpush.bf16.msra.mxu3 %v6676_v34  ;;  %v1076_v34 = vsel %vm1051_vm0, %v1073_v43, %v1075_v17  ;;  %9468 = vst [vmem:[#allocation43_spill] sm:$0xff] %v7056_v22  ;;  %v464_v43 = vunpack.c.l.bf16 %v410_v18  ;;  %v465_v17 = vunpack.c.h.bf16 %v410_v18 }
  0x6c   : > { %v7066_v57 = vpack.c.bf16 %v1076_v34, %v1074_v41  ;;  %9474 = vst [vmem:[#allocation47_spill] sm:$0xff] %v7074_v50 }
  0x6d   : > { %v7080_v41 = vadd.f32 %v464_v43, %v356_v58  ;;  %v7082_v34 = vadd.f32 %v465_v17, %v357_v20  ;;  %v572_v18 = vsub.f32 %v356_v58, %v464_v43  ;;  %2038 = vmatpush.bf16.msrb.mxu0 %v5985_v8  ;;  %v7108_v58 = vld [vmem:[%s6610_s29 + $0x50] sm:$0x1] }
  0x6e   : > { %9471 = vst [vmem:[#allocation46_spill] sm:$0xff] %v7066_v57 }
  0x6f   : > { %6308 = vmatpush.bf16.msra.mxu3 %v6705_v44  ;;  %v7060_v44 = vpack.c.bf16 %v7020_v19, %v7018_v28  ;;  %9475 = vst [vmem:[#allocation48_spill] sm:$0xff] %v7080_v41  ;;  %v6257_v19 = vld [vmem:[%s6610_s29 + $0x48] sm:$0xff]  }
  0x70   : > { %9476 = vst [vmem:[#allocation49_spill] sm:$0xff] %v7082_v34  ;;  %v6265_v28 = vld [vmem:[%s6615_s11 + $0x48] sm:$0xff]  }
  0x71   : > { %9469 = vst [vmem:[#allocation44_spill] sm:$0xff] %v7060_v44  ;;  %v6153_v8 = vunpack.c.l.bf16 %v6265_v28  ;;  %v6154_v33 = vunpack.c.h.bf16 %v6265_v28 }
  0x72   : > { %9480 = vst [vmem:[#allocation53_spill] sm:$0xff] %v7108_v58 }
  0x73   : > { %6309 = vmatpush.bf16.msra.mxu3 %v6731_v54  ;;  %v9188_v54 = vunpack.c.l.bf16 %v7048_v23 }
  0x75   : > { %v7088_v51 = vadd.f32 %v9189_v46, %v9188_v54  ;;  %v7099_v46 = vand.u32 2147483647, %v572_v18  ;;  %v9211_v18 = vunpack.c.l.bf16 %v7108_v58  ;;  %v9492_v58 = vunpack.c.l.bf16 %v6833_v16 }
  0x76   : > { %805 = vmatmul.bf16.gmra.mxu0 %v7056_v22  ;;  %982 = vmatmul.bf16.vlgmr.msrb.gmra.mxu3 %v7064_v13  ;;  %v1077_v22 = vrot.slane %v7080_v41, 1  ;;  %v1078_v13 = vrot.slane %v7082_v34, 1 }
  0x77   : > { %9477 = vst [vmem:[#allocation50_spill] sm:$0xff] %v7088_v51  ;;  %v1080_v54 = vrot.slane %v7088_v51, 1 }
  0x78   : > { %942 = vmatmul.bf16.gmra.mxu1 %v7060_v44  ;;  %1433 = vmatmul.bf16.gmra.mxu2 %v7066_v57  ;;  %v573_v57 = vsub.f32 %v357_v20, %v465_v17  ;;  %9478 = vst [vmem:[#allocation51_spill] sm:$0xff] %v7099_v46  ;;  %v1079_v40 = vsel %vm1051_vm0, %v1077_v22, %v1078_v13  ;;  %v7111_v20 = vld [vmem:[%s6615_s11 + $0x50] sm:$0x1] }
  0x79   : > { %v1081_v12 = vsel %vm1051_vm0, %v1078_v13, %v1080_v54  ;;  %9481 = vst [vmem:[#allocation54_spill] sm:$0xff] %v7111_v20  ;;  %v7119_v17 = vpack.c.bf16 %v7082_v34, %v7080_v41  ;;  %v6117_v13 = vunpack.c.l.bf16 %v6257_v19  ;;  %v6118_v54 = vunpack.c.h.bf16 %v6257_v19 }
  0x7a   : > { %v7101_v23 = vand.u32 2147483647, %v573_v57  ;;  %v7123_v57 = vpack.c.bf16 %v7011_v2, %v7005_v32  ;;  %v7125_v22 = vpack.c.bf16 %v1081_v12, %v1079_v40  ;;  %v9212_v51 = vunpack.c.l.bf16 %v7111_v20  ;;  %v7238_v20 = vld [vmem:[%s6610_s29 + $0x68] sm:$0x1] }
  0x7b   : > { %9483 = vst [vmem:[#allocation56_spill] sm:$0xff] %v7119_v17  ;;  %v7133_v12 = vadd.f32 %v6153_v8, %v6117_v13  ;;  %v7135_v19 = vadd.f32 %v6154_v33, %v6118_v54  ;;  %v575_v40 = vsub.f32 %v6117_v13, %v6153_v8  ;;  %v416_v8 = vld [vmem:[%s6615_s11 + $0x54] sm:$0xff]  }
  0x7c   : > { %9479 = vst [vmem:[#allocation52_spill] sm:$0xff] %v7101_v23  ;;  %v7115_v43 = vpack.c.bf16 %v7101_v23, %v7099_v46  ;;  %v7141_v28 = vadd.f32 %v9212_v51, %v9211_v18  ;;  %v9491_v46 = vunpack.c.l.bf16 %v6830_v15  ;;  %v7164_v51 = vld [vmem:[%s6615_s11 + $0x5c] sm:$0x1] }
  0x7d   : > { %9484 = vst [vmem:[#allocation57_spill] sm:$0xff] %v7123_v57  ;;  %v1083_v34 = vrot.slane %v7135_v19, 1  ;;  %v7146_v41 = vand.u32 2147483647, %v575_v40  ;;  %v7172_v15 = vpack.c.bf16 %v7135_v19, %v7133_v12 }
  0x7e   : > { %9482 = vst [vmem:[#allocation55_spill] sm:$0xff] %v7115_v43 }
  0x7f   : > { %9485 = vst [vmem:[#allocation58_spill] sm:$0xff] %v7125_v22 }
  0x80   : > { %9486 = vst [vmem:[#allocation59_spill] sm:$0xff] %v7133_v12 }
  0x81   : > { %9487 = vst [vmem:[#allocation60_spill] sm:$0xff] %v7135_v19 }
  0x82   : > { %9488 = vst [vmem:[#allocation61_spill] sm:$0xff] %v7141_v28 }
  0x83   : > { %9489 = vst [vmem:[#allocation62_spill] sm:$0xff] %v7146_v41 }
  0x84   : > { %9495 = vst [vmem:[#allocation66_spill] sm:$0xff] %v7164_v51 }
  0x85   : > { %9497 = vst [vmem:[#allocation68_spill] sm:$0xff] %v7172_v15 }
  0x86   : > { %810 = vmatmul.bf16.gmra.mxu0 %v7115_v43  ;;  %987 = vmatmul.bf16.gmra.mxu3 %v7123_v57  ;;  %v576_v43 = vsub.f32 %v6118_v54, %v6154_v33  ;;  %v1082_v57 = vrot.slane %v7133_v12, 1  ;;  %v308_v54 = vld [vmem:[%s6610_s29 + $0x54] sm:$0xff]   ;;  %v7161_v33 = vld [vmem:[%s6610_s29 + $0x5c] sm:$0x1]  ;;  %9512 = vst [vmem:[#allocation79_spill] sm:$0xff] %v7238_v20 }
  0x87   : > { %9494 = vst [vmem:[#allocation65_spill] sm:$0xff] %v7161_v33  ;;  %v9219_v40 = vunpack.c.l.bf16 %v7161_v33 }
  0x88   : > { %947 = vmatmul.bf16.gmra.mxu1 %v7119_v17  ;;  %1438 = vmatmul.bf16.gmra.mxu2 %v7125_v22  ;;  %v1085_v22 = vrot.slane %v7141_v28, 1  ;;  %v7148_v23 = vand.u32 2147483647, %v576_v43  ;;  %v7154_v17 = vadd.f32 %v9492_v58, %v9491_v46  ;;  %v1084_v18 = vsel %vm1051_vm0, %v1082_v57, %v1083_v34 }
  0x89   : > { %v363_v58 = vunpack.c.h.bf16 %v308_v54  ;;  %v470_v57 = vunpack.c.l.bf16 %v416_v8  ;;  %v9220_v28 = vunpack.c.l.bf16 %v7164_v51 }
  0x8a   : > { %9490 = vst [vmem:[#allocation63_spill] sm:$0xff] %v7148_v23  ;;  %v1086_v13 = vsel %vm1051_vm0, %v1083_v34, %v1085_v22  ;;  %v7168_v43 = vpack.c.bf16 %v7148_v23, %v7146_v41  ;;  %v7176_v16 = vpack.c.bf16 %v7074_v50, %v7154_v17  ;;  %v362_v34 = vunpack.c.l.bf16 %v308_v54  ;;  %v5981_v54 = vld [vmem:[%s9123_s3 + $0x78] sm:$0xff] }
  0x8b   : > { %9493 = vst [vmem:[#allocation64_spill] sm:$0xff] %v7154_v17  ;;  %v7178_v46 = vpack.c.bf16 %v1086_v13, %v1084_v18  ;;  %v471_v22 = vunpack.c.h.bf16 %v416_v8  ;;  %v7194_v13 = vadd.f32 %v9220_v28, %v9219_v40  ;;  %v5984_v8 = vld [vmem:[%s9122_s2 + $0x90] sm:$0xff]  ;;  %1607 = vmatpush.bf16.msrb.mxu3 %v5981_v54  ;;  %v7234_v41 = vld [vmem:[%s6615_s11 + $0x98] sm:$0x1] }
  0x8c   : > { %9496 = vst [vmem:[#allocation67_spill] sm:$0xff] %v7168_v43  ;;  %v7186_v19 = vadd.f32 %v470_v57, %v362_v34  ;;  %2039 = vmatpush.bf16.msrb.mxu0 %v5984_v8  ;;  %v5980_v54 = vld [vmem:[%s9123_s3 + $0x70] sm:$0xff] }
  0x8d   : > { %9498 = vst [vmem:[#allocation69_spill] sm:$0xff] %v7176_v16  ;;  %v7188_v18 = vadd.f32 %v471_v22, %v363_v58  ;;  %v579_v40 = vsub.f32 %v363_v58, %v471_v22  ;;  %v1090_v33 = vrot.slane %v7194_v13, 1  ;;  %v9508_v22 = vunpack.c.h.bf16 %v6912_v30 }
  0x8e   : > { %9499 = vst [vmem:[#allocation70_spill] sm:$0xff] %v7178_v46  ;;  %v1087_v28 = vrot.slane %v7186_v19, 1 }
  0x8f   : > { %9500 = vst [vmem:[#allocation71_spill] sm:$0xff] %v7186_v19  ;;  %v7213_v8 = vand.u32 2147483647, %v579_v40  ;;  %1608 = vmatpush.bf16.msrb.mxu3 %v5980_v54  ;;  %v7231_v40 = vld [vmem:[%s6610_s29 + $0x98] sm:$0x1] }
  0x90   : > { %9501 = vst [vmem:[#allocation72_spill] sm:$0xff] %v7188_v18 }
  0x91   : > { %9502 = vst [vmem:[#allocation73_spill] sm:$0xff] %v7194_v13 }
  0x92   : > { %9504 = vst [vmem:[#allocation75_spill] sm:$0xff] %v7213_v8 }
  0x93   : > { %9510 = vst [vmem:[#allocation77_spill] sm:$0xff] %v7231_v40 }
  0x94   : > { %9511 = vst [vmem:[#allocation78_spill] sm:$0xff] %v7234_v41 }
  0x96   : > { %815 = vmatmul.bf16.gmra.mxu0 %v7168_v43  ;;  %992 = vmatmul.bf16.gmra.mxu3 %v7176_v16  ;;  %v578_v43 = vsub.f32 %v362_v34, %v470_v57  ;;  %v1088_v16 = vrot.slane %v7188_v18, 1  ;;  %v9505_v34 = vunpack.c.l.bf16 %v6909_v29  ;;  %v9507_v57 = vunpack.c.h.bf16 %v6909_v29 }
  0x98   : > { %952 = vmatmul.bf16.gmra.mxu1 %v7172_v15  ;;  %1443 = vmatmul.bf16.gmra.mxu2 %v7178_v46  ;;  %v5992_v46 = vld [vmem:[%s9123_s3 + $0x90] sm:$0xff]  ;;  %v7211_v51 = vand.u32 2147483647, %v578_v43  ;;  %v7225_v12 = vadd.f32 %v9508_v22, %v9507_v57  ;;  %v1089_v13 = vsel %vm1051_vm0, %v1087_v28, %v1088_v16  ;;  %v1091_v23 = vsel %vm1051_vm0, %v1088_v16, %v1090_v33  ;;  %v6258_v43 = vld [vmem:[%s6610_s29 + $0x60] sm:$0xff]  }
  0x99   : > { %2241 = vmatpush.bf16.msrb.mxu1 %v5992_v46  ;;  %v9506_v46 = vunpack.c.l.bf16 %v6912_v30  ;;  %v6266_v15 = vld [vmem:[%s6615_s11 + $0x60] sm:$0xff]   ;;  %v7249_v30 = vpack.c.bf16 %v7188_v18, %v7186_v19  ;;  %v7255_v33 = vpack.c.bf16 %v1091_v23, %v1089_v13  ;;  %v6121_v16 = vunpack.c.l.bf16 %v6258_v43  ;;  %v422_v18 = vld [vmem:[%s6615_s11 + $0x6c] sm:$0xff]   ;;  %v7319_v19 = vld [vmem:[%s6610_s29 + $0x74] sm:$0x1] }
  0x9a   : > { %9503 = vst [vmem:[#allocation74_spill] sm:$0xff] %v7211_v51  ;;  %v7245_v29 = vpack.c.bf16 %v7213_v8, %v7211_v51  ;;  %v6122_v54 = vunpack.c.h.bf16 %v6258_v43  ;;  %v9247_v57 = vunpack.c.l.bf16 %v7234_v41  ;;  %v6157_v22 = vunpack.c.l.bf16 %v6266_v15 }
  0x9b   : > { %v7219_v58 = vadd.f32 %v9506_v46, %v9505_v34  ;;  %9509 = vst [vmem:[#allocation76_spill] sm:$0xff] %v7225_v12  ;;  %v7241_v34 = vld [vmem:[%s6615_s11 + $0x68] sm:$0x1]  ;;  %v9246_v46 = vunpack.c.l.bf16 %v7231_v40  ;;  %v6158_v4 = vunpack.c.h.bf16 %v6266_v15  ;;  %v9251_v8 = vunpack.c.l.bf16 %v7238_v20 }
  0x9c   : > { %9513 = vst [vmem:[#allocation80_spill] sm:$0xff] %v7241_v34  ;;  %v5979_v15 = vld [vmem:[%s9123_s3 + $0x68] sm:$0xff]  ;;  %v581_v13 = vsub.f32 %v6121_v16, %v6157_v22  ;;  %v7274_v43 = vadd.f32 %v6157_v22, %v6121_v16  ;;  %v477_v11 = vunpack.c.h.bf16 %v422_v18 }
  0x9d   : > { %9514 = vst [vmem:[#allocation81_spill] sm:$0xff] %v7245_v29  ;;  %v7253_v28 = vpack.c.bf16 %v7225_v12, %v7219_v58  ;;  %v7269_v23 = vadd.f32 %v9247_v57, %v9246_v46  ;;  %v7276_v51 = vadd.f32 %v6158_v4, %v6122_v54  ;;  %1609 = vmatpush.bf16.msrb.mxu3 %v5979_v15  ;;  %v1112_v46 = vrot.slane %v6927_v59, 1  ;;  %v5983_v15 = vld [vmem:[%s9122_s2 + $0x88] sm:$0xff] }
  0x9e   : > { %9515 = vst [vmem:[#allocation82_spill] sm:$0xff] %v7249_v30  ;;  %v1113_v57 = vrot.slane %v6933_v63, 1  ;;  %v7287_v16 = vand.u32 2147483647, %v581_v13  ;;  %v1092_v22 = vrot.slane %v7274_v43, 1  ;;  %2040 = vmatpush.bf16.msrb.mxu0 %v5983_v15 }
  0x9f   : > { %9516 = vst [vmem:[#allocation83_spill] sm:$0xff] %v7253_v28  ;;  %v1115_v40 = vrot.slane %v7269_v23, 1  ;;  %v1093_v41 = vrot.slane %v7276_v51, 1  ;;  %v7304_v13 = vld [vmem:[%s6610_s29 + $0xa4] sm:$0x1] }
  0xa0   : > { %9517 = vst [vmem:[#allocation84_spill] sm:$0xff] %v7255_v33 }
  0xa1   : > { %9518 = vst [vmem:[#allocation85_spill] sm:$0xff] %v7269_v23  ;;  %v1114_v23 = vsel %vm1051_vm0, %v1112_v46, %v1113_v57  ;;  %v1116_v63 = vsel %vm1051_vm0, %v1113_v57, %v1115_v40  ;;  %v1094_v59 = vsel %vm1051_vm0, %v1092_v22, %v1093_v41  ;;  %v9273_v46 = vunpack.c.l.bf16 %v7319_v19 }
  0xa2   : > { %9519 = vst [vmem:[#allocation86_spill] sm:$0xff] %v7274_v43  ;;  %v7330_v57 = vpack.c.bf16 %v1116_v63, %v1114_v23  ;;  %v9533_v63 = vunpack.c.l.bf16 %v7304_v13 }
  0xa3   : > { %9520 = vst [vmem:[#allocation87_spill] sm:$0xff] %v7276_v51 }
  0xa4   : > { %9523 = vst [vmem:[#allocation89_spill] sm:$0xff] %v7287_v16 }
  0xa5   : > { %9525 = vst [vmem:[#allocation91_spill] sm:$0xff] %v7304_v13  ;;  %v6259_v13 = vld [vmem:[%s6610_s29 + $0x78] sm:$0xff]  }
  0xa6   : > { %820 = vmatmul.bf16.gmra.mxu0 %v7245_v29  ;;  %997 = vmatmul.bf16.gmra.mxu3 %v7253_v28  ;;  %v582_v28 = vsub.f32 %v6122_v54, %v6158_v4  ;;  %v6005_v4 = vld [vmem:[%s9122_s2 + $0xf8] sm:$0xff]  ;;  %v5978_v54 = vld [vmem:[%s9123_s3 + $0x60] sm:$0xff]  ;;  %9527 = vst [vmem:[#allocation93_spill] sm:$0xff] %v7319_v19  ;;  %v7394_v19 = vld [vmem:[%s6615_s11 + $0xb0] sm:$0x1] }
  0xa7   : > { %2423 = vmatpush.bf16.msrb.mxu2 %v6005_v4  ;;  %1610 = vmatpush.bf16.msrb.mxu3 %v5978_v54  ;;  %9530 = vst [vmem:[#allocation96_spill] sm:$0xff] %v7330_v57  ;;  %v476_v54 = vunpack.c.l.bf16 %v422_v18  ;;  %v5977_v18 = vld [vmem:[%s9123_s3 + $0x58] sm:$0xff] }
  0xa8   : > { %957 = vmatmul.bf16.gmra.mxu1 %v7249_v30  ;;  %1448 = vmatmul.bf16.gmra.mxu2 %v7255_v33  ;;  %v9521_v33 = vunpack.c.l.bf16 %v7241_v34  ;;  %v314_v34 = vld [vmem:[%s6610_s29 + $0x6c] sm:$0xff]   ;;  %v7322_v30 = vld [vmem:[%s6615_s11 + $0x74] sm:$0x1]  ;;  %9545 = vst [vmem:[#allocation109_spill] sm:$0xff] %v7394_v19 }
  0xa9   : > { %9528 = vst [vmem:[#allocation94_spill] sm:$0xff] %v7322_v30  ;;  %v368_v4 = vunpack.c.l.bf16 %v314_v34  ;;  %v9274_v44 = vunpack.c.l.bf16 %v7322_v30  ;;  %v6125_v30 = vunpack.c.l.bf16 %v6259_v13 }
  0xaa   : > { %v7282_v29 = vadd.f32 %v9521_v33, %v9251_v8  ;;  %v7292_v33 = vand.u32 2147483647, %v582_v28  ;;  %v7307_v8 = vld [vmem:[%s6615_s11 + $0xa4] sm:$0x1]  ;;  %v5991_v28 = vld [vmem:[%s9123_s3 + $0x88] sm:$0xff] }
  0xab   : > { %9526 = vst [vmem:[#allocation92_spill] sm:$0xff] %v7307_v8  ;;  %2242 = vmatpush.bf16.msrb.mxu1 %v5991_v28  ;;  %v369_v28 = vunpack.c.h.bf16 %v314_v34  ;;  %v9534_v23 = vunpack.c.l.bf16 %v7307_v8  ;;  %v584_v34 = vsub.f32 %v368_v4, %v476_v54  ;;  %1611 = vmatpush.bf16.msrb.mxu3 %v5977_v18  ;;  %v6267_v8 = vld [vmem:[%s6615_s11 + $0x78] sm:$0xff]  }
  0xac   : > { %9522 = vst [vmem:[#allocation88_spill] sm:$0xff] %v7282_v29  ;;  %v1095_v20 = vrot.slane %v7282_v29, 1  ;;  %v7328_v40 = vpack.c.bf16 %v7292_v33, %v7287_v16 }
  0xad   : > { %9524 = vst [vmem:[#allocation90_spill] sm:$0xff] %v7292_v33  ;;  %v7344_v16 = vadd.f32 %v9534_v23, %v9533_v63  ;;  %v1117_v23 = vrot.slane %v7005_v32, 1 }
  0xae   : > { %v1096_v29 = vsel %vm1051_vm0, %v1093_v41, %v1095_v20  ;;  %9529 = vst [vmem:[#allocation95_spill] sm:$0xff] %v7328_v40  ;;  %v7334_v41 = vpack.c.bf16 %v7276_v51, %v7274_v43  ;;  %v6126_v51 = vunpack.c.h.bf16 %v6259_v13  ;;  %v6161_v43 = vunpack.c.l.bf16 %v6267_v8 }
  0xaf   : > { %v7336_v20 = vpack.c.bf16 %v1096_v29, %v1094_v59  ;;  %9535 = vst [vmem:[#allocation99_spill] sm:$0xff] %v7344_v16  ;;  %v7350_v59 = vadd.f32 %v476_v54, %v368_v4  ;;  %v585_v29 = vsub.f32 %v369_v28, %v477_v11 }
  0xb0   : > { %9531 = vst [vmem:[#allocation97_spill] sm:$0xff] %v7334_v41  ;;  %v7424_v24 = vadd.f32 %v6161_v43, %v6125_v30 }
  0xb1   : > { %9532 = vst [vmem:[#allocation98_spill] sm:$0xff] %v7336_v20 }
  0xb2   : > { %9536 = vst [vmem:[#allocation100_spill] sm:$0xff] %v7350_v59 }
  0xb3   : > { %v786_v22 = vpop.f32.mrf.mxu0  ;;  %9551 = vst [vmem:[#allocation115_spill] sm:$0xff] %v7424_v24 }
  0xb5   : > { %v923_v15 = vpop.f32.mrf.mxu1 }
  0xb6   : > { %v924_v33 = vadd.f32 %v923_v15, %v786_v22  ;;  %825 = vmatmul.bf16.gmra.mxu0 %v7328_v40  ;;  %1473 = vmatmul.bf16.vlgmr.msra.gmra.mxu3 %v7330_v57  ;;  %v7355_v22 = vadd.f32 %v477_v11, %v369_v28  ;;  %v7361_v15 = vadd.f32 %v9274_v44, %v9273_v46  ;;  %v1118_v57 = vrot.slane %v7011_v2, 1 }
  0xb7   : > { %v1097_v28 = vrot.slane %v7350_v59, 1  ;;  %v7371_v44 = vand.u32 2147483647, %v584_v34  ;;  %v7373_v40 = vand.u32 2147483647, %v585_v29 }
  0xb8   : > { %962 = vmatmul.bf16.gmra.mxu1 %v7334_v41  ;;  %1453 = vmatmul.bf16.gmra.mxu2 %v7336_v20  ;;  %9537 = vst [vmem:[#allocation101_spill] sm:$0xff] %v7355_v22  ;;  %v1120_v20 = vrot.slane %v7344_v16, 1  ;;  %v1098_v2 = vrot.slane %v7355_v22, 1  ;;  %v1100_v16 = vrot.slane %v7361_v15, 1  ;;  %v1119_v32 = vsel %vm1051_vm0, %v1117_v23, %v1118_v57  ;;  %v7388_v34 = vld [vmem:[%s6615_s11 + $0x80] sm:$0x1] }
  0xb9   : > { %9538 = vst [vmem:[#allocation102_spill] sm:$0xff] %v7361_v15  ;;  %v7363_v63 = vpop.f32.mrf.mxu3  ;;  %v7391_v29 = vld [vmem:[%s6610_s29 + $0xb0] sm:$0x1] }
  0xba   : > { %9540 = vst [vmem:[#allocation104_spill] sm:$0xff] %v7371_v44 }
  0xbb   : > { %v1414_v11 = vpop.f32.mrf.mxu2  ;;  %v788_v54 = vpop.f32.mrf.mxu0  ;;  %9541 = vst [vmem:[#allocation105_spill] sm:$0xff] %v7373_v40 }
  0xbc   : > { %v7368_v4 = vadd.f32 %v1414_v11, %v924_v33  ;;  %v1121_v33 = vsel %vm1051_vm0, %v1118_v57, %v1120_v20  ;;  %v5976_v11 = vld [vmem:[%s9123_s3 + $0x50] sm:$0xff]  ;;  %9543 = vst [vmem:[#allocation107_spill] sm:$0xff] %v7388_v34  ;;  %v1099_v57 = vsel %vm1051_vm0, %v1097_v28, %v1098_v2  ;;  %v1101_v20 = vsel %vm1051_vm0, %v1098_v2, %v1100_v16 }
  0xbd   : > { %v925_v46 = vpop.f32.mrf.mxu1  ;;  %9544 = vst [vmem:[#allocation108_spill] sm:$0xff] %v7391_v29  ;;  %1612 = vmatpush.bf16.msrb.mxu3 %v5976_v11  ;;  %v7402_v23 = vpack.c.bf16 %v1121_v33, %v1119_v32  ;;  %v6162_v11 = vunpack.c.h.bf16 %v6267_v8  ;;  %v9296_v28 = vunpack.c.l.bf16 %v7391_v29  ;;  %v9297_v32 = vunpack.c.l.bf16 %v7394_v19 }
  0xbe   : > { %9539 = vst [vmem:[#allocation103_spill] sm:$0xff] %v7368_v4  ;;  %v926_v18 = vadd.f32 %v925_v46, %v788_v54  ;;  %v7385_v4 = vld [vmem:[%s6610_s29 + $0x80] sm:$0x1]  ;;  %v7398_v46 = vpack.c.bf16 %v7373_v40, %v7371_v44  ;;  %v6004_v54 = vld [vmem:[%s9122_s2 + $0xf0] sm:$0xff]  ;;  %v7417_v33 = vpack.c.bf16 %v7355_v22, %v7350_v59  ;;  %v7419_v13 = vpack.c.bf16 %v1101_v20, %v1099_v57  ;;  %v6003_v40 = vld [vmem:[%s9122_s2 + $0xe8] sm:$0xff] }
  0xbf   : > { %9542 = vst [vmem:[#allocation106_spill] sm:$0xff] %v7385_v4  ;;  %2424 = vmatpush.bf16.msrb.mxu2 %v6004_v54  ;;  %v9554_v54 = vunpack.c.l.bf16 %v7388_v34  ;;  %v7440_v20 = vadd.f32 %v9297_v32, %v9296_v28  ;;  %v6002_v28 = vld [vmem:[%s9122_s2 + $0xe0] sm:$0xff]  ;;  %v1102_v19 = vrot.slane %v7424_v24, 1 }
  0xc0   : > { %9546 = vst [vmem:[#allocation110_spill] sm:$0xff] %v7398_v46 }
  0xc1   : > { %9547 = vst [vmem:[#allocation111_spill] sm:$0xff] %v7402_v23  ;;  %v7407_v15 = vpop.f32.mrf.mxu3 }
  0xc2   : > { %9549 = vst [vmem:[#allocation113_spill] sm:$0xff] %v7417_v33 }
  0xc3   : > { %v1416_v41 = vpop.f32.mrf.mxu2  ;;  %v791_v16 = vpop.f32.mrf.mxu0  ;;  %9550 = vst [vmem:[#allocation114_spill] sm:$0xff] %v7419_v13  ;;  %2425 = vmatpush.bf16.msrb.mxu2 %v6003_v40  ;;  %v1730_v40 = vrot.slane %v6680_v36, 2  ;;  %v1841_v36 = vrot.slane %v6710_v48, 2 }
  0xc4   : > { %v7413_v2 = vadd.f32 %v1416_v41, %v926_v18  ;;  %v7428_v41 = vadd.f32 %v6162_v11, %v6126_v51  ;;  %v9553_v18 = vunpack.c.l.bf16 %v7385_v4  ;;  %9556 = vst [vmem:[#allocation118_spill] sm:$0xff] %v7440_v20 }
  0xc5   : > { %v928_v8 = vpop.f32.mrf.mxu1 }
  0xc6   : > { %9548 = vst [vmem:[#allocation112_spill] sm:$0xff] %v7413_v2  ;;  %v929_v44 = vadd.f32 %v928_v8, %v791_v16  ;;  %830 = vmatmul.bf16.gmra.mxu0 %v7398_v46  ;;  %1478 = vmatmul.bf16.gmra.mxu3 %v7402_v23  ;;  %v7434_v57 = vadd.f32 %v9554_v54, %v9553_v18  ;;  %v5975_v16 = vld [vmem:[%s9123_s3 + $0x48] sm:$0xff]  ;;  %v5982_v8 = vld [vmem:[%s9122_s2 + $0x80] sm:$0xff]  ;;  %v1123_v46 = vrot.slane %v7074_v50, 1  ;;  %v1103_v4 = vrot.slane %v7428_v41, 1 }
  0xc7   : > { %9552 = vst [vmem:[#allocation116_spill] sm:$0xff] %v7428_v41  ;;  %v5990_v18 = vld [vmem:[%s9123_s3 + $0x80] sm:$0xff]  ;;  %v587_v54 = vsub.f32 %v6125_v30, %v6161_v43  ;;  %v588_v23 = vsub.f32 %v6126_v51, %v6162_v11  ;;  %1613 = vmatpush.bf16.msrb.mxu3 %v5975_v16  ;;  %2041 = vmatpush.bf16.msrb.mxu0 %v5982_v8  ;;  %v1125_v30 = vrot.slane %v7440_v20, 1  ;;  %v1729_v43 = vrot.slane %v6678_v35, 2  ;;  %v6001_v35 = vld [vmem:[%s9122_s2 + $0xd8] sm:$0xff] }
  0xc8   : > { %9555 = vst [vmem:[#allocation117_spill] sm:$0xff] %v7434_v57  ;;  %967 = vmatmul.bf16.gmra.mxu1 %v7417_v33  ;;  %1458 = vmatmul.bf16.gmra.mxu2 %v7419_v13  ;;  %v1122_v13 = vrot.slane %v7154_v17, 1  ;;  %v1105_v51 = vrot.slane %v7434_v57, 1  ;;  %v613_v11 = vand.u32 2147483647, %v6657_v27  ;;  %v1212_v8 = vrot.slane %v6710_v48, 1 }
  0xc9   : > { %v7456_v32 = vpop.f32.mrf.mxu3  ;;  %2243 = vmatpush.bf16.msrb.mxu1 %v5990_v18  ;;  %v7470_v34 = vand.u32 2147483647, %v587_v54  ;;  %v7472_v57 = vand.u32 2147483647, %v588_v23  ;;  %2426 = vmatpush.bf16.msrb.mxu2 %v6002_v28  ;;  %v1213_v27 = vrot.slane %v6712_v49, 1  ;;  %v5974_v23 = vld [vmem:[%s9123_s3 + $0x40] sm:$0xff]  ;;  %v1104_v18 = vsel %vm1051_vm0, %v1102_v19, %v1103_v4 }
  0xca   : > { %v1106_v28 = vsel %vm1051_vm0, %v1103_v4, %v1105_v51  ;;  %v1124_v54 = vsel %vm1051_vm0, %v1122_v13, %v1123_v46  ;;  %v1126_v20 = vsel %vm1051_vm0, %v1123_v46, %v1125_v30  ;;  %v1732_v48 = vrot.slane %v6682_v37, 2  ;;  %v428_v2 = vld [vmem:[%s6615_s11 + $0x84] sm:$0xff]   ;;  %v7505_v4 = vld [vmem:[%s6610_s29 + $0xbc] sm:$0x1]  ;;  %v6000_v37 = vld [vmem:[%s9122_s2 + $0xd0] sm:$0xff] }
  0xcb   : > { %v1419_v29 = vpop.f32.mrf.mxu2  ;;  %v793_v16 = vpop.f32.mrf.mxu0  ;;  %9558 = vst [vmem:[#allocation120_spill] sm:$0xff] %v7470_v34  ;;  %1614 = vmatpush.bf16.msrb.mxu3 %v5974_v23  ;;  %v7498_v22 = vpack.c.bf16 %v7472_v57, %v7470_v34  ;;  %v7502_v19 = vpack.c.bf16 %v7428_v41, %v7424_v24  ;;  %v7508_v46 = vld [vmem:[%s6615_s11 + $0xbc] sm:$0x1]  ;;  %v7515_v51 = vpack.c.bf16 %v1106_v28, %v1104_v18  ;;  %v482_v41 = vunpack.c.l.bf16 %v428_v2 }
  0xcc   : > { %v7467_v17 = vadd.f32 %v1419_v29, %v929_v44  ;;  %9559 = vst [vmem:[#allocation121_spill] sm:$0xff] %v7472_v57  ;;  %v1842_v44 = vrot.slane %v6712_v49, 2  ;;  %v7491_v49 = vld [vmem:[%s6610_s29 + $0x8c] sm:$0x1]  ;;  %v7517_v30 = vpack.c.bf16 %v1126_v20, %v1124_v54  ;;  %v483_v24 = vunpack.c.h.bf16 %v428_v2 }
  0xcd   : > { %v930_v50 = vpop.f32.mrf.mxu1  ;;  %9560 = vst [vmem:[#allocation122_spill] sm:$0xff] %v7498_v22  ;;  %2427 = vmatpush.bf16.msrb.mxu2 %v6001_v35  ;;  %v9325_v59 = vunpack.c.l.bf16 %v7491_v49  ;;  %v9323_v14 = vunpack.c.l.bf16 %v7505_v4  ;;  %v9324_v53 = vunpack.c.l.bf16 %v7508_v46  ;;  %v7529_v2 = vsel %vm1051_vm0, %v1212_v8, %v1213_v27 }
  0xce   : > { %9557 = vst [vmem:[#allocation119_spill] sm:$0xff] %v7467_v17  ;;  %v931_v29 = vadd.f32 %v930_v50, %v793_v16  ;;  %v320_v17 = vld [vmem:[%s6610_s29 + $0x84] sm:$0xff]   ;;  %v7494_v50 = vld [vmem:[%s6615_s11 + $0x8c] sm:$0x1]  ;;  %v1215_v16 = vrot.slane %v613_v11, 1  ;;  %v1844_v33 = vrot.slane %v613_v11, 2  ;;  %v7550_v8 = vsel %vm1728_vm1, %v1841_v36, %v1842_v44 }
  0xcf   : > { %9561 = vst [vmem:[#allocation123_spill] sm:$0xff] %v7502_v19  ;;  %v374_v23 = vunpack.c.l.bf16 %v320_v17  ;;  %v375_v57 = vunpack.c.h.bf16 %v320_v17  ;;  %v5999_v17 = vld [vmem:[%s9122_s2 + $0xc8] sm:$0xff]  ;;  %v9565_v36 = vunpack.c.l.bf16 %v7494_v50 }
  0xd0   : > { %9562 = vst [vmem:[#allocation124_spill] sm:$0xff] %v7515_v51  ;;  %v7532_v20 = vsel %vm1051_vm0, %v1213_v27, %v1215_v16  ;;  %v7563_v11 = vsel %vm1728_vm1, %v1842_v44, %v1844_v33 }
  0xd1   : > { %v7513_v13 = vpop.f32.mrf.mxu3  ;;  %9563 = vst [vmem:[#allocation125_spill] sm:$0xff] %v7517_v30  ;;  %2428 = vmatpush.bf16.msrb.mxu2 %v6000_v37  ;;  %v7565_v27 = vadd.f32 %v483_v24, %v375_v57  ;;  %v2155_v16 = vpack.c.bf16 %v7563_v11, %v7550_v8  ;;  %v590_v44 = vsub.f32 %v374_v23, %v482_v41 }
  0xd3   : > { %v1421_v34 = vpop.f32.mrf.mxu2  ;;  %v796_v7 = vpop.f32.mrf.mxu0  ;;  %v1108_v11 = vrot.slane %v7565_v27, 1 }
  0xd4   : > { %v7521_v35 = vadd.f32 %v1421_v34, %v931_v29  ;;  %v7535_v34 = vsel %vm1728_vm1, %v1729_v43, %v1730_v40  ;;  %v7538_v29 = vsel %vm1728_vm1, %v1730_v40, %v1732_v48  ;;  %v6013_v43 = vld [vmem:[%s9123_s3 + $0xf8] sm:$0xff]  ;;  %v7560_v40 = vadd.f32 %v9324_v53, %v9323_v14 }
  0xd5   : > { %v933_v18 = vpop.f32.mrf.mxu1  ;;  %v7571_v48 = vadd.f32 %v9565_v36, %v9325_v59  ;;  %2429 = vmatpush.bf16.msrb.mxu2 %v5999_v17  ;;  %2610 = vmatpush.bf16.msra.mxu3 %v6013_v43  ;;  %v591_v53 = vsub.f32 %v375_v57, %v483_v24  ;;  %v1127_v36 = vrot.slane %v7219_v58, 1  ;;  %v1128_v17 = vrot.slane %v7225_v12, 1  ;;  %v6021_v24 = vld [vmem:[%s9122_s2 + $0x138] sm:$0xff] }
  0xd6   : > { %v934_v28 = vadd.f32 %v933_v18, %v796_v7  ;;  %835 = vmatmul.bf16.gmra.mxu0 %v7498_v22  ;;  %1483 = vmatmul.bf16.gmra.mxu3 %v7517_v30  ;;  %v7554_v7 = vadd.f32 %v482_v41, %v374_v23  ;;  %9564 = vst [vmem:[#allocation126_spill] sm:$0xff] %v7560_v40  ;;  %v5998_v18 = vld [vmem:[%s9122_s2 + $0xc0] sm:$0xff]  ;;  %v1130_v43 = vrot.slane %v7560_v40, 1  ;;  %v6029_v41 = vld [vmem:[%s9123_s3 + $0x138] sm:$0xff]  ;;  %v7594_v57 = vand.u32 2147483647, %v590_v44 }
  0xd7   : > { %v1110_v30 = vrot.slane %v7571_v48, 1  ;;  %v7596_v23 = vand.u32 2147483647, %v591_v53  ;;  %2817 = vmatpush.bf16.msra.mxu0 %v6021_v24  ;;  %3004 = vmatpush.bf16.msra.mxu1 %v6029_v41 }
  0xd8   : > { %972 = vmatmul.bf16.gmra.mxu1 %v7502_v19  ;;  %1463 = vmatmul.bf16.gmra.mxu2 %v7515_v51  ;;  %v1107_v8 = vrot.slane %v7554_v7, 1 }
  0xd9   : > { %v7578_v14 = vpop.f32.mrf.mxu3  ;;  %2430 = vmatpush.bf16.msrb.mxu2 %v5998_v18  ;;  %v7606_v40 = vpack.c.bf16 %v7596_v23, %v7594_v57 }
  0xdb   : > { %v1424_v33 = vpop.f32.mrf.mxu2  ;;  %v798_v54 = vpop.f32.mrf.mxu0  ;;  %9566 = vst [vmem:[#allocation127_spill] sm:$0xff] %v7606_v40 }
  0xdc   : > { %v7580_v37 = vadd.f32 %v1424_v33, %v934_v28  ;;  %v1129_v28 = vsel %vm1051_vm0, %v1127_v36, %v1128_v17  ;;  %v1131_v33 = vsel %vm1051_vm0, %v1128_v17, %v1130_v43  ;;  %v7614_v17 = vpack.c.bf16 %v7565_v27, %v7554_v7 }
  0xdd   : > { %v935_v59 = vpop.f32.mrf.mxu1  ;;  %v7608_v44 = vpack.c.bf16 %v1131_v33, %v1129_v28 }
  0xde   : > { %v936_v51 = vadd.f32 %v935_v59, %v798_v54  ;;  %v1109_v59 = vsel %vm1051_vm0, %v1107_v8, %v1108_v11  ;;  %v1111_v54 = vsel %vm1051_vm0, %v1108_v11, %v1110_v30  ;;  %9568 = vst [vmem:[#allocation129_spill] sm:$0xff] %v7614_v17 }
  0xdf   : > { %9567 = vst [vmem:[#allocation128_spill] sm:$0xff] %v7608_v44  ;;  %v7616_v43 = vpack.c.bf16 %v1111_v54, %v1109_v59  ;;  %v9570_v54 = vunpack.c.l.bf16 %v6744_v61  ;;  %v6012_v61 = vld [vmem:[%s9123_s3 + $0xf0] sm:$0xff] }
  0xe0   : > { %2611 = vmatpush.bf16.msra.mxu3 %v6012_v61 }
  0xe1   : > { %v7602_v18 = vpop.f32.mrf.mxu3  ;;  %9569 = vst [vmem:[#allocation130_spill] sm:$0xff] %v7616_v43 }
  0xe3   : > { %v1426_v22 = vpop.f32.mrf.mxu2  ;;  %v801_v36 = vpop.f32.mrf.mxu0 }
  0xe4   : > { %v7610_v53 = vadd.f32 %v1426_v22, %v936_v51 }
  0xe5   : > { %v938_v8 = vpop.f32.mrf.mxu1 }
  0xe6   : > { %v939_v30 = vadd.f32 %v938_v8, %v801_v36  ;;  %840 = vmatmul.bf16.gmra.mxu0 %v7606_v40  ;;  %1488 = vmatmul.bf16.gmra.mxu3 %v7608_v44  ;;  %v9571_v36 = vunpack.c.l.bf16 %v6741_v60 }
  0xe8   : > { %977 = vmatmul.bf16.gmra.mxu1 %v7614_v17  ;;  %1468 = vmatmul.bf16.gmra.mxu2 %v7616_v43  ;;  %v562_v8 = vsub.f32 %v9571_v36, %v9570_v54  ;;  %v1846_v54 = vrot.slane %v6801_v55, 2 }
  0xe9   : > { %v7622_v11 = vpop.f32.mrf.mxu3 }
  0xeb   : > { %v1429_v22 = vpop.f32.mrf.mxu2  ;;  %v803_v24 = vpop.f32.mrf.mxu0 }
  0xec   : > { %v7624_v51 = vadd.f32 %v1429_v22, %v939_v30  ;;  %v9572_v30 = vpack.c.bf16 %v7532_v20, %v7529_v2  ;;  %v9573_v22 = vpack.c.bf16 %v7538_v29, %v7535_v34  ;;  %v1217_v2 = vrot.slane %v6801_v55, 1 }
  0xed   : > { %v940_v41 = vpop.f32.mrf.mxu1  ;;  %v1218_v20 = vrot.slane %v6804_v56, 1 }
  0xee   : > { %v941_v28 = vadd.f32 %v940_v41, %v803_v24  ;;  %v616_v24 = vand.u32 2147483647, %v562_v8 }
  0xf0   : > { %v1220_v34 = vrot.slane %v616_v24, 1  ;;  %v1849_v36 = vrot.slane %v616_v24, 2 }
  0xf1   : > { %v7626_v33 = vpop.f32.mrf.mxu3 }
  0xf3   : > { %v1431_v59 = vpop.f32.mrf.mxu2  ;;  %v806_v40 = vpop.f32.mrf.mxu0 }
  0xf4   : > { %v7632_v44 = vadd.f32 %v1431_v59, %v941_v28  ;;  %v1734_v28 = vrot.slane %v6776_v1, 2  ;;  %v1219_v1 = vsel %vm1051_vm0, %v1217_v2, %v1218_v20 }
  0xf5   : > { %v943_v43 = vpop.f32.mrf.mxu1 }
  0xf6   : > { %v944_v12 = vadd.f32 %v943_v43, %v806_v40  ;;  %1615 = vmatmul.bf16.vlgmr.msrb.gmra.mxu3 %v9572_v30  ;;  %2042 = vmatmul.bf16.vlgmr.msrb.gmra.mxu0 %v9573_v22  ;;  %v6020_v30 = vld [vmem:[%s9122_s2 + $0x130] sm:$0xff] }
  0xf7   : > { %2818 = vmatpush.bf16.msra.mxu0 %v6020_v30 }
  0xf8   : > { %2244 = vmatmul.bf16.vlgmr.msrb.gmra.mxu1 %v2155_v16  ;;  %2431 = vmatmul.bf16.vlgmr.msrb.gmra.mxu2 %v6837_v10  ;;  %v1735_v16 = vrot.slane %v6778_v38, 2  ;;  %v1737_v10 = vrot.slane %v6784_v39, 2  ;;  %v1221_v38 = vsel %vm1051_vm0, %v1218_v20, %v1220_v34  ;;  %v9574_v20 = vunpack.c.l.bf16 %v6819_v9 }
  0xf9   : > { %v983_v60 = vpop.f32.mrf.mxu3  ;;  %v9575_v34 = vunpack.c.l.bf16 %v6816_v6 }
  0xfa   : > { %v7645_v40 = vadd.f32 %v983_v60, %v7363_v63  ;;  %v1847_v63 = vrot.slane %v6804_v56, 2  ;;  %v1736_v39 = vsel %vm1728_vm1, %v1734_v28, %v1735_v16  ;;  %v1738_v55 = vsel %vm1728_vm1, %v1735_v16, %v1737_v10 }
  0xfb   : > { %v1434_v43 = vpop.f32.mrf.mxu2  ;;  %v808_v41 = vpop.f32.mrf.mxu0  ;;  %v7673_v2 = vpack.c.bf16 %v1738_v55, %v1736_v39  ;;  %v1740_v39 = vrot.slane %v6860_v21, 2  ;;  %v1742_v55 = vrot.slane %v6866_v26, 2 }
  0xfc   : > { %v7649_v29 = vadd.f32 %v1434_v43, %v944_v12  ;;  %v6028_v12 = vld [vmem:[%s9123_s3 + $0x130] sm:$0xff]  ;;  %v1848_v56 = vsel %vm1728_vm1, %v1846_v54, %v1847_v63  ;;  %v1850_v22 = vsel %vm1728_vm1, %v1847_v63, %v1849_v36  ;;  %v7671_v43 = vpack.c.bf16 %v1221_v38, %v1219_v1 }
  0xfd   : > { %v945_v59 = vpop.f32.mrf.mxu1  ;;  %3005 = vmatpush.bf16.msra.mxu1 %v6028_v12  ;;  %v7681_v10 = vpack.c.bf16 %v1850_v22, %v1848_v56  ;;  %v1222_v36 = vrot.slane %v6877_v42, 1  ;;  %v1739_v38 = vrot.slane %v6858_v3, 2  ;;  %v1851_v22 = vrot.slane %v6877_v42, 2 }
  0xfe   : > { %v946_v8 = vadd.f32 %v945_v59, %v808_v41  ;;  %v565_v41 = vsub.f32 %v9575_v34, %v9574_v20 }
  0xff   : > { %9576 = vst [vmem:[#allocation131_spill] sm:$0xff] %v7681_v10 }
 0x101   : > { %v985_v24 = vpop.f32.mrf.mxu3 }
 0x102   : > { %v7669_v61 = vadd.f32 %v985_v24, %v7407_v15  ;;  %v619_v15 = vand.u32 2147483647, %v565_v41  ;;  %v1741_v41 = vsel %vm1728_vm1, %v1739_v38, %v1740_v39 }
 0x103   : > { %v1436_v60 = vpop.f32.mrf.mxu2  ;;  %v811_v16 = vpop.f32.mrf.mxu0 }
 0x104   : > { %v7679_v28 = vadd.f32 %v1436_v60, %v946_v8  ;;  %v1223_v8 = vrot.slane %v6882_v47, 1  ;;  %v1225_v30 = vrot.slane %v619_v15, 1  ;;  %v1854_v24 = vrot.slane %v619_v15, 2 }
 0x105   : > { %v948_v59 = vpop.f32.mrf.mxu1  ;;  %v9579_v15 = vunpack.c.l.bf16 %v6895_v0 }
 0x106   : > { %v949_v54 = vadd.f32 %v948_v59, %v811_v16  ;;  %1620 = vmatmul.bf16.gmra.mxu3 %v7671_v43  ;;  %2047 = vmatmul.bf16.gmra.mxu0 %v7673_v2  ;;  %v1224_v20 = vsel %vm1051_vm0, %v1222_v36, %v1223_v8  ;;  %v1226_v34 = vsel %vm1051_vm0, %v1223_v8, %v1225_v30 }
 0x107   : > { %v1743_v16 = vsel %vm1728_vm1, %v1740_v39, %v1742_v55  ;;  %v6011_v39 = vld [vmem:[%s9123_s3 + $0xe8] sm:$0xff] }
 0x108   : > { %2249 = vmatmul.bf16.gmra.mxu1 %v7681_v10  ;;  %2436 = vmatmul.bf16.gmra.mxu2 %v6919_v45  ;;  %v6018_v45 = vld [vmem:[%s9122_s2 + $0x120] sm:$0xff] }
 0x109   : > { %v988_v9 = vpop.f32.mrf.mxu3  ;;  %2612 = vmatpush.bf16.msra.mxu3 %v6011_v39 }
 0x10a   : > { %v7688_v6 = vadd.f32 %v988_v9, %v7456_v32  ;;  %v1852_v32 = vrot.slane %v6882_v47, 2  ;;  %v7708_v47 = vpack.c.bf16 %v1226_v34, %v1224_v20  ;;  %v9580_v9 = vunpack.c.l.bf16 %v6892_v62  ;;  %v9582_v34 = vld [vmem:[#allocation24_spill] sm:$0xff] }
 0x10b   : > { %v1439_v63 = vpop.f32.mrf.mxu2  ;;  %v813_v1 = vpop.f32.mrf.mxu0  ;;  %v1744_v20 = vrot.slane %v6941_v52, 2 }
 0x10c   : > { %v7692_v12 = vadd.f32 %v1439_v63, %v949_v54  ;;  %v1853_v3 = vsel %vm1728_vm1, %v1851_v22, %v1852_v32  ;;  %v1855_v21 = vsel %vm1728_vm1, %v1852_v32, %v1854_v24  ;;  %9577 = vst [vmem:[#allocation132_spill] sm:$0xff] %v7708_v47  ;;  %v7710_v54 = vpack.c.bf16 %v1743_v16, %v1741_v41  ;;  %v9583_v16 = vld [vmem:[#allocation25_spill] sm:$0xff] }
 0x10d   : > { %v950_v56 = vpop.f32.mrf.mxu1  ;;  %v568_v63 = vsub.f32 %v9580_v9, %v9579_v15  ;;  %v7718_v30 = vpack.c.bf16 %v1855_v21, %v1853_v3  ;;  %v1228_v22 = vrot.slane %v6968_v31, 1  ;;  %v1745_v41 = vrot.slane %v9582_v34, 2  ;;  %v6019_v9 = vld [vmem:[%s9122_s2 + $0x128] sm:$0xff] }
 0x10e   : > { %v951_v60 = vadd.f32 %v950_v56, %v813_v1  ;;  %9578 = vst [vmem:[#allocation133_spill] sm:$0xff] %v7710_v54  ;;  %v1227_v56 = vrot.slane %v6965_v5, 1  ;;  %v1747_v3 = vrot.slane %v9583_v16, 2  ;;  %2819 = vmatpush.bf16.msra.mxu0 %v6019_v9 }
 0x10f   : > { %9581 = vst [vmem:[#allocation134_spill] sm:$0xff] %v7718_v30 }
 0x110   : > { %v1229_v52 = vsel %vm1051_vm0, %v1227_v56, %v1228_v22 }
 0x111   : > { %v990_v26 = vpop.f32.mrf.mxu3 }
 0x112   : > { %v7706_v59 = vadd.f32 %v990_v26, %v7513_v13  ;;  %v622_v13 = vand.u32 2147483647, %v568_v63  ;;  %v1856_v26 = vrot.slane %v6965_v5, 2  ;;  %v6027_v63 = vld [vmem:[%s9123_s3 + $0x128] sm:$0xff]  ;;  %v1748_v5 = vsel %vm1728_vm1, %v1745_v41, %v1747_v3  ;;  %2820 = vmatpush.bf16.msra.mxu0 %v6018_v45 }
 0x113   : > { %v1441_v42 = vpop.f32.mrf.mxu2  ;;  %v816_v8 = vpop.f32.mrf.mxu0  ;;  %3006 = vmatpush.bf16.msra.mxu1 %v6027_v63  ;;  %v9592_v63 = vld [vmem:[#allocation39_spill] sm:$0xff] }
 0x114   : > { %v7716_v36 = vadd.f32 %v1441_v42, %v951_v60  ;;  %v1230_v32 = vrot.slane %v622_v13, 1  ;;  %v1859_v42 = vrot.slane %v622_v13, 2 }
 0x115   : > { %v953_v1 = vpop.f32.mrf.mxu1 }
 0x116   : > { %v954_v38 = vadd.f32 %v953_v1, %v816_v8  ;;  %1625 = vmatmul.bf16.gmra.mxu3 %v7708_v47  ;;  %2052 = vmatmul.bf16.gmra.mxu0 %v7710_v54  ;;  %v1231_v8 = vsel %vm1051_vm0, %v1228_v22, %v1230_v32  ;;  %v1746_v1 = vsel %vm1728_vm1, %v1744_v20, %v1745_v41  ;;  %v9586_v22 = vld [vmem:[#allocation29_spill] sm:$0xff] }
 0x117   : > { %v7756_v56 = vpack.c.bf16 %v1748_v5, %v1746_v1  ;;  %v9587_v32 = vunpack.c.l.bf16 %v9586_v22  ;;  %v9595_v22 = vld [vmem:[#allocation37_spill] sm:$0xff] }
 0x118   : > { %2254 = vmatmul.bf16.gmra.mxu1 %v7718_v30  ;;  %2441 = vmatmul.bf16.gmra.mxu2 %v6995_v25 }
 0x119   : > { %v993_v62 = vpop.f32.mrf.mxu3  ;;  %9585 = vst [vmem:[#allocation25_spill] sm:$0xff] %v7756_v56 }
 0x11a   : > { %v7728_v0 = vadd.f32 %v993_v62, %v7578_v14  ;;  %v1857_v14 = vrot.slane %v6968_v31, 2 }
 0x11b   : > { %v1444_v55 = vpop.f32.mrf.mxu2  ;;  %v818_v60 = vpop.f32.mrf.mxu0 }
 0x11c   : > { %v7732_v24 = vadd.f32 %v1444_v55, %v954_v38  ;;  %v1858_v31 = vsel %vm1728_vm1, %v1856_v26, %v1857_v14  ;;  %v1860_v38 = vsel %vm1728_vm1, %v1857_v14, %v1859_v42  ;;  %v7754_v55 = vpack.c.bf16 %v1231_v8, %v1229_v52  ;;  %v9591_v14 = vld [vmem:[#allocation44_spill] sm:$0xff] }
 0x11d   : > { %v955_v21 = vpop.f32.mrf.mxu1  ;;  %v7764_v3 = vpack.c.bf16 %v1860_v38, %v1858_v31  ;;  %v1232_v52 = vrot.slane %v9592_v63, 1  ;;  %v9593_v8 = vld [vmem:[#allocation40_spill] sm:$0xff] }
 0x11e   : > { %v956_v15 = vadd.f32 %v955_v21, %v818_v60  ;;  %9584 = vst [vmem:[#allocation24_spill] sm:$0xff] %v7754_v55  ;;  %v9588_v60 = vld [vmem:[#allocation28_spill] sm:$0xff]  ;;  %v1233_v1 = vrot.slane %v9593_v8, 1 }
 0x11f   : > { %v9589_v20 = vunpack.c.l.bf16 %v9588_v60  ;;  %9590 = vst [vmem:[#allocation29_spill] sm:$0xff] %v7764_v3  ;;  %v9596_v60 = vld [vmem:[#allocation38_spill] sm:$0xff] }
 0x121   : > { %v995_v13 = vpop.f32.mrf.mxu3  ;;  %v571_v34 = vsub.f32 %v9589_v20, %v9587_v32  ;;  %v1750_v32 = vrot.slane %v9595_v22, 2  ;;  %v1752_v20 = vrot.slane %v9596_v60, 2 }
 0x122   : > { %v7752_v39 = vadd.f32 %v995_v13, %v7602_v18  ;;  %v9594_v13 = vld [vmem:[#allocation36_spill] sm:$0xff] }
 0x123   : > { %v1446_v62 = vpop.f32.mrf.mxu2  ;;  %v821_v16 = vpop.f32.mrf.mxu0  ;;  %v625_v18 = vand.u32 2147483647, %v571_v34 }
 0x124   : > { %v7762_v41 = vadd.f32 %v1446_v62, %v956_v15  ;;  %v1749_v62 = vrot.slane %v9594_v13, 2 }
 0x125   : > { %v958_v21 = vpop.f32.mrf.mxu1  ;;  %v1235_v5 = vrot.slane %v625_v18, 1 }
 0x126   : > { %v959_v26 = vadd.f32 %v958_v21, %v821_v16  ;;  %1630 = vmatmul.bf16.gmra.mxu3 %v7754_v55  ;;  %2057 = vmatmul.bf16.gmra.mxu0 %v7756_v56  ;;  %v1861_v16 = vrot.slane %v9592_v63, 2  ;;  %v1864_v21 = vrot.slane %v625_v18, 2 }
 0x128   : > { %2259 = vmatmul.bf16.gmra.mxu1 %v7764_v3  ;;  %2446 = vmatmul.bf16.gmra.mxu2 %v9591_v14  ;;  %v1234_v14 = vsel %vm1051_vm0, %v1232_v52, %v1233_v1  ;;  %v1236_v3 = vsel %vm1051_vm0, %v1233_v1, %v1235_v5  ;;  %v9599_v52 = vld [vmem:[#allocation42_spill] sm:$0xff]  ;;  %v9601_v1 = vld [vmem:[#allocation41_spill] sm:$0xff] }
 0x129   : > { %v998_v42 = vpop.f32.mrf.mxu3  ;;  %v9602_v5 = vunpack.c.l.bf16 %v9601_v1  ;;  %v9608_v1 = vld [vmem:[#allocation48_spill] sm:$0xff] }
 0x12a   : > { %v7771_v9 = vadd.f32 %v998_v42, %v7622_v11  ;;  %v1862_v11 = vrot.slane %v9593_v8, 2  ;;  %v7791_v8 = vpack.c.bf16 %v1236_v3, %v1234_v14  ;;  %v6010_v3 = vld [vmem:[%s9123_s3 + $0xe0] sm:$0xff] }
 0x12b   : > { %v1449_v15 = vpop.f32.mrf.mxu2  ;;  %v823_v38 = vpop.f32.mrf.mxu0  ;;  %v9604_v14 = vld [vmem:[#allocation56_spill] sm:$0xff]  ;;  %2613 = vmatpush.bf16.msra.mxu3 %v6010_v3 }
 0x12c   : > { %v7775_v31 = vadd.f32 %v1449_v15, %v959_v26  ;;  %v1751_v26 = vsel %vm1728_vm1, %v1749_v62, %v1750_v32  ;;  %v1753_v15 = vsel %vm1728_vm1, %v1750_v32, %v1752_v20  ;;  %v1863_v13 = vsel %vm1728_vm1, %v1861_v16, %v1862_v11  ;;  %9597 = vst [vmem:[#allocation28_spill] sm:$0xff] %v7791_v8 }
 0x12d   : > { %v960_v34 = vpop.f32.mrf.mxu1  ;;  %v1865_v22 = vsel %vm1728_vm1, %v1862_v11, %v1864_v21  ;;  %v7793_v18 = vpack.c.bf16 %v1753_v15, %v1751_v26  ;;  %v9606_v15 = vld [vmem:[#allocation51_spill] sm:$0xff] }
 0x12e   : > { %v961_v42 = vadd.f32 %v960_v34, %v823_v38  ;;  %v9600_v38 = vunpack.c.l.bf16 %v9599_v52  ;;  %v7801_v20 = vpack.c.bf16 %v1865_v22, %v1863_v13  ;;  %v1237_v13 = vrot.slane %v9606_v15, 1  ;;  %v9607_v22 = vld [vmem:[#allocation52_spill] sm:$0xff] }
 0x12f   : > { %9598 = vst [vmem:[#allocation39_spill] sm:$0xff] %v7793_v18 }
 0x130   : > { %v574_v62 = vsub.f32 %v9602_v5, %v9600_v38  ;;  %9603 = vst [vmem:[#allocation40_spill] sm:$0xff] %v7801_v20  ;;  %v1754_v5 = vrot.slane %v9608_v1, 2 }
 0x131   : > { %v1000_v60 = vpop.f32.mrf.mxu3 }
 0x132   : > { %v7789_v25 = vadd.f32 %v1000_v60, %v7626_v33  ;;  %v628_v33 = vand.u32 2147483647, %v574_v62  ;;  %v1238_v60 = vrot.slane %v9607_v22, 1  ;;  %v9609_v62 = vld [vmem:[#allocation49_spill] sm:$0xff] }
 0x133   : > { %v1451_v63 = vpop.f32.mrf.mxu2  ;;  %v826_v32 = vpop.f32.mrf.mxu0 }
 0x134   : > { %v7799_v34 = vadd.f32 %v1451_v63, %v961_v42  ;;  %v1240_v63 = vrot.slane %v628_v33, 1 }
 0x135   : > { %v963_v16 = vpop.f32.mrf.mxu1 }
 0x136   : > { %v964_v11 = vadd.f32 %v963_v16, %v826_v32  ;;  %1635 = vmatmul.bf16.gmra.mxu3 %v7791_v8  ;;  %2062 = vmatmul.bf16.gmra.mxu0 %v7793_v18  ;;  %v1755_v32 = vrot.slane %v9609_v62, 2  ;;  %v9610_v16 = vld [vmem:[#allocation50_spill] sm:$0xff]  ;;  %v1241_v1 = vsel %vm1051_vm0, %v1238_v60, %v1240_v63 }
 0x138   : > { %2264 = vmatmul.bf16.gmra.mxu1 %v7801_v20  ;;  %2451 = vmatmul.bf16.gmra.mxu2 %v9604_v14  ;;  %v1757_v14 = vrot.slane %v9610_v16, 2  ;;  %v1866_v20 = vrot.slane %v9606_v15, 2  ;;  %v1756_v62 = vsel %vm1728_vm1, %v1754_v5, %v1755_v32  ;;  %v9616_v5 = vld [vmem:[#allocation53_spill] sm:$0xff] }
 0x139   : > { %v1474_v21 = vpop.f32.mrf.mxu3 }
 0x13a   : > { %v7811_v26 = vadd.f32 %v1474_v21, %v7645_v40  ;;  %v1867_v40 = vrot.slane %v9607_v22, 2  ;;  %v1869_v21 = vrot.slane %v628_v33, 2  ;;  %v1758_v15 = vsel %vm1728_vm1, %v1755_v32, %v1757_v14 }
 0x13b   : > { %v1454_v42 = vpop.f32.mrf.mxu2  ;;  %v828_v38 = vpop.f32.mrf.mxu0 }
 0x13c   : > { %9605 = vst [vmem:[#allocation36_spill] sm:$0xff] %v7811_v26  ;;  %v7815_v52 = vadd.f32 %v1454_v42, %v964_v11  ;;  %v6026_v11 = vld [vmem:[%s9123_s3 + $0x120] sm:$0xff]  ;;  %v1239_v42 = vsel %vm1051_vm0, %v1237_v13, %v1238_v60  ;;  %v1868_v33 = vsel %vm1728_vm1, %v1866_v20, %v1867_v40  ;;  %v1870_v22 = vsel %vm1728_vm1, %v1867_v40, %v1869_v21  ;;  %v9614_v60 = vld [vmem:[#allocation54_spill] sm:$0xff] }
 0x13d   : > { %v965_v3 = vpop.f32.mrf.mxu1  ;;  %3007 = vmatpush.bf16.msra.mxu1 %v6026_v11  ;;  %v7837_v10 = vpack.c.bf16 %v1241_v1, %v1239_v42  ;;  %v7839_v13 = vpack.c.bf16 %v1758_v15, %v1756_v62  ;;  %v9615_v63 = vunpack.c.l.bf16 %v9614_v60  ;;  %v9617_v26 = vunpack.c.l.bf16 %v9616_v5  ;;  %v9619_v11 = vld [vmem:[#allocation68_spill] sm:$0xff]  ;;  %v9622_v15 = vld [vmem:[#allocation63_spill] sm:$0xff] }
 0x13e   : > { %v966_v30 = vadd.f32 %v965_v3, %v828_v38  ;;  %v7847_v20 = vpack.c.bf16 %v1870_v22, %v1868_v33  ;;  %v1243_v33 = vrot.slane %v9622_v15, 1  ;;  %v9623_v60 = vld [vmem:[#allocation59_spill] sm:$0xff]  ;;  %v9624_v5 = vld [vmem:[#allocation60_spill] sm:$0xff] }
 0x13f   : > { %9612 = vst [vmem:[#allocation38_spill] sm:$0xff] %v7837_v10  ;;  %v577_v14 = vsub.f32 %v9617_v26, %v9615_v63  ;;  %v1759_v63 = vrot.slane %v9623_v60, 2 }
 0x140   : > { %9613 = vst [vmem:[#allocation42_spill] sm:$0xff] %v7839_v13 }
 0x141   : > { %v1476_v38 = vpop.f32.mrf.mxu3  ;;  %9618 = vst [vmem:[#allocation41_spill] sm:$0xff] %v7847_v20 }
 0x142   : > { %v7835_v3 = vadd.f32 %v1476_v38, %v7669_v61  ;;  %v631_v61 = vand.u32 2147483647, %v577_v14  ;;  %v1760_v14 = vrot.slane %v9624_v5, 2 }
 0x143   : > { %v1456_v16 = vpop.f32.mrf.mxu2  ;;  %v831_v32 = vpop.f32.mrf.mxu0 }
 0x144   : > { %9611 = vst [vmem:[#allocation37_spill] sm:$0xff] %v7835_v3  ;;  %v7845_v45 = vadd.f32 %v1456_v16, %v966_v30  ;;  %v9621_v30 = vld [vmem:[#allocation62_spill] sm:$0xff]  ;;  %v1245_v22 = vrot.slane %v631_v61, 1 }
 0x145   : > { %v968_v40 = vpop.f32.mrf.mxu1  ;;  %v1242_v62 = vrot.slane %v9621_v30, 1 }
 0x146   : > { %v969_v21 = vadd.f32 %v968_v40, %v831_v32  ;;  %1640 = vmatmul.bf16.gmra.mxu3 %v7837_v10  ;;  %2067 = vmatmul.bf16.gmra.mxu0 %v7839_v13  ;;  %v9625_v32 = vld [vmem:[#allocation61_spill] sm:$0xff]  ;;  %v1246_v13 = vsel %vm1051_vm0, %v1243_v33, %v1245_v22 }
 0x147   : > { %v1762_v40 = vrot.slane %v9625_v32, 2  ;;  %v1244_v3 = vsel %vm1051_vm0, %v1242_v62, %v1243_v33  ;;  %v9631_v33 = vld [vmem:[#allocation65_spill] sm:$0xff] }
 0x148   : > { %2269 = vmatmul.bf16.gmra.mxu1 %v7847_v20  ;;  %2456 = vmatmul.bf16.gmra.mxu2 %v9619_v11  ;;  %v1871_v20 = vrot.slane %v9621_v30, 2  ;;  %v9632_v22 = vunpack.c.l.bf16 %v9631_v33  ;;  %v9638_v33 = vld [vmem:[#allocation71_spill] sm:$0xff] }
 0x149   : > { %v1479_v42 = vpop.f32.mrf.mxu3 }
 0x14a   : > { %v7854_v26 = vadd.f32 %v1479_v42, %v7688_v6  ;;  %v1872_v6 = vrot.slane %v9622_v15, 2  ;;  %v1874_v42 = vrot.slane %v631_v61, 2  ;;  %v7874_v15 = vpack.c.bf16 %v1246_v13, %v1244_v3  ;;  %v6009_v3 = vld [vmem:[%s9123_s3 + $0xd8] sm:$0xff]  ;;  %v9634_v13 = vld [vmem:[#allocation82_spill] sm:$0xff] }
 0x14b   : > { %v1459_v1 = vpop.f32.mrf.mxu2  ;;  %v833_v16 = vpop.f32.mrf.mxu0  ;;  %2614 = vmatpush.bf16.msra.mxu3 %v6009_v3 }
 0x14c   : > { %9620 = vst [vmem:[#allocation51_spill] sm:$0xff] %v7854_v26  ;;  %v7858_v38 = vadd.f32 %v1459_v1, %v969_v21  ;;  %v1761_v21 = vsel %vm1728_vm1, %v1759_v63, %v1760_v14  ;;  %v1763_v1 = vsel %vm1728_vm1, %v1760_v14, %v1762_v40  ;;  %v1873_v60 = vsel %vm1728_vm1, %v1871_v20, %v1872_v6 }
 0x14d   : > { %v970_v11 = vpop.f32.mrf.mxu1  ;;  %v1875_v5 = vsel %vm1728_vm1, %v1872_v6, %v1874_v42  ;;  %9627 = vst [vmem:[#allocation48_spill] sm:$0xff] %v7874_v15  ;;  %v7876_v61 = vpack.c.bf16 %v1763_v1, %v1761_v21  ;;  %v9636_v21 = vld [vmem:[#allocation74_spill] sm:$0xff] }
 0x14e   : > { %v971_v26 = vadd.f32 %v970_v11, %v833_v16  ;;  %v9629_v11 = vld [vmem:[#allocation66_spill] sm:$0xff]  ;;  %v7884_v20 = vpack.c.bf16 %v1875_v5, %v1873_v60  ;;  %v1247_v1 = vrot.slane %v9636_v21, 1  ;;  %v9637_v60 = vld [vmem:[#allocation75_spill] sm:$0xff] }
 0x14f   : > { %9628 = vst [vmem:[#allocation49_spill] sm:$0xff] %v7876_v61  ;;  %v9630_v62 = vunpack.c.l.bf16 %v9629_v11  ;;  %v1248_v5 = vrot.slane %v9637_v60, 1 }
 0x150   : > { %9633 = vst [vmem:[#allocation50_spill] sm:$0xff] %v7884_v20 }
 0x151   : > { %v1481_v32 = vpop.f32.mrf.mxu3  ;;  %v580_v16 = vsub.f32 %v9632_v22, %v9630_v62  ;;  %v1764_v22 = vrot.slane %v9638_v33, 2 }
 0x152   : > { %v7872_v30 = vadd.f32 %v1481_v32, %v7706_v59 }
 0x153   : > { %v1461_v10 = vpop.f32.mrf.mxu2  ;;  %v836_v14 = vpop.f32.mrf.mxu0  ;;  %v634_v59 = vand.u32 2147483647, %v580_v16  ;;  %v9639_v16 = vld [vmem:[#allocation72_spill] sm:$0xff] }
 0x154   : > { %9626 = vst [vmem:[#allocation52_spill] sm:$0xff] %v7872_v30  ;;  %v7882_v63 = vadd.f32 %v1461_v10, %v971_v26 }
 0x155   : > { %v973_v40 = vpop.f32.mrf.mxu1  ;;  %v1250_v32 = vrot.slane %v634_v59, 1 }
 0x156   : > { %v974_v6 = vadd.f32 %v973_v40, %v836_v14  ;;  %1645 = vmatmul.bf16.gmra.mxu3 %v7874_v15  ;;  %2072 = vmatmul.bf16.gmra.mxu0 %v7876_v61  ;;  %v1765_v14 = vrot.slane %v9639_v16, 2  ;;  %v9640_v40 = vld [vmem:[#allocation73_spill] sm:$0xff] }
 0x158   : > { %2274 = vmatmul.bf16.gmra.mxu1 %v7884_v20  ;;  %2461 = vmatmul.bf16.gmra.mxu2 %v9634_v13  ;;  %v1767_v13 = vrot.slane %v9640_v40, 2  ;;  %v1876_v20 = vrot.slane %v9636_v21, 2  ;;  %v1766_v33 = vsel %vm1728_vm1, %v1764_v22, %v1765_v14 }
 0x159   : > { %v1484_v10 = vpop.f32.mrf.mxu3 }
 0x15a   : > { %v7894_v42 = vadd.f32 %v1484_v10, %v7728_v0  ;;  %v1877_v0 = vrot.slane %v9637_v60, 2  ;;  %v1879_v10 = vrot.slane %v634_v59, 2  ;;  %v1768_v16 = vsel %vm1728_vm1, %v1765_v14, %v1767_v13  ;;  %v6025_v59 = vld [vmem:[%s9123_s3 + $0x118] sm:$0xff] }
 0x15b   : > { %v1464_v26 = vpop.f32.mrf.mxu2  ;;  %v838_v62 = vpop.f32.mrf.mxu0  ;;  %v9646_v13 = vld [vmem:[#allocation79_spill] sm:$0xff]  ;;  %3008 = vmatpush.bf16.msra.mxu1 %v6025_v59 }
 0x15c   : > { %9635 = vst [vmem:[#allocation54_spill] sm:$0xff] %v7894_v42  ;;  %v7898_v11 = vadd.f32 %v1464_v26, %v974_v6  ;;  %v6017_v42 = vld [vmem:[%s9122_s2 + $0x118] sm:$0xff]  ;;  %v1249_v6 = vsel %vm1051_vm0, %v1247_v1, %v1248_v5  ;;  %v1251_v26 = vsel %vm1051_vm0, %v1248_v5, %v1250_v32  ;;  %v1878_v40 = vsel %vm1728_vm1, %v1876_v20, %v1877_v0  ;;  %v9644_v32 = vld [vmem:[#allocation80_spill] sm:$0xff] }
 0x15d   : > { %v975_v3 = vpop.f32.mrf.mxu1  ;;  %2821 = vmatpush.bf16.msra.mxu0 %v6017_v42  ;;  %v1880_v21 = vsel %vm1728_vm1, %v1877_v0, %v1879_v10  ;;  %v7920_v1 = vpack.c.bf16 %v1251_v26, %v1249_v6  ;;  %v7922_v5 = vpack.c.bf16 %v1768_v16, %v1766_v33  ;;  %v9647_v22 = vunpack.c.l.bf16 %v9646_v13  ;;  %v9649_v6 = vld [vmem:[#allocation97_spill] sm:$0xff] }
 0x15e   : > { %v976_v30 = vadd.f32 %v975_v3, %v838_v62  ;;  %v9645_v62 = vunpack.c.l.bf16 %v9644_v32  ;;  %v7930_v0 = vpack.c.bf16 %v1880_v21, %v1878_v40  ;;  %v9652_v40 = vld [vmem:[#allocation90_spill] sm:$0xff] }
 0x15f   : > { %9642 = vst [vmem:[#allocation62_spill] sm:$0xff] %v7920_v1  ;;  %v1253_v21 = vrot.slane %v9652_v40, 1 }
 0x160   : > { %9643 = vst [vmem:[#allocation63_spill] sm:$0xff] %v7922_v5  ;;  %v583_v20 = vsub.f32 %v9647_v22, %v9645_v62  ;;  %v9654_v62 = vld [vmem:[#allocation86_spill] sm:$0xff]  ;;  %v9655_v22 = vld [vmem:[#allocation87_spill] sm:$0xff] }
 0x161   : > { %v1486_v60 = vpop.f32.mrf.mxu3  ;;  %9648 = vst [vmem:[#allocation59_spill] sm:$0xff] %v7930_v0  ;;  %v1769_v13 = vrot.slane %v9654_v62, 2 }
 0x162   : > { %v7918_v42 = vadd.f32 %v1486_v60, %v7752_v39  ;;  %v637_v39 = vand.u32 2147483647, %v583_v20  ;;  %v1770_v20 = vrot.slane %v9655_v22, 2 }
 0x163   : > { %v1466_v61 = vpop.f32.mrf.mxu2  ;;  %v841_v3 = vpop.f32.mrf.mxu0 }
 0x164   : > { %9641 = vst [vmem:[#allocation53_spill] sm:$0xff] %v7918_v42  ;;  %v7928_v14 = vadd.f32 %v1466_v61, %v976_v30  ;;  %v9651_v30 = vld [vmem:[#allocation89_spill] sm:$0xff]  ;;  %v1255_v59 = vrot.slane %v637_v39, 1  ;;  %v1771_v62 = vsel %vm1728_vm1, %v1769_v13, %v1770_v20 }
 0x165   : > { %v978_v10 = vpop.f32.mrf.mxu1  ;;  %v1252_v61 = vrot.slane %v9651_v30, 1  ;;  %v9664_v13 = vld [vmem:[#allocation93_spill] sm:$0xff] }
 0x166   : > { %v979_v15 = vadd.f32 %v978_v10, %v841_v3  ;;  %1650 = vmatmul.bf16.gmra.mxu3 %v7920_v1  ;;  %2077 = vmatmul.bf16.gmra.mxu0 %v7922_v5  ;;  %v9656_v3 = vld [vmem:[#allocation88_spill] sm:$0xff] }
 0x167   : > { %v1772_v10 = vrot.slane %v9656_v3, 2 }
 0x168   : > { %2279 = vmatmul.bf16.gmra.mxu1 %v7930_v0  ;;  %2466 = vmatmul.bf16.gmra.mxu2 %v9649_v6  ;;  %v1881_v0 = vrot.slane %v9651_v30, 2 }
 0x169   : > { %v1489_v26 = vpop.f32.mrf.mxu3  ;;  %v1773_v22 = vsel %vm1728_vm1, %v1770_v20, %v1772_v10 }
 0x16a   : > { %v7937_v16 = vadd.f32 %v1489_v26, %v7771_v9  ;;  %v1882_v9 = vrot.slane %v9652_v40, 2  ;;  %v1884_v26 = vrot.slane %v637_v39, 2 }
 0x16b   : > { %v1469_v33 = vpop.f32.mrf.mxu2  ;;  %v843_v32 = vpop.f32.mrf.mxu0 }
 0x16c   : > { %9650 = vst [vmem:[#allocation60_spill] sm:$0xff] %v7937_v16  ;;  %v7941_v60 = vadd.f32 %v1469_v33, %v979_v15  ;;  %v6037_v16 = vld [vmem:[%s9122_s2 + $0x178] sm:$0xff]  ;;  %v1254_v15 = vsel %vm1051_vm0, %v1252_v61, %v1253_v21  ;;  %v1256_v33 = vsel %vm1051_vm0, %v1253_v21, %v1255_v59  ;;  %v1883_v3 = vsel %vm1728_vm1, %v1881_v0, %v1882_v9  ;;  %v9662_v59 = vld [vmem:[#allocation94_spill] sm:$0xff] }
 0x16d   : > { %v980_v6 = vpop.f32.mrf.mxu1  ;;  %3205 = vmatpush.bf16.msra.mxu2 %v6037_v16  ;;  %v1885_v30 = vsel %vm1728_vm1, %v1882_v9, %v1884_v26  ;;  %v7960_v1 = vpack.c.bf16 %v1256_v33, %v1254_v15  ;;  %v9665_v0 = vunpack.c.l.bf16 %v9664_v13  ;;  %v9667_v15 = vld [vmem:[#allocation103_spill] sm:$0xff] }
 0x16e   : > { %9653 = vst [vmem:[#allocation61_spill] sm:$0xff] %v7941_v60  ;;  %v981_v42 = vadd.f32 %v980_v6, %v843_v32  ;;  %v7962_v6 = vpack.c.bf16 %v1773_v22, %v1771_v62  ;;  %v7966_v21 = vpack.c.bf16 %v1885_v30, %v1883_v3  ;;  %v9663_v32 = vunpack.c.l.bf16 %v9662_v59  ;;  %v9668_v22 = vld [vmem:[#allocation104_spill] sm:$0xff]  ;;  %v9669_v30 = vld [vmem:[#allocation105_spill] sm:$0xff] }
 0x16f   : > { %9658 = vst [vmem:[#allocation65_spill] sm:$0xff] %v7960_v1  ;;  %v1257_v3 = vrot.slane %v9668_v22, 1 }
 0x170   : > { %9659 = vst [vmem:[#allocation74_spill] sm:$0xff] %v7962_v6  ;;  %v586_v20 = vsub.f32 %v9665_v0, %v9663_v32  ;;  %v9670_v32 = vld [vmem:[#allocation100_spill] sm:$0xff]  ;;  %v9671_v0 = vld [vmem:[#allocation101_spill] sm:$0xff] }
 0x171   : > { %v1491_v40 = vpop.f32.mrf.mxu3  ;;  %9661 = vst [vmem:[#allocation71_spill] sm:$0xff] %v7966_v21  ;;  %v1774_v13 = vrot.slane %v9670_v32, 2 }
 0x172   : > { %v7958_v5 = vadd.f32 %v1491_v40, %v7789_v25  ;;  %v6008_v25 = vld [vmem:[%s9123_s3 + $0xd0] sm:$0xff]  ;;  %v640_v9 = vand.u32 2147483647, %v586_v20  ;;  %v1258_v40 = vrot.slane %v9669_v30, 1  ;;  %v1886_v20 = vrot.slane %v9668_v22, 2 }
 0x173   : > { %v1471_v39 = vpop.f32.mrf.mxu2  ;;  %v2043_v61 = vpop.f32.mrf.mxu0  ;;  %2615 = vmatpush.bf16.msra.mxu3 %v6008_v25  ;;  %v1887_v25 = vrot.slane %v9669_v30, 2  ;;  %v6024_v22 = vld [vmem:[%s9123_s3 + $0x110] sm:$0xff] }
 0x174   : > { %9657 = vst [vmem:[#allocation66_spill] sm:$0xff] %v7958_v5  ;;  %v7964_v16 = vadd.f32 %v1471_v39, %v981_v42  ;;  %v9666_v42 = vld [vmem:[#allocation113_spill] sm:$0xff]  ;;  %v1260_v59 = vrot.slane %v640_v9, 1  ;;  %v1775_v5 = vrot.slane %v9671_v0, 2  ;;  %v1259_v60 = vsel %vm1051_vm0, %v1257_v3, %v1258_v40  ;;  %3009 = vmatpush.bf16.msra.mxu1 %v6024_v22 }
 0x175   : > { %v2245_v10 = vpop.f32.mrf.mxu1 }
 0x176   : > { %9660 = vst [vmem:[#allocation75_spill] sm:$0xff] %v7964_v16  ;;  %1655 = vmatmul.bf16.gmra.mxu3 %v7960_v1  ;;  %2082 = vmatmul.bf16.gmra.mxu0 %v7962_v6  ;;  %v9672_v6 = vld [vmem:[#allocation102_spill] sm:$0xff]  ;;  %v1261_v32 = vsel %vm1051_vm0, %v1258_v40, %v1260_v59  ;;  %v1776_v0 = vsel %vm1728_vm1, %v1774_v13, %v1775_v5 }
 0x177   : > { %v8002_v3 = vpack.c.bf16 %v1261_v32, %v1259_v60  ;;  %v9680_v13 = vld [vmem:[#allocation106_spill] sm:$0xff] }
 0x178   : > { %2284 = vmatmul.bf16.gmra.mxu1 %v7966_v21  ;;  %2471 = vmatmul.bf16.gmra.mxu2 %v9666_v42  ;;  %v1777_v21 = vrot.slane %v9672_v6, 2 }
 0x179   : > { %v1616_v26 = vpop.f32.mrf.mxu3  ;;  %9675 = vst [vmem:[#allocation73_spill] sm:$0xff] %v8002_v3 }
 0x17a   : > { %v1696_v33 = vadd.f32 %v1616_v26, %v9667_v15  ;;  %v1889_v26 = vrot.slane %v640_v9, 2  ;;  %v6016_v15 = vld [vmem:[%s9122_s2 + $0x110] sm:$0xff]  ;;  %v1778_v6 = vsel %vm1728_vm1, %v1775_v5, %v1777_v21  ;;  %v9678_v21 = vld [vmem:[#allocation107_spill] sm:$0xff] }
 0x17b   : > { %v2432_v62 = vpop.f32.mrf.mxu2  ;;  %v2045_v39 = vpop.f32.mrf.mxu0  ;;  %2822 = vmatpush.bf16.msra.mxu0 %v6016_v15  ;;  %v8004_v40 = vpack.c.bf16 %v1778_v6, %v1776_v0 }
 0x17c   : > { %v2123_v1 = vadd.f32 %v2043_v61, %v1696_v33  ;;  %v1888_v33 = vsel %vm1728_vm1, %v1886_v20, %v1887_v25  ;;  %v1890_v9 = vsel %vm1728_vm1, %v1887_v25, %v1889_v26  ;;  %v9681_v20 = vunpack.c.l.bf16 %v9680_v13  ;;  %v9686_v13 = vld [vmem:[#allocation115_spill] sm:$0xff] }
 0x17d   : > { %v2247_v42 = vpop.f32.mrf.mxu1  ;;  %9676 = vst [vmem:[#allocation80_spill] sm:$0xff] %v8004_v40 }
 0x17e   : > { %v2325_v16 = vadd.f32 %v2245_v10, %v2123_v1  ;;  %v9674_v10 = vld [vmem:[#allocation112_spill] sm:$0xff] }
 0x180   : > { %v7994_v61 = vadd.f32 %v2432_v62, %v2325_v16  ;;  %v8006_v16 = vpack.c.bf16 %v1890_v9, %v1888_v33  ;;  %v9679_v62 = vunpack.c.l.bf16 %v9678_v21  ;;  %v9683_v33 = vld [vmem:[#allocation119_spill] sm:$0xff] }
 0x181   : > { %v1618_v1 = vpop.f32.mrf.mxu3 }
 0x182   : > { %9673 = vst [vmem:[#allocation72_spill] sm:$0xff] %v7994_v61  ;;  %v1697_v30 = vadd.f32 %v1618_v1, %v9674_v10  ;;  %v589_v25 = vsub.f32 %v9681_v20, %v9679_v62  ;;  %v9684_v1 = vld [vmem:[#allocation120_spill] sm:$0xff]  ;;  %v1779_v20 = vrot.slane %v9686_v13, 2 }
 0x183   : > { %v2434_v59 = vpop.f32.mrf.mxu2  ;;  %v2048_v5 = vpop.f32.mrf.mxu0  ;;  %9677 = vst [vmem:[#allocation79_spill] sm:$0xff] %v8006_v16  ;;  %v1262_v10 = vrot.slane %v9684_v1, 1 }
 0x184   : > { %v2124_v26 = vadd.f32 %v2045_v39, %v1697_v30  ;;  %v643_v32 = vand.u32 2147483647, %v589_v25  ;;  %v9685_v39 = vld [vmem:[#allocation121_spill] sm:$0xff] }
 0x185   : > { %v2250_v15 = vpop.f32.mrf.mxu1  ;;  %v1263_v30 = vrot.slane %v9685_v39, 1 }
 0x186   : > { %1660 = vmatmul.bf16.gmra.mxu3 %v8002_v3  ;;  %2087 = vmatmul.bf16.gmra.mxu0 %v8004_v40  ;;  %v2326_v60 = vadd.f32 %v2247_v42, %v2124_v26  ;;  %v1265_v62 = vrot.slane %v643_v32, 1  ;;  %v9687_v42 = vld [vmem:[#allocation116_spill] sm:$0xff] }
 0x187   : > { %v1780_v26 = vrot.slane %v9687_v42, 2  ;;  %v1264_v40 = vsel %vm1051_vm0, %v1262_v10, %v1263_v30 }
 0x188   : > { %2289 = vmatmul.bf16.gmra.mxu1 %v8006_v16  ;;  %2476 = vmatmul.bf16.gmra.mxu2 %v7502_v19  ;;  %v8016_v0 = vadd.f32 %v2434_v59, %v2326_v60  ;;  %v9688_v16 = vld [vmem:[#allocation117_spill] sm:$0xff]  ;;  %v1891_v59 = vrot.slane %v9684_v1, 2  ;;  %v1892_v60 = vrot.slane %v9685_v39, 2  ;;  %v1266_v13 = vsel %vm1051_vm0, %v1263_v30, %v1265_v62 }
 0x189   : > { %v1621_v6 = vpop.f32.mrf.mxu3  ;;  %v1782_v61 = vrot.slane %v9688_v16, 2  ;;  %v1781_v42 = vsel %vm1728_vm1, %v1779_v20, %v1780_v26  ;;  %v8038_v3 = vpack.c.bf16 %v1266_v13, %v1264_v40  ;;  %v9692_v62 = vunpack.c.l.bf16 %v7494_v50  ;;  %v6007_v40 = vld [vmem:[%s9123_s3 + $0xc8] sm:$0xff] }
 0x18a   : > { %9682 = vst [vmem:[#allocation89_spill] sm:$0xff] %v8016_v0  ;;  %v1698_v9 = vadd.f32 %v1621_v6, %v9683_v33  ;;  %v1894_v6 = vrot.slane %v643_v32, 2  ;;  %v6036_v33 = vld [vmem:[%s9122_s2 + $0x170] sm:$0xff]  ;;  %2616 = vmatpush.bf16.msra.mxu3 %v6007_v40  ;;  %v1784_v13 = vrot.slane %v7554_v7, 2 }
 0x18b   : > { %v2437_v22 = vpop.f32.mrf.mxu2  ;;  %v2050_v21 = vpop.f32.mrf.mxu0  ;;  %3206 = vmatpush.bf16.msra.mxu2 %v6036_v33  ;;  %9689 = vst [vmem:[#allocation90_spill] sm:$0xff] %v8038_v3 }
 0x18c   : > { %v2125_v19 = vadd.f32 %v2048_v5, %v1698_v9  ;;  %v1783_v5 = vsel %vm1728_vm1, %v1780_v26, %v1782_v61  ;;  %v1893_v9 = vsel %vm1728_vm1, %v1891_v59, %v1892_v60  ;;  %v1895_v32 = vsel %vm1728_vm1, %v1892_v60, %v1894_v6 }
 0x18d   : > { %v2252_v25 = vpop.f32.mrf.mxu1  ;;  %v8042_v30 = vpack.c.bf16 %v1895_v32, %v1893_v9  ;;  %v9693_v61 = vunpack.c.l.bf16 %v7491_v49  ;;  %v1267_v60 = vrot.slane %v7594_v57, 1 }
 0x18e   : > { %v2327_v0 = vadd.f32 %v2250_v15, %v2125_v19  ;;  %v8040_v19 = vpack.c.bf16 %v1783_v5, %v1781_v42  ;;  %v1785_v42 = vrot.slane %v7565_v27, 2  ;;  %v1787_v5 = vrot.slane %v7571_v48, 2 }
 0x18f   : > { %9691 = vst [vmem:[#allocation87_spill] sm:$0xff] %v8042_v30 }
 0x190   : > { %v8033_v16 = vadd.f32 %v2437_v22, %v2327_v0  ;;  %9690 = vst [vmem:[#allocation86_spill] sm:$0xff] %v8040_v19  ;;  %v592_v0 = vsub.f32 %v9693_v61, %v9692_v62  ;;  %v1786_v27 = vsel %vm1728_vm1, %v1784_v13, %v1785_v42  ;;  %v1788_v48 = vsel %vm1728_vm1, %v1785_v42, %v1787_v5 }
 0x191   : > { %v1623_v1 = vpop.f32.mrf.mxu3  ;;  %v8082_v40 = vpack.c.bf16 %v1788_v48, %v1786_v27 }
 0x192   : > { %v1699_v39 = vadd.f32 %v1623_v1, %v7521_v35  ;;  %v646_v26 = vand.u32 2147483647, %v592_v0  ;;  %v1896_v1 = vrot.slane %v7594_v57, 2  ;;  %v6023_v0 = vld [vmem:[%s9123_s3 + $0x108] sm:$0xff] }
 0x193   : > { %v2439_v15 = vpop.f32.mrf.mxu2  ;;  %v2053_v10 = vpop.f32.mrf.mxu0  ;;  %9695 = vst [vmem:[#allocation94_spill] sm:$0xff] %v8082_v40  ;;  %3010 = vmatpush.bf16.msra.mxu1 %v6023_v0 }
 0x194   : > { %v2126_v22 = vadd.f32 %v2050_v21, %v1699_v39  ;;  %v1270_v33 = vrot.slane %v646_v26, 1  ;;  %v1897_v39 = vrot.slane %v7596_v23, 2 }
 0x195   : > { %v2255_v20 = vpop.f32.mrf.mxu1 }
 0x196   : > { %1665 = vmatmul.bf16.gmra.mxu3 %v8038_v3  ;;  %2092 = vmatmul.bf16.gmra.mxu0 %v8040_v19  ;;  %v2328_v35 = vadd.f32 %v2252_v25, %v2126_v22  ;;  %v1268_v25 = vrot.slane %v7596_v23, 1  ;;  %v1898_v57 = vsel %vm1728_vm1, %v1896_v1, %v1897_v39 }
 0x198   : > { %2294 = vmatmul.bf16.gmra.mxu1 %v8042_v30  ;;  %2481 = vmatmul.bf16.gmra.mxu2 %v7614_v17  ;;  %v8055_v50 = vadd.f32 %v2439_v15, %v2328_v35  ;;  %v6015_v15 = vld [vmem:[%s9122_s2 + $0x108] sm:$0xff]  ;;  %v1269_v61 = vsel %vm1051_vm0, %v1267_v60, %v1268_v25  ;;  %v1271_v7 = vsel %vm1051_vm0, %v1268_v25, %v1270_v33 }
 0x199   : > { %v1626_v49 = vpop.f32.mrf.mxu3  ;;  %2823 = vmatpush.bf16.msra.mxu0 %v6015_v15  ;;  %v8080_v35 = vpack.c.bf16 %v1271_v7, %v1269_v61  ;;  %v9699_v25 = vld [vmem:[#allocation77_spill] sm:$0xff]  ;;  %v9702_v61 = vld [vmem:[#allocation8_spill] sm:$0xff] }
 0x19a   : > { %v1700_v21 = vadd.f32 %v1626_v49, %v7580_v37  ;;  %v1899_v37 = vrot.slane %v646_v26, 2  ;;  %v9700_v33 = vunpack.c.l.bf16 %v9699_v25  ;;  %v1272_v7 = vrot.slane %v9702_v61, 1 }
 0x19b   : > { %v2442_v59 = vpop.f32.mrf.mxu2  ;;  %v2055_v6 = vpop.f32.mrf.mxu0  ;;  %9694 = vst [vmem:[#allocation88_spill] sm:$0xff] %v8080_v35 }
 0x19c   : > { %v2127_v9 = vadd.f32 %v2053_v10, %v1700_v21  ;;  %v1900_v23 = vsel %vm1728_vm1, %v1897_v39, %v1899_v37 }
 0x19d   : > { %v2257_v32 = vpop.f32.mrf.mxu1  ;;  %v8084_v21 = vpack.c.bf16 %v1900_v23, %v1898_v57  ;;  %v9704_v23 = vld [vmem:[#allocation22_spill] sm:$0xff] }
 0x19e   : > { %v2329_v62 = vadd.f32 %v2255_v20, %v2127_v9  ;;  %v9701_v9 = vld [vmem:[#allocation45_spill] sm:$0xff]  ;;  %v1789_v0 = vrot.slane %v9704_v23, 2 }
 0x19f   : > { %9696 = vst [vmem:[#allocation93_spill] sm:$0xff] %v8084_v21 }
 0x1a0   : > { %v8072_v10 = vadd.f32 %v2442_v59, %v2329_v62  ;;  %v9697_v59 = vld [vmem:[#allocation78_spill] sm:$0xff] }
 0x1a1   : > { %v1628_v22 = vpop.f32.mrf.mxu3  ;;  %v9698_v60 = vunpack.c.l.bf16 %v9697_v59 }
 0x1a2   : > { %v1701_v20 = vadd.f32 %v1628_v22, %v7610_v53 }
 0x1a3   : > { %v2444_v26 = vpop.f32.mrf.mxu2  ;;  %v2058_v49 = vpop.f32.mrf.mxu0  ;;  %v595_v13 = vsub.f32 %v9700_v33, %v9698_v60 }
 0x1a4   : > { %v2128_v42 = vadd.f32 %v2055_v6, %v1701_v20  ;;  %v9703_v6 = vld [vmem:[#allocation9_spill] sm:$0xff] }
 0x1a5   : > { %v2260_v5 = vpop.f32.mrf.mxu1  ;;  %v649_v1 = vand.u32 2147483647, %v595_v13  ;;  %v1273_v27 = vrot.slane %v9703_v6, 1  ;;  %v9706_v20 = vld [vmem:[#allocation85_spill] sm:$0xff]  ;;  %v1902_v33 = vrot.slane %v9703_v6, 2 }
 0x1a6   : > { %1670 = vmatmul.bf16.gmra.mxu3 %v8080_v35  ;;  %2097 = vmatmul.bf16.gmra.mxu0 %v8082_v40  ;;  %v2330_v53 = vadd.f32 %v2257_v32, %v2128_v42  ;;  %v9705_v32 = vld [vmem:[#allocation23_spill] sm:$0xff]  ;;  %v1792_v59 = vrot.slane %v9706_v20, 2  ;;  %v6035_v13 = vld [vmem:[%s9122_s2 + $0x168] sm:$0xff] }
 0x1a7   : > { %v1275_v57 = vrot.slane %v649_v1, 1  ;;  %v1790_v22 = vrot.slane %v9705_v32, 2  ;;  %3207 = vmatpush.bf16.msra.mxu2 %v6035_v13 }
 0x1a8   : > { %2299 = vmatmul.bf16.gmra.mxu1 %v8084_v21  ;;  %2486 = vmatmul.bf16.gmra.mxu2 %v9701_v9  ;;  %v8094_v39 = vadd.f32 %v2444_v26, %v2330_v53  ;;  %v1901_v26 = vrot.slane %v9702_v61, 2  ;;  %v1274_v53 = vsel %vm1051_vm0, %v1272_v7, %v1273_v27  ;;  %v6033_v21 = vld [vmem:[%s9122_s2 + $0x158] sm:$0xff] }
 0x1a9   : > { %v1631_v37 = vpop.f32.mrf.mxu3  ;;  %v1791_v23 = vsel %vm1728_vm1, %v1789_v0, %v1790_v22 }
 0x1aa   : > { %v1702_v15 = vadd.f32 %v1631_v37, %v7624_v51  ;;  %v1904_v51 = vrot.slane %v649_v1, 2  ;;  %v1276_v37 = vsel %vm1051_vm0, %v1273_v27, %v1275_v57  ;;  %v1903_v61 = vsel %vm1728_vm1, %v1901_v26, %v1902_v33  ;;  %v9710_v57 = vld [vmem:[#allocation92_spill] sm:$0xff] }
 0x1ab   : > { %v2447_v62 = vpop.f32.mrf.mxu2  ;;  %v2060_v48 = vpop.f32.mrf.mxu0  ;;  %v8116_v20 = vpack.c.bf16 %v1276_v37, %v1274_v53  ;;  %v9711_v0 = vunpack.c.l.bf16 %v9710_v57  ;;  %v9717_v57 = vld [vmem:[#allocation34_spill] sm:$0xff] }
 0x1ac   : > { %v2129_v60 = vadd.f32 %v2058_v49, %v1702_v15  ;;  %v1793_v49 = vsel %vm1728_vm1, %v1790_v22, %v1792_v59  ;;  %v1905_v1 = vsel %vm1728_vm1, %v1902_v33, %v1904_v51  ;;  %v9712_v22 = vld [vmem:[#allocation91_spill] sm:$0xff]  ;;  %v6006_v33 = vld [vmem:[%s9123_s3 + $0xc0] sm:$0xff]  ;;  %v9714_v51 = vld [vmem:[#allocation57_spill] sm:$0xff] }
 0x1ad   : > { %v2262_v25 = vpop.f32.mrf.mxu1  ;;  %9707 = vst [vmem:[#allocation103_spill] sm:$0xff] %v8116_v20  ;;  %v8120_v27 = vpack.c.bf16 %v1905_v1, %v1903_v61  ;;  %2617 = vmatpush.bf16.msra.mxu3 %v6006_v33  ;;  %v9716_v1 = vld [vmem:[#allocation12_spill] sm:$0xff] }
 0x1ae   : > { %v2331_v42 = vadd.f32 %v2260_v5, %v2129_v60  ;;  %v8118_v5 = vpack.c.bf16 %v1793_v49, %v1791_v23  ;;  %v9715_v49 = vld [vmem:[#allocation11_spill] sm:$0xff]  ;;  %v1907_v33 = vrot.slane %v9716_v1, 2 }
 0x1af   : > { %9709 = vst [vmem:[#allocation105_spill] sm:$0xff] %v8120_v27  ;;  %v1277_v61 = vrot.slane %v9715_v49, 1 }
 0x1b0   : > { %v8111_v15 = vadd.f32 %v2447_v62, %v2331_v42  ;;  %9708 = vst [vmem:[#allocation104_spill] sm:$0xff] %v8118_v5  ;;  %v9713_v62 = vunpack.c.l.bf16 %v9712_v22  ;;  %v9718_v22 = vld [vmem:[#allocation35_spill] sm:$0xff] }
 0x1b1   : > { %v1633_v6 = vpop.f32.mrf.mxu3 }
 0x1b2   : > { %v1703_v32 = vadd.f32 %v1633_v6, %v7632_v44  ;;  %v598_v59 = vsub.f32 %v9713_v62, %v9711_v0  ;;  %v1794_v0 = vrot.slane %v9717_v57, 2  ;;  %v1795_v62 = vrot.slane %v9718_v22, 2 }
 0x1b3   : > { %v2449_v7 = vpop.f32.mrf.mxu2  ;;  %v2063_v60 = vpop.f32.mrf.mxu0 }
 0x1b4   : > { %v2130_v13 = vadd.f32 %v2060_v48, %v1703_v32  ;;  %v652_v42 = vand.u32 2147483647, %v598_v59  ;;  %v1796_v22 = vsel %vm1728_vm1, %v1794_v0, %v1795_v62 }
 0x1b5   : > { %v2265_v26 = vpop.f32.mrf.mxu1 }
 0x1b6   : > { %1675 = vmatmul.bf16.gmra.mxu3 %v8116_v20  ;;  %2102 = vmatmul.bf16.gmra.mxu0 %v8118_v5  ;;  %v2332_v44 = vadd.f32 %v2262_v25, %v2130_v13  ;;  %v1278_v25 = vrot.slane %v9716_v1, 1  ;;  %v1280_v32 = vrot.slane %v652_v42, 1  ;;  %v9719_v13 = vld [vmem:[#allocation99_spill] sm:$0xff]  ;;  %v6022_v1 = vld [vmem:[%s9123_s3 + $0x100] sm:$0xff] }
 0x1b7   : > { %3011 = vmatpush.bf16.msra.mxu1 %v6022_v1 }
 0x1b8   : > { %2304 = vmatmul.bf16.gmra.mxu1 %v8120_v27  ;;  %2491 = vmatmul.bf16.gmra.mxu2 %v9714_v51  ;;  %v8133_v53 = vadd.f32 %v2449_v7, %v2332_v44  ;;  %v1797_v51 = vrot.slane %v9719_v13, 2  ;;  %v1906_v44 = vrot.slane %v9715_v49, 2  ;;  %v1279_v9 = vsel %vm1051_vm0, %v1277_v61, %v1278_v25 }
 0x1b9   : > { %v1636_v37 = vpop.f32.mrf.mxu3  ;;  %v1281_v57 = vsel %vm1051_vm0, %v1278_v25, %v1280_v32 }
 0x1ba   : > { %v1704_v48 = vadd.f32 %v1636_v37, %v7649_v29  ;;  %v1909_v29 = vrot.slane %v652_v42, 2  ;;  %v6014_v37 = vld [vmem:[%s9122_s2 + $0x100] sm:$0xff]  ;;  %v1908_v49 = vsel %vm1728_vm1, %v1906_v44, %v1907_v33  ;;  %v8158_v61 = vpack.c.bf16 %v1281_v57, %v1279_v9  ;;  %v9727_v9 = vld [vmem:[#allocation69_spill] sm:$0xff] }
 0x1bb   : > { %v2452_v23 = vpop.f32.mrf.mxu2  ;;  %v2065_v6 = vpop.f32.mrf.mxu0  ;;  %2824 = vmatpush.bf16.msra.mxu0 %v6014_v37 }
 0x1bc   : > { %v2131_v59 = vadd.f32 %v2063_v60, %v1704_v48  ;;  %v1798_v60 = vsel %vm1728_vm1, %v1795_v62, %v1797_v51  ;;  %v1910_v42 = vsel %vm1728_vm1, %v1907_v33, %v1909_v29  ;;  %9720 = vst [vmem:[#allocation100_spill] sm:$0xff] %v8158_v61  ;;  %v9725_v62 = vld [vmem:[#allocation108_spill] sm:$0xff] }
 0x1bd   : > { %v2267_v7 = vpop.f32.mrf.mxu1  ;;  %v8160_v25 = vpack.c.bf16 %v1798_v60, %v1796_v22  ;;  %v6034_v22 = vld [vmem:[%s9122_s2 + $0x160] sm:$0xff] }
 0x1be   : > { %v2333_v27 = vadd.f32 %v2265_v26, %v2131_v59  ;;  %v9726_v59 = vunpack.c.l.bf16 %v9725_v62  ;;  %3208 = vmatpush.bf16.msra.mxu2 %v6034_v22 }
 0x1bf   : > { %9721 = vst [vmem:[#allocation101_spill] sm:$0xff] %v8160_v25 }
 0x1c0   : > { %v8150_v48 = vadd.f32 %v2452_v23, %v2333_v27  ;;  %v8162_v27 = vpack.c.bf16 %v1910_v42, %v1908_v49  ;;  %v9723_v23 = vld [vmem:[#allocation109_spill] sm:$0xff]  ;;  %v9728_v42 = vld [vmem:[#allocation16_spill] sm:$0xff] }
 0x1c1   : > { %v1638_v26 = vpop.f32.mrf.mxu3  ;;  %v9724_v0 = vunpack.c.l.bf16 %v9723_v23  ;;  %v1282_v1 = vrot.slane %v9728_v42, 1 }
 0x1c2   : > { %v1705_v13 = vadd.f32 %v1638_v26, %v7679_v28  ;;  %9722 = vst [vmem:[#allocation102_spill] sm:$0xff] %v8162_v27  ;;  %v9729_v26 = vld [vmem:[#allocation17_spill] sm:$0xff]  ;;  %3209 = vmatpush.bf16.msra.mxu2 %v6033_v21  ;;  %v9733_v21 = vunpack.c.l.bf16 %v7508_v46 }
 0x1c3   : > { %v2454_v32 = vpop.f32.mrf.mxu2  ;;  %v2068_v51 = vpop.f32.mrf.mxu0  ;;  %v601_v44 = vsub.f32 %v9726_v59, %v9724_v0  ;;  %v9730_v0 = vld [vmem:[#allocation64_spill] sm:$0xff]  ;;  %v9731_v59 = vld [vmem:[#allocation47_spill] sm:$0xff] }
 0x1c4   : > { %v2132_v33 = vadd.f32 %v2065_v6, %v1705_v13  ;;  %v1283_v13 = vrot.slane %v9729_v26, 1  ;;  %v1799_v62 = vrot.slane %v9730_v0, 2 }
 0x1c5   : > { %v2270_v29 = vpop.f32.mrf.mxu1  ;;  %v655_v37 = vand.u32 2147483647, %v601_v44  ;;  %v9732_v44 = vld [vmem:[#allocation118_spill] sm:$0xff] }
 0x1c6   : > { %1680 = vmatmul.bf16.gmra.mxu3 %v8158_v61  ;;  %2107 = vmatmul.bf16.gmra.mxu0 %v8160_v25  ;;  %v2334_v28 = vadd.f32 %v2267_v7, %v2132_v33  ;;  %v1802_v33 = vrot.slane %v9732_v44, 2  ;;  %v1284_v17 = vsel %vm1051_vm0, %v1282_v1, %v1283_v13  ;;  %v9734_v1 = vunpack.c.l.bf16 %v7505_v4  ;;  %v6031_v4 = vld [vmem:[%s9122_s2 + $0x148] sm:$0xff] }
 0x1c7   : > { %v1285_v23 = vrot.slane %v655_v37, 1 }
 0x1c8   : > { %2309 = vmatmul.bf16.gmra.mxu1 %v8162_v27  ;;  %2496 = vmatmul.bf16.gmra.mxu2 %v9727_v9  ;;  %v8172_v57 = vadd.f32 %v2454_v32, %v2334_v28  ;;  %v1800_v32 = vrot.slane %v9731_v59, 2  ;;  %v1911_v27 = vrot.slane %v9728_v42, 2 }
 0x1c9   : > { %v1641_v60 = vpop.f32.mrf.mxu3  ;;  %v1286_v0 = vsel %vm1051_vm0, %v1283_v13, %v1285_v23  ;;  %v604_v13 = vsub.f32 %v9734_v1, %v9733_v21  ;;  %v1804_v1 = vrot.slane %v7219_v58, 2 }
 0x1ca   : > { %v1706_v6 = vadd.f32 %v1641_v60, %v7692_v12  ;;  %v1912_v12 = vrot.slane %v9729_v26, 2  ;;  %v1914_v60 = vrot.slane %v655_v37, 2  ;;  %v1801_v59 = vsel %vm1728_vm1, %v1799_v62, %v1800_v32  ;;  %v6032_v26 = vld [vmem:[%s9122_s2 + $0x150] sm:$0xff] }
 0x1cb   : > { %v2457_v49 = vpop.f32.mrf.mxu2  ;;  %v2070_v7 = vpop.f32.mrf.mxu0  ;;  %v8204_v62 = vpack.c.bf16 %v1286_v0, %v1284_v17  ;;  %3210 = vmatpush.bf16.msra.mxu2 %v6032_v26  ;;  %v658_v46 = vand.u32 2147483647, %v604_v13  ;;  %v9742_v13 = vld [vmem:[#allocation76_spill] sm:$0xff] }
 0x1cc   : > { %v2133_v28 = vadd.f32 %v2068_v51, %v1706_v6  ;;  %v1803_v51 = vsel %vm1728_vm1, %v1800_v32, %v1802_v33  ;;  %v1913_v42 = vsel %vm1728_vm1, %v1911_v27, %v1912_v12  ;;  %v1915_v37 = vsel %vm1728_vm1, %v1912_v12, %v1914_v60  ;;  %v9738_v12 = vld [vmem:[#allocation83_spill] sm:$0xff]  ;;  %v8223_v60 = vld [vmem:[%s6610_s29 + $0xc0] sm:$0xff]  }
 0x1cd   : > { %v2272_v9 = vpop.f32.mrf.mxu1  ;;  %9735 = vst [vmem:[#allocation112_spill] sm:$0xff] %v8204_v62  ;;  %v8208_v44 = vpack.c.bf16 %v1915_v37, %v1913_v42  ;;  %v9741_v42 = vld [vmem:[#allocation27_spill] sm:$0xff]  ;;  %v1290_v26 = vrot.slane %v658_v46, 1  ;;  %v1919_v58 = vrot.slane %v658_v46, 2 }
 0x1ce   : > { %v2335_v22 = vadd.f32 %v2270_v29, %v2133_v28  ;;  %v1288_v37 = vrot.slane %v9741_v42, 1 }
 0x1cf   : > { %9737 = vst [vmem:[#allocation106_spill] sm:$0xff] %v8208_v44  ;;  %3211 = vmatpush.bf16.msra.mxu2 %v6031_v4 }
 0x1d0   : > { %v8192_v6 = vadd.f32 %v2457_v49, %v2335_v22  ;;  %v8206_v49 = vpack.c.bf16 %v1803_v51, %v1801_v59  ;;  %v8226_v22 = vld [vmem:[%s6615_s11 + $0xc0] sm:$0xff]   ;;  %v9740_v59 = vld [vmem:[#allocation26_spill] sm:$0xff] }
 0x1d1   : > { %v1643_v29 = vpop.f32.mrf.mxu3  ;;  %v1287_v51 = vrot.slane %v9740_v59, 1 }
 0x1d2   : > { %v1707_v23 = vadd.f32 %v1643_v29, %v7716_v36  ;;  %9736 = vst [vmem:[#allocation107_spill] sm:$0xff] %v8206_v49  ;;  %v6045_v36 = vld [vmem:[%s9123_s3 + $0x178] sm:$0xff] }
 0x1d3   : > { %v2459_v27 = vpop.f32.mrf.mxu2  ;;  %v2073_v32 = vpop.f32.mrf.mxu0  ;;  %3392 = vmatpush.bf16.msrb.mxu3 %v6045_v36  ;;  %v1291_v36 = vsel %vm1051_vm0, %v1288_v37, %v1290_v26  ;;  %v6061_v26 = vld [vmem:[%s9123_s3 + $0x1b8] sm:$0xff] }
 0x1d4   : > { %v2134_v33 = vadd.f32 %v2070_v7, %v1707_v23  ;;  %v1805_v23 = vrot.slane %v9742_v13, 2  ;;  %v6053_v13 = vld [vmem:[%s9122_s2 + $0x1b8] sm:$0xff]  ;;  %3766 = vmatpush.bf16.msrb.mxu1 %v6061_v26 }
 0x1d5   : > { %v2275_v28 = vpop.f32.mrf.mxu1  ;;  %3579 = vmatpush.bf16.msrb.mxu0 %v6053_v13 }
 0x1d6   : > { %1685 = vmatmul.bf16.gmra.mxu3 %v8204_v62  ;;  %2112 = vmatmul.bf16.gmra.mxu0 %v8206_v49  ;;  %v2336_v17 = vadd.f32 %v2272_v9, %v2134_v33  ;;  %v6030_v9 = vld [vmem:[%s9122_s2 + $0x140] sm:$0xff] }
 0x1d7   : > { %3212 = vmatpush.bf16.msra.mxu2 %v6030_v9  ;;  %v9745_v9 = vunpack.c.h.bf16 %v8223_v60 }
 0x1d8   : > { %2314 = vmatmul.bf16.gmra.mxu1 %v8208_v44  ;;  %2501 = vmatmul.bf16.gmra.mxu2 %v9738_v12  ;;  %v8220_v7 = vadd.f32 %v2459_v27, %v2336_v17  ;;  %v9743_v27 = vld [vmem:[#allocation126_spill] sm:$0xff]  ;;  %v9391_v12 = vunpack.c.l.bf16 %v8226_v22  ;;  %v1289_v17 = vsel %vm1051_vm0, %v1287_v51, %v1288_v37  ;;  %v1806_v44 = vsel %vm1728_vm1, %v1804_v1, %v1805_v23 }
 0x1d9   : > { %v1646_v0 = vpop.f32.mrf.mxu3  ;;  %v1807_v33 = vrot.slane %v9743_v27, 2 }
 0x1da   : > { %9739 = vst [vmem:[#allocation119_spill] sm:$0xff] %v8220_v7  ;;  %v1708_v29 = vadd.f32 %v1646_v0, %v7732_v24  ;;  %v1916_v24 = vrot.slane %v9740_v59, 2  ;;  %v1917_v0 = vrot.slane %v9741_v42, 2  ;;  %v9744_v59 = vunpack.c.l.bf16 %v8223_v60 }
 0x1db   : > { %v2462_v21 = vpop.f32.mrf.mxu2  ;;  %v2075_v4 = vpop.f32.mrf.mxu0  ;;  %v9746_v42 = vunpack.c.h.bf16 %v8226_v22 }
 0x1dc   : > { %v2135_v30 = vadd.f32 %v2073_v32, %v1708_v29  ;;  %v1808_v32 = vsel %vm1728_vm1, %v1805_v23, %v1807_v33  ;;  %v8254_v46 = vadd.f32 %v9391_v12, %v9744_v59  ;;  %v1918_v51 = vsel %vm1728_vm1, %v1916_v24, %v1917_v0  ;;  %v9751_v12 = vld [vmem:[#allocation13_spill] sm:$0xff] }
 0x1dd   : > { %v2277_v7 = vpop.f32.mrf.mxu1  ;;  %v1920_v37 = vsel %vm1728_vm1, %v1917_v0, %v1919_v58  ;;  %v8270_v23 = vpack.c.bf16 %v1291_v36, %v1289_v17  ;;  %v8272_v33 = vpack.c.bf16 %v1808_v32, %v1806_v44 }
 0x1de   : > { %v2337_v27 = vadd.f32 %v2275_v28, %v2135_v30  ;;  %v8260_v30 = vadd.f32 %v9746_v42, %v9745_v9 }
 0x1df   : > { %9747 = vst [vmem:[#allocation120_spill] sm:$0xff] %v8270_v23 }
 0x1e0   : > { %v8262_v28 = vadd.f32 %v2462_v21, %v2337_v27  ;;  %9748 = vst [vmem:[#allocation121_spill] sm:$0xff] %v8272_v33  ;;  %v8274_v21 = vpack.c.bf16 %v1920_v37, %v1918_v51  ;;  %v8278_v24 = vpack.c.bf16 %v8260_v30, %v8254_v46 }
 0x1e1   : > { %v1648_v29 = vpop.f32.mrf.mxu3 }
 0x1e2   : > { %v1709_v1 = vadd.f32 %v1648_v29, %v7762_v41  ;;  %9749 = vst [vmem:[#allocation115_spill] sm:$0xff] %v8274_v21 }
 0x1e3   : > { %v2464_v13 = vpop.f32.mrf.mxu2  ;;  %v2078_v59 = vpop.f32.mrf.mxu0  ;;  %9750 = vst [vmem:[#allocation116_spill] sm:$0xff] %v8278_v24 }
 0x1e4   : > { %v2136_v0 = vadd.f32 %v2075_v4, %v1709_v1 }
 0x1e5   : > { %v2280_v58 = vpop.f32.mrf.mxu1 }
 0x1e6   : > { %1690 = vmatmul.bf16.gmra.mxu3 %v8270_v23  ;;  %2117 = vmatmul.bf16.gmra.mxu0 %v8272_v33  ;;  %v2338_v41 = vadd.f32 %v2277_v7, %v2136_v0 }
 0x1e8   : > { %2319 = vmatmul.bf16.gmra.mxu1 %v8274_v21  ;;  %2506 = vmatmul.bf16.gmra.mxu2 %v8278_v24  ;;  %v8284_v44 = vadd.f32 %v2464_v13, %v2338_v41  ;;  %v9752_v13 = vld [vmem:[#allocation15_spill] sm:$0xff]  ;;  %v9771_v24 = vld [vmem:[#allocation70_spill] sm:$0xff] }
 0x1e9   : > { %v1651_v17 = vpop.f32.mrf.mxu3  ;;  %v9774_v21 = vld [vmem:[#allocation51_spill] sm:$0xff] }
 0x1ea   : > { %v1710_v36 = vadd.f32 %v1651_v17, %v7775_v31  ;;  %v6044_v31 = vld [vmem:[%s9123_s3 + $0x170] sm:$0xff] }
 0x1eb   : > { %v2467_v27 = vpop.f32.mrf.mxu2  ;;  %v2080_v32 = vpop.f32.mrf.mxu0  ;;  %3393 = vmatpush.bf16.msrb.mxu3 %v6044_v31 }
 0x1ec   : > { %v2137_v9 = vadd.f32 %v2078_v59, %v1710_v36 }
 0x1ed   : > { %v2282_v42 = vpop.f32.mrf.mxu1 }
 0x1ee   : > { %v2339_v4 = vadd.f32 %v2280_v58, %v2137_v9 }
 0x1f0   : > { %v8287_v51 = vadd.f32 %v2467_v27, %v2339_v4 }
 0x1f1   : > { %v1653_v37 = vpop.f32.mrf.mxu3 }
 0x1f2   : > { %v1711_v26 = vadd.f32 %v1653_v37, %v7799_v34 }
 0x1f3   : > { %v2469_v7 = vpop.f32.mrf.mxu2  ;;  %v2083_v29 = vpop.f32.mrf.mxu0 }
 0x1f4   : > { %v2138_v1 = vadd.f32 %v2080_v32, %v1711_v26  ;;  %v6052_v32 = vld [vmem:[%s9122_s2 + $0x1b0] sm:$0xff] }
 0x1f5   : > { %v2285_v0 = vpop.f32.mrf.mxu1  ;;  %3580 = vmatpush.bf16.msrb.mxu0 %v6052_v32 }
 0x1f6   : > { %2618 = vmatmul.bf16.vlgmr.msra.gmra.mxu3 %v9751_v12  ;;  %2825 = vmatmul.bf16.vlgmr.msra.gmra.mxu0 %v9752_v13  ;;  %v2340_v41 = vadd.f32 %v2282_v42, %v2138_v1  ;;  %v9754_v1 = vld [vmem:[#allocation21_spill] sm:$0xff] }
 0x1f8   : > { %3012 = vmatmul.bf16.vlgmr.msra.gmra.mxu1 %v7671_v43  ;;  %3213 = vmatmul.bf16.vlgmr.msra.gmra.mxu2 %v7673_v2  ;;  %v8297_v59 = vadd.f32 %v2469_v7, %v2340_v41  ;;  %v6060_v43 = vld [vmem:[%s9123_s3 + $0x1b0] sm:$0xff] }
 0x1f9   : > { %v1656_v34 = vpop.f32.mrf.mxu3  ;;  %3767 = vmatpush.bf16.msrb.mxu1 %v6060_v43 }
 0x1fa   : > { %v1712_v58 = vadd.f32 %v1656_v34, %v7815_v52 }
 0x1fb   : > { %v2472_v17 = vpop.f32.mrf.mxu2  ;;  %v2085_v36 = vpop.f32.mrf.mxu0 }
 0x1fc   : > { %v2139_v12 = vadd.f32 %v2083_v29, %v1712_v58  ;;  %v9753_v29 = vld [vmem:[#allocation18_spill] sm:$0xff] }
 0x1fd   : > { %v2287_v27 = vpop.f32.mrf.mxu1 }
 0x1fe   : > { %v2341_v9 = vadd.f32 %v2285_v0, %v2139_v12 }
 0x200   : > { %v8303_v42 = vadd.f32 %v2472_v17, %v2341_v9 }
 0x201   : > { %v1658_v2 = vpop.f32.mrf.mxu3 }
 0x202   : > { %v1713_v4 = vadd.f32 %v1658_v2, %v7845_v45 }
 0x203   : > { %v2474_v52 = vpop.f32.mrf.mxu2  ;;  %v2088_v37 = vpop.f32.mrf.mxu0 }
 0x204   : > { %v2140_v26 = vadd.f32 %v2085_v36, %v1713_v4 }
 0x205   : > { %v2290_v7 = vpop.f32.mrf.mxu1 }
 0x206   : > { %2623 = vmatmul.bf16.gmra.mxu3 %v9753_v29  ;;  %2830 = vmatmul.bf16.gmra.mxu0 %v9754_v1  ;;  %v2342_v0 = vadd.f32 %v2287_v27, %v2140_v26  ;;  %v9755_v26 = vld [vmem:[#allocation30_spill] sm:$0xff] }
 0x208   : > { %3017 = vmatmul.bf16.gmra.mxu1 %v7708_v47  ;;  %3218 = vmatmul.bf16.gmra.mxu2 %v7710_v54  ;;  %v8313_v13 = vadd.f32 %v2474_v52, %v2342_v0  ;;  %v9756_v52 = vld [vmem:[#allocation33_spill] sm:$0xff] }
 0x209   : > { %v1661_v41 = vpop.f32.mrf.mxu3 }
 0x20a   : > { %v1714_v31 = vadd.f32 %v1661_v41, %v7858_v38  ;;  %v6043_v38 = vld [vmem:[%s9123_s3 + $0x168] sm:$0xff] }
 0x20b   : > { %v2477_v45 = vpop.f32.mrf.mxu2  ;;  %v2090_v34 = vpop.f32.mrf.mxu0  ;;  %3394 = vmatpush.bf16.msrb.mxu3 %v6043_v38  ;;  %v9757_v38 = vld [vmem:[#allocation43_spill] sm:$0xff] }
 0x20c   : > { %v2141_v58 = vadd.f32 %v2088_v37, %v1714_v31 }
 0x20d   : > { %v2292_v17 = vpop.f32.mrf.mxu1 }
 0x20e   : > { %v2343_v36 = vadd.f32 %v2290_v7, %v2141_v58  ;;  %v6051_v58 = vld [vmem:[%s9122_s2 + $0x1a8] sm:$0xff] }
 0x20f   : > { %3581 = vmatpush.bf16.msrb.mxu0 %v6051_v58 }
 0x210   : > { %v8316_v12 = vadd.f32 %v2477_v45, %v2343_v36 }
 0x211   : > { %v1663_v32 = vpop.f32.mrf.mxu3 }
 0x212   : > { %v1715_v9 = vadd.f32 %v1663_v32, %v7882_v63  ;;  %v6059_v32 = vld [vmem:[%s9123_s3 + $0x1a8] sm:$0xff] }
 0x213   : > { %v2479_v27 = vpop.f32.mrf.mxu2  ;;  %v2093_v43 = vpop.f32.mrf.mxu0  ;;  %3768 = vmatpush.bf16.msrb.mxu1 %v6059_v32 }
 0x214   : > { %v2142_v2 = vadd.f32 %v2090_v34, %v1715_v9 }
 0x215   : > { %v2295_v4 = vpop.f32.mrf.mxu1 }
 0x216   : > { %2628 = vmatmul.bf16.gmra.mxu3 %v9755_v26  ;;  %2835 = vmatmul.bf16.gmra.mxu0 %v9756_v52  ;;  %v2344_v0 = vadd.f32 %v2292_v17, %v2142_v2 }
 0x218   : > { %3022 = vmatmul.bf16.gmra.mxu1 %v7754_v55  ;;  %3223 = vmatmul.bf16.gmra.mxu2 %v7756_v56  ;;  %v8326_v37 = vadd.f32 %v2479_v27, %v2344_v0  ;;  %v9761_v55 = vld [vmem:[#allocation75_spill] sm:$0xff] }
 0x219   : > { %v1666_v63 = vpop.f32.mrf.mxu3 }
 0x21a   : > { %v1716_v7 = vadd.f32 %v1666_v63, %v7898_v11  ;;  %v9758_v63 = vld [vmem:[#allocation46_spill] sm:$0xff] }
 0x21b   : > { %v2482_v41 = vpop.f32.mrf.mxu2  ;;  %v2095_v31 = vpop.f32.mrf.mxu0 }
 0x21c   : > { %v2143_v45 = vadd.f32 %v2093_v43, %v1716_v7 }
 0x21d   : > { %v2297_v34 = vpop.f32.mrf.mxu1 }
 0x21e   : > { %v2345_v17 = vadd.f32 %v2295_v4, %v2143_v45  ;;  %v9759_v45 = vld [vmem:[#allocation61_spill] sm:$0xff] }
 0x220   : > { %v8332_v36 = vadd.f32 %v2482_v41, %v2345_v17 }
 0x221   : > { %v1668_v9 = vpop.f32.mrf.mxu3 }
 0x222   : > { %v1717_v27 = vadd.f32 %v1668_v9, %v7928_v14 }
 0x223   : > { %v2484_v11 = vpop.f32.mrf.mxu2  ;;  %v2098_v2 = vpop.f32.mrf.mxu0 }
 0x224   : > { %v2144_v43 = vadd.f32 %v2095_v31, %v1717_v27 }
 0x225   : > { %v2300_v0 = vpop.f32.mrf.mxu1 }
 0x226   : > { %2633 = vmatmul.bf16.gmra.mxu3 %v9757_v38  ;;  %2840 = vmatmul.bf16.gmra.mxu0 %v9758_v63  ;;  %v2346_v4 = vadd.f32 %v2297_v34, %v2144_v43 }
 0x228   : > { %3027 = vmatmul.bf16.gmra.mxu1 %v7791_v8  ;;  %3228 = vmatmul.bf16.gmra.mxu2 %v7793_v18  ;;  %v8342_v7 = vadd.f32 %v2484_v11, %v2346_v4  ;;  %v9762_v18 = vld [vmem:[#allocation55_spill] sm:$0xff]  ;;  %v9763_v11 = vld [vmem:[#allocation58_spill] sm:$0xff] }
 0x229   : > { %v1671_v41 = vpop.f32.mrf.mxu3 }
 0x22a   : > { %v1718_v58 = vadd.f32 %v1671_v41, %v9759_v45  ;;  %v9764_v41 = vld [vmem:[#allocation38_spill] sm:$0xff] }
 0x22b   : > { %v2487_v14 = vpop.f32.mrf.mxu2  ;;  %v2100_v17 = vpop.f32.mrf.mxu0 }
 0x22c   : > { %v2145_v32 = vadd.f32 %v2098_v2, %v1718_v58  ;;  %v6042_v2 = vld [vmem:[%s9123_s3 + $0x160] sm:$0xff] }
 0x22d   : > { %v2302_v9 = vpop.f32.mrf.mxu1  ;;  %3395 = vmatpush.bf16.msrb.mxu3 %v6042_v2  ;;  %v9769_v2 = vld [vmem:[#allocation37_spill] sm:$0xff] }
 0x22e   : > { %v2347_v31 = vadd.f32 %v2300_v0, %v2145_v32  ;;  %v9765_v0 = vld [vmem:[#allocation42_spill] sm:$0xff] }
 0x230   : > { %v8345_v27 = vadd.f32 %v2487_v14, %v2347_v31 }
 0x231   : > { %v1673_v56 = vpop.f32.mrf.mxu3 }
 0x232   : > { %9760 = vst [vmem:[#allocation117_spill] sm:$0xff] %v8345_v27  ;;  %v1719_v54 = vadd.f32 %v1673_v56, %v9761_v55  ;;  %v9767_v56 = vld [vmem:[#allocation36_spill] sm:$0xff] }
 0x233   : > { %v2489_v34 = vpop.f32.mrf.mxu2  ;;  %v2103_v43 = vpop.f32.mrf.mxu0  ;;  %v9776_v27 = vld [vmem:[#allocation52_spill] sm:$0xff] }
 0x234   : > { %v2146_v8 = vadd.f32 %v2100_v17, %v1719_v54 }
 0x235   : > { %v2305_v47 = vpop.f32.mrf.mxu1 }
 0x236   : > { %2638 = vmatmul.bf16.gmra.mxu3 %v9762_v18  ;;  %2845 = vmatmul.bf16.gmra.mxu0 %v9763_v11  ;;  %v2348_v4 = vadd.f32 %v2302_v9, %v2146_v8  ;;  %v6050_v8 = vld [vmem:[%s9122_s2 + $0x1a0] sm:$0xff] }
 0x237   : > { %3582 = vmatpush.bf16.msrb.mxu0 %v6050_v8 }
 0x238   : > { %3032 = vmatmul.bf16.gmra.mxu1 %v9764_v41  ;;  %3233 = vmatmul.bf16.gmra.mxu2 %v9765_v0  ;;  %v8355_v45 = vadd.f32 %v2489_v34, %v2348_v4  ;;  %v6058_v34 = vld [vmem:[%s9123_s3 + $0x1a0] sm:$0xff]  ;;  %v9770_v41 = vld [vmem:[#allocation67_spill] sm:$0xff] }
 0x239   : > { %v1676_v55 = vpop.f32.mrf.mxu3  ;;  %3769 = vmatpush.bf16.msrb.mxu1 %v6058_v34 }
 0x23a   : > { %9766 = vst [vmem:[#allocation78_spill] sm:$0xff] %v8355_v45  ;;  %v1720_v54 = vadd.f32 %v1676_v55, %v9767_v56 }
 0x23b   : > { %v2492_v58 = vpop.f32.mrf.mxu2  ;;  %v2105_v14 = vpop.f32.mrf.mxu0 }
 0x23c   : > { %v2147_v17 = vadd.f32 %v2103_v43, %v1720_v54 }
 0x23d   : > { %v2307_v32 = vpop.f32.mrf.mxu1 }
 0x23e   : > { %v2349_v9 = vadd.f32 %v2305_v47, %v2147_v17  ;;  %v9772_v17 = vld [vmem:[#allocation48_spill] sm:$0xff] }
 0x240   : > { %v8361_v31 = vadd.f32 %v2492_v58, %v2349_v9  ;;  %v9773_v58 = vld [vmem:[#allocation49_spill] sm:$0xff] }
 0x241   : > { %v1678_v4 = vpop.f32.mrf.mxu3 }
 0x242   : > { %9768 = vst [vmem:[#allocation77_spill] sm:$0xff] %v8361_v31  ;;  %v1721_v0 = vadd.f32 %v1678_v4, %v9769_v2 }
 0x243   : > { %v2494_v55 = vpop.f32.mrf.mxu2  ;;  %v2108_v56 = vpop.f32.mrf.mxu0 }
 0x244   : > { %v2148_v43 = vadd.f32 %v2105_v14, %v1721_v0 }
 0x245   : > { %v2310_v54 = vpop.f32.mrf.mxu1 }
 0x246   : > { %2643 = vmatmul.bf16.gmra.mxu3 %v9770_v41  ;;  %2850 = vmatmul.bf16.gmra.mxu0 %v9771_v24  ;;  %v2350_v47 = vadd.f32 %v2307_v32, %v2148_v43 }
 0x248   : > { %3037 = vmatmul.bf16.gmra.mxu1 %v9772_v17  ;;  %3238 = vmatmul.bf16.gmra.mxu2 %v9773_v58  ;;  %v8371_v8 = vadd.f32 %v2494_v55, %v2350_v47  ;;  %v9777_v58 = vld [vmem:[#allocation81_spill] sm:$0xff]  ;;  %v9778_v55 = vld [vmem:[#allocation84_spill] sm:$0xff] }
 0x249   : > { %v1681_v9 = vpop.f32.mrf.mxu3 }
 0x24a   : > { %v1722_v31 = vadd.f32 %v1681_v9, %v9774_v21  ;;  %v6041_v21 = vld [vmem:[%s9123_s3 + $0x158] sm:$0xff] }
 0x24b   : > { %v2497_v4 = vpop.f32.mrf.mxu2  ;;  %v2110_v2 = vpop.f32.mrf.mxu0  ;;  %3396 = vmatpush.bf16.msrb.mxu3 %v6041_v21  ;;  %v9784_v21 = vld [vmem:[#allocation53_spill] sm:$0xff] }
 0x24c   : > { %v2149_v34 = vadd.f32 %v2108_v56, %v1722_v31  ;;  %v9779_v31 = vld [vmem:[#allocation62_spill] sm:$0xff]  ;;  %v9780_v56 = vld [vmem:[#allocation63_spill] sm:$0xff] }
 0x24d   : > { %v2312_v45 = vpop.f32.mrf.mxu1 }
 0x24e   : > { %v2351_v0 = vadd.f32 %v2310_v54, %v2149_v34 }
 0x250   : > { %v8374_v14 = vadd.f32 %v2497_v4, %v2351_v0 }
 0x251   : > { %v1683_v41 = vpop.f32.mrf.mxu3 }
 0x252   : > { %9775 = vst [vmem:[#allocation8_spill] sm:$0xff] %v8374_v14  ;;  %v1723_v24 = vadd.f32 %v1683_v41, %v9776_v27  ;;  %v9782_v41 = vld [vmem:[#allocation54_spill] sm:$0xff] }
 0x253   : > { %v2499_v32 = vpop.f32.mrf.mxu2  ;;  %v2113_v43 = vpop.f32.mrf.mxu0 }
 0x254   : > { %v2150_v17 = vadd.f32 %v2110_v2, %v1723_v24 }
 0x255   : > { %v2315_v11 = vpop.f32.mrf.mxu1 }
 0x256   : > { %2648 = vmatmul.bf16.gmra.mxu3 %v9777_v58  ;;  %2855 = vmatmul.bf16.gmra.mxu0 %v9778_v55  ;;  %v2352_v47 = vadd.f32 %v2312_v45, %v2150_v17  ;;  %v6049_v45 = vld [vmem:[%s9122_s2 + $0x198] sm:$0xff] }
 0x257   : > { %3583 = vmatpush.bf16.msrb.mxu0 %v6049_v45 }
 0x258   : > { %3042 = vmatmul.bf16.gmra.mxu1 %v9779_v31  ;;  %3243 = vmatmul.bf16.gmra.mxu2 %v9780_v56  ;;  %v8384_v54 = vadd.f32 %v2499_v32, %v2352_v47  ;;  %v6057_v32 = vld [vmem:[%s9123_s3 + $0x198] sm:$0xff] }
 0x259   : > { %v1686_v27 = vpop.f32.mrf.mxu3  ;;  %3770 = vmatpush.bf16.msrb.mxu1 %v6057_v32  ;;  %v9785_v31 = vld [vmem:[#allocation95_spill] sm:$0xff] }
 0x25a   : > { %9781 = vst [vmem:[#allocation9_spill] sm:$0xff] %v8384_v54  ;;  %v1724_v24 = vadd.f32 %v1686_v27, %v9782_v41  ;;  %v9786_v54 = vld [vmem:[#allocation98_spill] sm:$0xff] }
 0x25b   : > { %v2502_v9 = vpop.f32.mrf.mxu2  ;;  %v2115_v4 = vpop.f32.mrf.mxu0 }
 0x25c   : > { %v2151_v2 = vadd.f32 %v2113_v43, %v1724_v24 }
 0x25d   : > { %v2317_v34 = vpop.f32.mrf.mxu1 }
 0x25e   : > { %v2353_v17 = vadd.f32 %v2315_v11, %v2151_v2  ;;  %v9787_v2 = vld [vmem:[#allocation65_spill] sm:$0xff] }
 0x260   : > { %v8390_v0 = vadd.f32 %v2502_v9, %v2353_v17  ;;  %v9788_v9 = vld [vmem:[#allocation74_spill] sm:$0xff] }
 0x261   : > { %v1688_v47 = vpop.f32.mrf.mxu3 }
 0x262   : > { %9783 = vst [vmem:[#allocation22_spill] sm:$0xff] %v8390_v0  ;;  %v1725_v56 = vadd.f32 %v1688_v47, %v9784_v21  ;;  %v9790_v0 = vld [vmem:[#allocation60_spill] sm:$0xff] }
 0x263   : > { %v2504_v27 = vpop.f32.mrf.mxu2  ;;  %v2118_v41 = vpop.f32.mrf.mxu0 }
 0x264   : > { %v2152_v43 = vadd.f32 %v2115_v4, %v1725_v56  ;;  %v6069_v56 = vld [vmem:[%s9122_s2 + $0x1f8] sm:$0xff] }
 0x265   : > { %v2320_v24 = vpop.f32.mrf.mxu1  ;;  %3973 = vmatpush.bf16.msrb.mxu2 %v6069_v56  ;;  %v9798_v56 = vld [vmem:[#allocation72_spill] sm:$0xff] }
 0x266   : > { %2653 = vmatmul.bf16.gmra.mxu3 %v9785_v31  ;;  %2860 = vmatmul.bf16.gmra.mxu0 %v9786_v54  ;;  %v2354_v11 = vadd.f32 %v2317_v34, %v2152_v43 }
 0x268   : > { %3047 = vmatmul.bf16.gmra.mxu1 %v9787_v2  ;;  %3248 = vmatmul.bf16.gmra.mxu2 %v9788_v9  ;;  %v8400_v45 = vadd.f32 %v2504_v27, %v2354_v11  ;;  %v9792_v2 = vld [vmem:[#allocation66_spill] sm:$0xff] }
 0x269   : > { %v1691_v17 = vpop.f32.mrf.mxu3 }
 0x26a   : > { %9789 = vst [vmem:[#allocation23_spill] sm:$0xff] %v8400_v45  ;;  %v1726_v14 = vadd.f32 %v1691_v17, %v9790_v0  ;;  %v9793_v0 = vld [vmem:[#allocation110_spill] sm:$0xff] }
 0x26b   : > { %v2507_v47 = vpop.f32.mrf.mxu2  ;;  %v2120_v21 = vpop.f32.mrf.mxu0  ;;  %v9794_v17 = vld [vmem:[#allocation114_spill] sm:$0xff] }
 0x26c   : > { %v2153_v32 = vadd.f32 %v2118_v41, %v1726_v14  ;;  %v6040_v41 = vld [vmem:[%s9123_s3 + $0x150] sm:$0xff] }
 0x26d   : > { %v2322_v55 = vpop.f32.mrf.mxu1  ;;  %3397 = vmatpush.bf16.msrb.mxu3 %v6040_v41  ;;  %v9799_v41 = vld [vmem:[#allocation89_spill] sm:$0xff] }
 0x26e   : > { %v2355_v4 = vadd.f32 %v2320_v24, %v2153_v32  ;;  %v9795_v24 = vld [vmem:[#allocation73_spill] sm:$0xff] }
 0x270   : > { %v8406_v34 = vadd.f32 %v2507_v47, %v2355_v4  ;;  %v9796_v47 = vld [vmem:[#allocation80_spill] sm:$0xff] }
 0x271   : > { %v1693_v43 = vpop.f32.mrf.mxu3 }
 0x272   : > { %9791 = vst [vmem:[#allocation85_spill] sm:$0xff] %v8406_v34  ;;  %v1727_v9 = vadd.f32 %v1693_v43, %v9792_v2 }
 0x273   : > { %v2509_v27 = vpop.f32.mrf.mxu2  ;;  %v2826_v11 = vpop.f32.mrf.mxu0 }
 0x274   : > { %v2154_v45 = vadd.f32 %v2120_v21, %v1727_v9 }
 0x275   : > { %v3013_v54 = vpop.f32.mrf.mxu1 }
 0x276   : > { %2658 = vmatmul.bf16.gmra.mxu3 %v9793_v0  ;;  %2865 = vmatmul.bf16.gmra.mxu0 %v9794_v17  ;;  %v2356_v14 = vadd.f32 %v2322_v55, %v2154_v45  ;;  %v6048_v55 = vld [vmem:[%s9122_s2 + $0x190] sm:$0xff] }
 0x277   : > { %3584 = vmatpush.bf16.msrb.mxu0 %v6048_v55 }
 0x278   : > { %3052 = vmatmul.bf16.gmra.mxu1 %v9795_v24  ;;  %3253 = vmatmul.bf16.gmra.mxu2 %v9796_v47  ;;  %v8416_v32 = vadd.f32 %v2509_v27, %v2356_v14  ;;  %v6056_v27 = vld [vmem:[%s9123_s3 + $0x190] sm:$0xff] }
 0x279   : > { %v2619_v2 = vpop.f32.mrf.mxu3  ;;  %3771 = vmatpush.bf16.msrb.mxu1 %v6056_v27  ;;  %v9800_v24 = vld [vmem:[#allocation122_spill] sm:$0xff] }
 0x27a   : > { %9797 = vst [vmem:[#allocation92_spill] sm:$0xff] %v8416_v32  ;;  %v2699_v9 = vadd.f32 %v2619_v2, %v9798_v56  ;;  %v9801_v32 = vld [vmem:[#allocation124_spill] sm:$0xff] }
 0x27b   : > { %v3214_v21 = vpop.f32.mrf.mxu2  ;;  %v2828_v4 = vpop.f32.mrf.mxu0 }
 0x27c   : > { %v2906_v43 = vadd.f32 %v2826_v11, %v2699_v9 }
 0x27d   : > { %v3015_v34 = vpop.f32.mrf.mxu1 }
 0x27e   : > { %v3093_v45 = vadd.f32 %v3013_v54, %v2906_v43 }
 0x280   : > { %v8422_v17 = vadd.f32 %v3214_v21, %v3093_v45 }
 0x281   : > { %v2621_v14 = vpop.f32.mrf.mxu3 }
 0x282   : > { %v2700_v47 = vadd.f32 %v2621_v14, %v9799_v41 }
 0x283   : > { %v3216_v2 = vpop.f32.mrf.mxu2  ;;  %v2831_v56 = vpop.f32.mrf.mxu0 }
 0x284   : > { %v2907_v11 = vadd.f32 %v2828_v4, %v2700_v47  ;;  %v6068_v47 = vld [vmem:[%s9122_s2 + $0x1f0] sm:$0xff] }
 0x285   : > { %v3018_v9 = vpop.f32.mrf.mxu1  ;;  %3974 = vmatpush.bf16.msrb.mxu2 %v6068_v47 }
 0x286   : > { %2663 = vmatmul.bf16.gmra.mxu3 %v9800_v24  ;;  %2870 = vmatmul.bf16.gmra.mxu0 %v9801_v32  ;;  %v3094_v54 = vadd.f32 %v3015_v34, %v2907_v11 }
 0x288   : > { %3057 = vmatmul.bf16.gmra.mxu1 %v8038_v3  ;;  %3258 = vmatmul.bf16.gmra.mxu2 %v8040_v19  ;;  %v8432_v21 = vadd.f32 %v3216_v2, %v3094_v54 }
 0x289   : > { %v2624_v43 = vpop.f32.mrf.mxu3 }
 0x28a   : > { %9802 = vst [vmem:[#allocation91_spill] sm:$0xff] %v8432_v21  ;;  %v2701_v55 = vadd.f32 %v2624_v43, %v8033_v16  ;;  %v9803_v16 = vld [vmem:[#allocation127_spill] sm:$0xff]  ;;  %v9804_v43 = vld [vmem:[#allocation130_spill] sm:$0xff] }
 0x28b   : > { %v3219_v45 = vpop.f32.mrf.mxu2  ;;  %v2833_v14 = vpop.f32.mrf.mxu0 }
 0x28c   : > { %v2908_v27 = vadd.f32 %v2831_v56, %v2701_v55  ;;  %v6039_v55 = vld [vmem:[%s9123_s3 + $0x148] sm:$0xff] }
 0x28d   : > { %v3020_v41 = vpop.f32.mrf.mxu1  ;;  %3398 = vmatpush.bf16.msrb.mxu3 %v6039_v55 }
 0x28e   : > { %v3095_v4 = vadd.f32 %v3018_v9, %v2908_v27 }
 0x290   : > { %v8438_v34 = vadd.f32 %v3219_v45, %v3095_v4 }
 0x291   : > { %v2626_v11 = vpop.f32.mrf.mxu3 }
 0x292   : > { %v2702_v19 = vadd.f32 %v2626_v11, %v8055_v50  ;;  %v6055_v11 = vld [vmem:[%s9123_s3 + $0x188] sm:$0xff] }
 0x293   : > { %v3221_v2 = vpop.f32.mrf.mxu2  ;;  %v2836_v54 = vpop.f32.mrf.mxu0  ;;  %3772 = vmatpush.bf16.msrb.mxu1 %v6055_v11 }
 0x294   : > { %v2909_v3 = vadd.f32 %v2833_v14, %v2702_v19 }
 0x295   : > { %v3023_v21 = vpop.f32.mrf.mxu1 }
 0x296   : > { %2668 = vmatmul.bf16.gmra.mxu3 %v9803_v16  ;;  %2875 = vmatmul.bf16.gmra.mxu0 %v9804_v43  ;;  %v3096_v56 = vadd.f32 %v3020_v41, %v2909_v3  ;;  %v6047_v3 = vld [vmem:[%s9122_s2 + $0x188] sm:$0xff] }
 0x297   : > { %3585 = vmatpush.bf16.msrb.mxu0 %v6047_v3 }
 0x298   : > { %3062 = vmatmul.bf16.gmra.mxu1 %v8080_v35  ;;  %3263 = vmatmul.bf16.gmra.mxu2 %v8082_v40  ;;  %v8448_v9 = vadd.f32 %v3221_v2, %v3096_v56  ;;  %v9806_v40 = vld [vmem:[#allocation96_spill] sm:$0xff] }
 0x299   : > { %v2629_v50 = vpop.f32.mrf.mxu3 }
 0x29a   : > { %v2703_v19 = vadd.f32 %v2629_v50, %v8072_v10 }
 0x29b   : > { %v3224_v45 = vpop.f32.mrf.mxu2  ;;  %v2838_v14 = vpop.f32.mrf.mxu0 }
 0x29c   : > { %v2910_v27 = vadd.f32 %v2836_v54, %v2703_v19  ;;  %v9805_v19 = vld [vmem:[#allocation10_spill] sm:$0xff] }
 0x29d   : > { %v3025_v47 = vpop.f32.mrf.mxu1 }
 0x29e   : > { %v3097_v41 = vadd.f32 %v3023_v21, %v2910_v27 }
 0x2a0   : > { %v8454_v4 = vadd.f32 %v3224_v45, %v3097_v41 }
 0x2a1   : > { %v2631_v2 = vpop.f32.mrf.mxu3 }
 0x2a2   : > { %v2704_v56 = vadd.f32 %v2631_v2, %v8094_v39 }
 0x2a3   : > { %v3226_v10 = vpop.f32.mrf.mxu2  ;;  %v2841_v55 = vpop.f32.mrf.mxu0 }
 0x2a4   : > { %v2911_v54 = vadd.f32 %v2838_v14, %v2704_v56  ;;  %v6067_v14 = vld [vmem:[%s9122_s2 + $0x1e8] sm:$0xff] }
 0x2a5   : > { %v3028_v50 = vpop.f32.mrf.mxu1  ;;  %3975 = vmatpush.bf16.msrb.mxu2 %v6067_v14 }
 0x2a6   : > { %2673 = vmatmul.bf16.gmra.mxu3 %v9805_v19  ;;  %2880 = vmatmul.bf16.gmra.mxu0 %v9806_v40  ;;  %v3098_v21 = vadd.f32 %v3025_v47, %v2911_v54 }
 0x2a8   : > { %3067 = vmatmul.bf16.gmra.mxu1 %v8116_v20  ;;  %3268 = vmatmul.bf16.gmra.mxu2 %v8118_v5  ;;  %v8464_v45 = vadd.f32 %v3226_v10, %v3098_v21 }
 0x2a9   : > { %v2634_v27 = vpop.f32.mrf.mxu3 }
 0x2aa   : > { %v2705_v3 = vadd.f32 %v2634_v27, %v8111_v15  ;;  %v9807_v15 = vld [vmem:[#allocation14_spill] sm:$0xff]  ;;  %v9808_v27 = vld [vmem:[#allocation111_spill] sm:$0xff] }
 0x2ab   : > { %v3229_v39 = vpop.f32.mrf.mxu2  ;;  %v2843_v41 = vpop.f32.mrf.mxu0 }
 0x2ac   : > { %v2912_v11 = vadd.f32 %v2841_v55, %v2705_v3  ;;  %v6038_v3 = vld [vmem:[%s9123_s3 + $0x140] sm:$0xff] }
 0x2ad   : > { %v3030_v2 = vpop.f32.mrf.mxu1  ;;  %3399 = vmatpush.bf16.msrb.mxu3 %v6038_v3 }
 0x2ae   : > { %v3099_v56 = vadd.f32 %v3028_v50, %v2912_v11 }
 0x2b0   : > { %v8470_v47 = vadd.f32 %v3229_v39, %v3099_v56 }
 0x2b1   : > { %v2636_v54 = vpop.f32.mrf.mxu3 }
 0x2b2   : > { %v2706_v5 = vadd.f32 %v2636_v54, %v8133_v53  ;;  %v6054_v54 = vld [vmem:[%s9123_s3 + $0x180] sm:$0xff] }
 0x2b3   : > { %v3231_v10 = vpop.f32.mrf.mxu2  ;;  %v2846_v21 = vpop.f32.mrf.mxu0  ;;  %3773 = vmatpush.bf16.msrb.mxu1 %v6054_v54 }
 0x2b4   : > { %v2913_v20 = vadd.f32 %v2843_v41, %v2706_v5 }
 0x2b5   : > { %v3033_v35 = vpop.f32.mrf.mxu1 }
 0x2b6   : > { %2678 = vmatmul.bf16.gmra.mxu3 %v9807_v15  ;;  %2885 = vmatmul.bf16.gmra.mxu0 %v9808_v27  ;;  %v3100_v55 = vadd.f32 %v3030_v2, %v2913_v20  ;;  %v6046_v20 = vld [vmem:[%s9122_s2 + $0x180] sm:$0xff] }
 0x2b7   : > { %3586 = vmatpush.bf16.msrb.mxu0 %v6046_v20 }
 0x2b8   : > { %3072 = vmatmul.bf16.gmra.mxu1 %v8158_v61  ;;  %3273 = vmatmul.bf16.gmra.mxu2 %v8160_v25  ;;  %v8480_v50 = vadd.f32 %v3231_v10, %v3100_v55  ;;  %v337_v25 = vld [vmem:[%s6610_s29 + $0xc8] sm:$0x1] }
 0x2b9   : > { %v2639_v53 = vpop.f32.mrf.mxu3 }
 0x2ba   : > { %v2707_v5 = vadd.f32 %v2639_v53, %v8150_v48 }
 0x2bb   : > { %v3234_v39 = vpop.f32.mrf.mxu2  ;;  %v2848_v41 = vpop.f32.mrf.mxu0 }
 0x2bc   : > { %v2914_v11 = vadd.f32 %v2846_v21, %v2707_v5  ;;  %v9810_v5 = vld [vmem:[#allocation19_spill] sm:$0xff] }
 0x2bd   : > { %v3035_v14 = vpop.f32.mrf.mxu1 }
 0x2be   : > { %v3101_v2 = vadd.f32 %v3033_v35, %v2914_v11  ;;  %v9811_v35 = vld [vmem:[#allocation125_spill] sm:$0xff] }
 0x2c0   : > { %v8486_v56 = vadd.f32 %v3234_v39, %v3101_v2 }
 0x2c1   : > { %v2641_v10 = vpop.f32.mrf.mxu3 }
 0x2c2   : > { %9809 = vst [vmem:[#allocation11_spill] sm:$0xff] %v8486_v56  ;;  %v2708_v55 = vadd.f32 %v2641_v10, %v8172_v57  ;;  %v6066_v57 = vld [vmem:[%s9122_s2 + $0x1e0] sm:$0xff]  ;;  %v9816_v56 = vunpack.c.l.bf16 %v8223_v60 }
 0x2c3   : > { %v3236_v48 = vpop.f32.mrf.mxu2  ;;  %v2851_v3 = vpop.f32.mrf.mxu0  ;;  %3976 = vmatpush.bf16.msrb.mxu2 %v6066_v57 }
 0x2c4   : > { %v2915_v21 = vadd.f32 %v2848_v41, %v2708_v55 }
 0x2c5   : > { %v3038_v53 = vpop.f32.mrf.mxu1 }
 0x2c6   : > { %2683 = vmatmul.bf16.gmra.mxu3 %v9810_v5  ;;  %2890 = vmatmul.bf16.gmra.mxu0 %v9811_v35  ;;  %v3102_v39 = vadd.f32 %v3035_v14, %v2915_v21  ;;  %v445_v14 = vld [vmem:[%s6615_s11 + $0xc8] sm:$0x1]  ;;  %v6065_v21 = vld [vmem:[%s9122_s2 + $0x1d8] sm:$0xff] }
 0x2c7   : > { %3977 = vmatpush.bf16.msrb.mxu2 %v6065_v21 }
 0x2c8   : > { %3077 = vmatmul.bf16.gmra.mxu1 %v8204_v62  ;;  %3278 = vmatmul.bf16.gmra.mxu2 %v8206_v49  ;;  %v8496_v11 = vadd.f32 %v3236_v48, %v3102_v39  ;;  %v391_v39 = vunpack.c.l.bf16 %v337_v25  ;;  %v499_v49 = vunpack.c.l.bf16 %v445_v14  ;;  %v9817_v25 = vunpack.c.h.bf16 %v8226_v22 }
 0x2c9   : > { %v2644_v20 = vpop.f32.mrf.mxu3 }
 0x2ca   : > { %9812 = vst [vmem:[#allocation12_spill] sm:$0xff] %v8496_v11  ;;  %v2709_v41 = vadd.f32 %v2644_v20, %v8192_v6  ;;  %v6064_v6 = vld [vmem:[%s9122_s2 + $0x1d0] sm:$0xff]  ;;  %v9814_v20 = vld [vmem:[#allocation119_spill] sm:$0xff]  ;;  %v9815_v11 = vunpack.c.l.bf16 %v8226_v22  ;;  %v8521_v14 = vsub.f32 %v391_v39, %v499_v49 }
 0x2cb   : > { %v3239_v2 = vpop.f32.mrf.mxu2  ;;  %v2853_v54 = vpop.f32.mrf.mxu0  ;;  %3978 = vmatpush.bf16.msrb.mxu2 %v6064_v6  ;;  %v9819_v6 = vld [vmem:[#allocation31_spill] sm:$0xff] }
 0x2cc   : > { %v2916_v10 = vadd.f32 %v2851_v3, %v2709_v41  ;;  %v6077_v22 = vld [vmem:[%s9123_s3 + $0x1f8] sm:$0xff] }
 0x2cd   : > { %v3040_v55 = vpop.f32.mrf.mxu1  ;;  %4160 = vmatpush.bf16.msra.mxu3 %v6077_v22 }
 0x2ce   : > { %v3103_v48 = vadd.f32 %v3038_v53, %v2916_v10  ;;  %v605_v53 = vsub.f32 %v9816_v56, %v9815_v11  ;;  %v553_v11 = vadd.f32 %v499_v49, %v391_v39 }
 0x2d0   : > { %v8507_v62 = vadd.f32 %v3239_v2, %v3103_v48  ;;  %v9818_v2 = vunpack.c.h.bf16 %v8223_v60  ;;  %v8533_v60 = vand.u32 2147483647, %v605_v53  ;;  %v2734_v53 = vrot.slane %v8254_v46, 1 }
 0x2d1   : > { %v2646_v57 = vpop.f32.mrf.mxu3  ;;  %v2737_v49 = vrot.slane %v553_v11, 1 }
 0x2d2   : > { %9813 = vst [vmem:[#allocation34_spill] sm:$0xff] %v8507_v62  ;;  %v2710_v3 = vadd.f32 %v2646_v57, %v9814_v20  ;;  %v606_v10 = vsub.f32 %v9818_v2, %v9817_v25  ;;  %v6063_v57 = vld [vmem:[%s9122_s2 + $0x1c8] sm:$0xff]  ;;  %v9820_v20 = vld [vmem:[#allocation128_spill] sm:$0xff]  ;;  %v2744_v39 = vrot.slane %v8533_v60, 1 }
 0x2d3   : > { %v3241_v41 = vpop.f32.mrf.mxu2  ;;  %v2856_v61 = vpop.f32.mrf.mxu0  ;;  %3979 = vmatpush.bf16.msrb.mxu2 %v6063_v57 }
 0x2d4   : > { %v2917_v21 = vadd.f32 %v2853_v54, %v2710_v3  ;;  %v8535_v56 = vand.u32 2147483647, %v606_v10  ;;  %v9413_v54 = vand.u32 2147483647, %v8521_v14  ;;  %v2735_v10 = vrot.slane %v8260_v30, 1 }
 0x2d5   : > { %v3043_v48 = vpop.f32.mrf.mxu1 }
 0x2d6   : > { %2688 = vmatmul.bf16.gmra.mxu3 %v9819_v6  ;;  %2895 = vmatmul.bf16.gmra.mxu0 %v9820_v20  ;;  %v3104_v62 = vadd.f32 %v3040_v55, %v2917_v21  ;;  %v6062_v55 = vld [vmem:[%s9122_s2 + $0x1c0] sm:$0xff]  ;;  %v2736_v6 = vsel %vm1051_vm0, %v2734_v53, %v2735_v10  ;;  %v2738_v35 = vsel %vm1051_vm0, %v2735_v10, %v2737_v49 }
 0x2d7   : > { %3980 = vmatpush.bf16.msrb.mxu2 %v6062_v55  ;;  %v6093_v55 = vld [vmem:[%s9123_s3 + $0x238] sm:$0xff]  ;;  %v8571_v53 = vpack.c.bf16 %v2738_v35, %v2736_v6 }
 0x2d8   : > { %3082 = vmatmul.bf16.gmra.mxu1 %v8270_v23  ;;  %3283 = vmatmul.bf16.gmra.mxu2 %v8272_v33  ;;  %v8538_v3 = vadd.f32 %v3241_v41, %v3104_v62  ;;  %v2745_v62 = vrot.slane %v8535_v56, 1  ;;  %v2747_v41 = vrot.slane %v9413_v54, 1  ;;  %v3125_v23 = vrot.slane %v8254_v46, 2 }
 0x2d9   : > { %v2649_v25 = vpop.f32.mrf.mxu3  ;;  %4548 = vmatpush.bf16.msra.mxu1 %v6093_v55 }
 0x2da   : > { %9821 = vst [vmem:[#allocation35_spill] sm:$0xff] %v8538_v3  ;;  %v2711_v2 = vadd.f32 %v2649_v25, %v8262_v28  ;;  %v3126_v28 = vrot.slane %v8260_v30, 2  ;;  %v3128_v25 = vrot.slane %v553_v11, 2  ;;  %v6085_v3 = vld [vmem:[%s9122_s2 + $0x238] sm:$0xff]  ;;  %v2746_v54 = vsel %vm1051_vm0, %v2744_v39, %v2745_v62 }
 0x2db   : > { %v3244_v21 = vpop.f32.mrf.mxu2  ;;  %v2858_v33 = vpop.f32.mrf.mxu0  ;;  %4361 = vmatpush.bf16.msra.mxu0 %v6085_v3  ;;  %v2748_v46 = vsel %vm1051_vm0, %v2745_v62, %v2747_v41 }
 0x2dc   : > { %v2918_v57 = vadd.f32 %v2856_v61, %v2711_v2  ;;  %v3127_v30 = vsel %vm1728_vm1, %v3125_v23, %v3126_v28  ;;  %v3129_v11 = vsel %vm1728_vm1, %v3126_v28, %v3128_v25  ;;  %v8569_v2 = vpack.c.bf16 %v8535_v56, %v8533_v60 }
 0x2dd   : > { %v3045_v22 = vpop.f32.mrf.mxu1  ;;  %v8573_v10 = vpack.c.bf16 %v2748_v46, %v2746_v54  ;;  %v8575_v23 = vpack.c.bf16 %v3129_v11, %v3127_v30 }
 0x2de   : > { %v3105_v20 = vadd.f32 %v3043_v48, %v2918_v57 }
 0x2df   : > { %9822 = vst [vmem:[#allocation99_spill] sm:$0xff] %v8573_v10 }
 0x2e0   : > { %v8558_v61 = vadd.f32 %v3244_v21, %v3105_v20  ;;  %9823 = vst [vmem:[#allocation109_spill] sm:$0xff] %v8575_v23 }
 0x2e1   : > { %v2651_v48 = vpop.f32.mrf.mxu3 }
 0x2e2   : > { %v2712_v3 = vadd.f32 %v2651_v48, %v8284_v44 }
 0x2e3   : > { %v3246_v20 = vpop.f32.mrf.mxu2  ;;  %v2861_v21 = vpop.f32.mrf.mxu0 }
 0x2e4   : > { %v2919_v49 = vadd.f32 %v2858_v33, %v2712_v3  ;;  %v9824_v3 = vld [vmem:[#allocation131_spill] sm:$0xff] }
 0x2e5   : > { %v3048_v39 = vpop.f32.mrf.mxu1 }
 0x2e6   : > { %2693 = vmatmul.bf16.gmra.mxu3 %v8569_v2  ;;  %2900 = vmatmul.bf16.gmra.mxu0 %v8571_v53  ;;  %v3106_v44 = vadd.f32 %v3045_v22, %v2919_v49 }
 0x2e8   : > { %3087 = vmatmul.bf16.gmra.mxu1 %v8573_v10  ;;  %3288 = vmatmul.bf16.gmra.mxu2 %v8575_v23  ;;  %v8581_v35 = vadd.f32 %v3246_v20, %v3106_v44  ;;  %v9825_v20 = vld [vmem:[#allocation20_spill] sm:$0xff] }
 0x2e9   : > { %v2654_v6 = vpop.f32.mrf.mxu3 }
 0x2ea   : > { %v2713_v62 = vadd.f32 %v2654_v6, %v8287_v51  ;;  %v6076_v51 = vld [vmem:[%s9123_s3 + $0x1f0] sm:$0xff] }
 0x2eb   : > { %v3249_v54 = vpop.f32.mrf.mxu2  ;;  %v2863_v41 = vpop.f32.mrf.mxu0  ;;  %4161 = vmatpush.bf16.msra.mxu3 %v6076_v51 }
 0x2ec   : > { %v2920_v57 = vadd.f32 %v2861_v21, %v2713_v62 }
 0x2ed   : > { %v3050_v28 = vpop.f32.mrf.mxu1 }
 0x2ee   : > { %v3107_v33 = vadd.f32 %v3048_v39, %v2920_v57 }
 0x2f0   : > { %v8584_v25 = vadd.f32 %v3249_v54, %v3107_v33 }
 0x2f1   : > { %v2656_v46 = vpop.f32.mrf.mxu3 }
 0x2f2   : > { %v2714_v30 = vadd.f32 %v2656_v46, %v8297_v59 }
 0x2f3   : > { %v3251_v22 = vpop.f32.mrf.mxu2  ;;  %v2866_v11 = vpop.f32.mrf.mxu0 }
 0x2f4   : > { %v2921_v55 = vadd.f32 %v2863_v41, %v2714_v30  ;;  %v6084_v41 = vld [vmem:[%s9122_s2 + $0x230] sm:$0xff] }
 0x2f5   : > { %v3053_v48 = vpop.f32.mrf.mxu1  ;;  %4362 = vmatpush.bf16.msra.mxu0 %v6084_v41 }
 0x2f6   : > { %3400 = vmatmul.bf16.vlgmr.msrb.gmra.mxu3 %v9824_v3  ;;  %3587 = vmatmul.bf16.vlgmr.msrb.gmra.mxu0 %v9825_v20  ;;  %v3108_v49 = vadd.f32 %v3050_v28, %v2921_v55  ;;  %v9827_v55 = vld [vmem:[#allocation32_spill] sm:$0xff] }
 0x2f8   : > { %3774 = vmatmul.bf16.vlgmr.msrb.gmra.mxu1 %v9753_v29  ;;  %3981 = vmatmul.bf16.vlgmr.msrb.gmra.mxu2 %v9754_v1  ;;  %v8594_v21 = vadd.f32 %v3251_v22, %v3108_v49  ;;  %v6092_v29 = vld [vmem:[%s9123_s3 + $0x230] sm:$0xff] }
 0x2f9   : > { %v2659_v59 = vpop.f32.mrf.mxu3  ;;  %4549 = vmatpush.bf16.msra.mxu1 %v6092_v29 }
 0x2fa   : > { %v2715_v39 = vadd.f32 %v2659_v59, %v8303_v42 }
 0x2fb   : > { %v3254_v44 = vpop.f32.mrf.mxu2  ;;  %v2868_v6 = vpop.f32.mrf.mxu0 }
 0x2fc   : > { %v2922_v62 = vadd.f32 %v2866_v11, %v2715_v39  ;;  %v9826_v11 = vld [vmem:[#allocation134_spill] sm:$0xff] }
 0x2fd   : > { %v3055_v54 = vpop.f32.mrf.mxu1 }
 0x2fe   : > { %v3109_v57 = vadd.f32 %v3053_v48, %v2922_v62 }
 0x300   : > { %v8600_v28 = vadd.f32 %v3254_v44, %v3109_v57 }
 0x301   : > { %v2661_v1 = vpop.f32.mrf.mxu3 }
 0x302   : > { %v2716_v33 = vadd.f32 %v2661_v1, %v8313_v13  ;;  %v9829_v1 = vld [vmem:[#allocation44_spill] sm:$0xff] }
 0x303   : > { %v3256_v42 = vpop.f32.mrf.mxu2  ;;  %v2871_v46 = vpop.f32.mrf.mxu0 }
 0x304   : > { %v2923_v30 = vadd.f32 %v2868_v6, %v2716_v33 }
 0x305   : > { %v3058_v22 = vpop.f32.mrf.mxu1 }
 0x306   : > { %3405 = vmatmul.bf16.gmra.mxu3 %v9826_v11  ;;  %3592 = vmatmul.bf16.gmra.mxu0 %v9827_v55  ;;  %v3110_v48 = vadd.f32 %v3055_v54, %v2923_v30 }
 0x308   : > { %3779 = vmatmul.bf16.gmra.mxu1 %v9755_v26  ;;  %3986 = vmatmul.bf16.gmra.mxu2 %v9756_v52  ;;  %v8610_v3 = vadd.f32 %v3256_v42, %v3110_v48  ;;  %v9828_v52 = vld [vmem:[#allocation29_spill] sm:$0xff] }
 0x309   : > { %v2664_v20 = vpop.f32.mrf.mxu3 }
 0x30a   : > { %v2717_v49 = vadd.f32 %v2664_v20, %v8316_v12  ;;  %v6075_v12 = vld [vmem:[%s9123_s3 + $0x1e8] sm:$0xff] }
 0x30b   : > { %v3259_v13 = vpop.f32.mrf.mxu2  ;;  %v2873_v51 = vpop.f32.mrf.mxu0  ;;  %4162 = vmatpush.bf16.msra.mxu3 %v6075_v12  ;;  %v6083_v20 = vld [vmem:[%s9122_s2 + $0x228] sm:$0xff] }
 0x30c   : > { %v2924_v59 = vadd.f32 %v2871_v46, %v2717_v49  ;;  %4363 = vmatpush.bf16.msra.mxu0 %v6083_v20  ;;  %v9834_v20 = vld [vmem:[#allocation78_spill] sm:$0xff] }
 0x30d   : > { %v3060_v39 = vpop.f32.mrf.mxu1 }
 0x30e   : > { %v3111_v44 = vadd.f32 %v3058_v22, %v2924_v59 }
 0x310   : > { %v8613_v6 = vadd.f32 %v3259_v13, %v3111_v44 }
 0x311   : > { %v2666_v62 = vpop.f32.mrf.mxu3 }
 0x312   : > { %v2718_v41 = vadd.f32 %v2666_v62, %v8326_v37  ;;  %v9830_v62 = vld [vmem:[#allocation40_spill] sm:$0xff] }
 0x313   : > { %v3261_v54 = vpop.f32.mrf.mxu2  ;;  %v2876_v57 = vpop.f32.mrf.mxu0 }
 0x314   : > { %v2925_v26 = vadd.f32 %v2873_v51, %v2718_v41  ;;  %v9831_v41 = vld [vmem:[#allocation56_spill] sm:$0xff] }
 0x315   : > { %v3063_v29 = vpop.f32.mrf.mxu1 }
 0x316   : > { %3410 = vmatmul.bf16.gmra.mxu3 %v9828_v52  ;;  %3597 = vmatmul.bf16.gmra.mxu0 %v9829_v1  ;;  %v3112_v33 = vadd.f32 %v3060_v39, %v2925_v26  ;;  %v9833_v1 = vld [vmem:[#allocation117_spill] sm:$0xff] }
 0x318   : > { %3784 = vmatmul.bf16.gmra.mxu1 %v9757_v38  ;;  %3991 = vmatmul.bf16.gmra.mxu2 %v9758_v63  ;;  %v8623_v42 = vadd.f32 %v3261_v54, %v3112_v33  ;;  %v6091_v38 = vld [vmem:[%s9123_s3 + $0x228] sm:$0xff] }
 0x319   : > { %v2669_v37 = vpop.f32.mrf.mxu3  ;;  %4550 = vmatpush.bf16.msra.mxu1 %v6091_v38 }
 0x31a   : > { %v2719_v46 = vadd.f32 %v2669_v37, %v8332_v36 }
 0x31b   : > { %v3264_v30 = vpop.f32.mrf.mxu2  ;;  %v2878_v22 = vpop.f32.mrf.mxu0 }
 0x31c   : > { %v2926_v55 = vadd.f32 %v2876_v57, %v2719_v46  ;;  %v9832_v57 = vld [vmem:[#allocation58_spill] sm:$0xff] }
 0x31d   : > { %v3065_v48 = vpop.f32.mrf.mxu1 }
 0x31e   : > { %v3113_v49 = vadd.f32 %v3063_v29, %v2926_v55 }
 0x320   : > { %v8629_v13 = vadd.f32 %v3264_v30, %v3113_v49 }
 0x321   : > { %v2671_v63 = vpop.f32.mrf.mxu3 }
 0x322   : > { %v2720_v51 = vadd.f32 %v2671_v63, %v8342_v7 }
 0x323   : > { %v3266_v36 = vpop.f32.mrf.mxu2  ;;  %v2881_v59 = vpop.f32.mrf.mxu0 }
 0x324   : > { %v2927_v39 = vadd.f32 %v2878_v22, %v2720_v51  ;;  %v9835_v51 = vld [vmem:[#allocation41_spill] sm:$0xff] }
 0x325   : > { %v3068_v44 = vpop.f32.mrf.mxu1 }
 0x326   : > { %3415 = vmatmul.bf16.gmra.mxu3 %v9830_v62  ;;  %3602 = vmatmul.bf16.gmra.mxu0 %v9831_v41  ;;  %v3114_v54 = vadd.f32 %v3065_v48, %v2927_v39  ;;  %v9837_v41 = vld [vmem:[#allocation67_spill] sm:$0xff] }
 0x328   : > { %3789 = vmatmul.bf16.gmra.mxu1 %v9762_v18  ;;  %3996 = vmatmul.bf16.gmra.mxu2 %v9832_v57  ;;  %v8639_v26 = vadd.f32 %v3266_v36, %v3114_v54  ;;  %v9836_v36 = vld [vmem:[#allocation68_spill] sm:$0xff] }
 0x329   : > { %v2674_v29 = vpop.f32.mrf.mxu3 }
 0x32a   : > { %v2721_v33 = vadd.f32 %v2674_v29, %v9833_v1  ;;  %v9839_v29 = vld [vmem:[#allocation77_spill] sm:$0xff] }
 0x32b   : > { %v3269_v7 = vpop.f32.mrf.mxu2  ;;  %v2883_v12 = vpop.f32.mrf.mxu0 }
 0x32c   : > { %v2928_v37 = vadd.f32 %v2881_v59, %v2721_v33  ;;  %v6074_v59 = vld [vmem:[%s9123_s3 + $0x1e0] sm:$0xff] }
 0x32d   : > { %v3070_v46 = vpop.f32.mrf.mxu1  ;;  %4163 = vmatpush.bf16.msra.mxu3 %v6074_v59  ;;  %v9840_v59 = vld [vmem:[#allocation50_spill] sm:$0xff] }
 0x32e   : > { %v3115_v30 = vadd.f32 %v3068_v44, %v2928_v37  ;;  %v9838_v44 = vld [vmem:[#allocation70_spill] sm:$0xff] }
 0x330   : > { %v8642_v22 = vadd.f32 %v3269_v7, %v3115_v30 }
 0x331   : > { %v2676_v55 = vpop.f32.mrf.mxu3 }
 0x332   : > { %v2722_v49 = vadd.f32 %v2676_v55, %v9834_v20  ;;  %v6090_v20 = vld [vmem:[%s9123_s3 + $0x220] sm:$0xff] }
 0x333   : > { %v3271_v48 = vpop.f32.mrf.mxu2  ;;  %v2886_v38 = vpop.f32.mrf.mxu0  ;;  %4551 = vmatpush.bf16.msra.mxu1 %v6090_v20 }
 0x334   : > { %v2929_v18 = vadd.f32 %v2883_v12, %v2722_v49 }
 0x335   : > { %v3073_v63 = vpop.f32.mrf.mxu1 }
 0x336   : > { %3420 = vmatmul.bf16.gmra.mxu3 %v9835_v51  ;;  %3607 = vmatmul.bf16.gmra.mxu0 %v9836_v36  ;;  %v3116_v39 = vadd.f32 %v3070_v46, %v2929_v18  ;;  %v6082_v46 = vld [vmem:[%s9122_s2 + $0x220] sm:$0xff] }
 0x337   : > { %4364 = vmatpush.bf16.msra.mxu0 %v6082_v46 }
 0x338   : > { %3794 = vmatmul.bf16.gmra.mxu1 %v9837_v41  ;;  %4001 = vmatmul.bf16.gmra.mxu2 %v9838_v44  ;;  %v8652_v54 = vadd.f32 %v3271_v48, %v3116_v39  ;;  %v9841_v41 = vld [vmem:[#allocation82_spill] sm:$0xff]  ;;  %v9842_v44 = vld [vmem:[#allocation84_spill] sm:$0xff] }
 0x339   : > { %v2679_v57 = vpop.f32.mrf.mxu3 }
 0x33a   : > { %v2723_v1 = vadd.f32 %v2679_v57, %v9839_v29 }
 0x33b   : > { %v3274_v33 = vpop.f32.mrf.mxu2  ;;  %v2888_v7 = vpop.f32.mrf.mxu0 }
 0x33c   : > { %v2930_v12 = vadd.f32 %v2886_v38, %v2723_v1  ;;  %v9843_v1 = vld [vmem:[#allocation8_spill] sm:$0xff] }
 0x33d   : > { %v3075_v37 = vpop.f32.mrf.mxu1 }
 0x33e   : > { %v3117_v30 = vadd.f32 %v3073_v63, %v2930_v12 }
 0x340   : > { %v8658_v55 = vadd.f32 %v3274_v33, %v3117_v30 }
 0x341   : > { %v2681_v49 = vpop.f32.mrf.mxu3 }
 0x342   : > { %v2724_v48 = vadd.f32 %v2681_v49, %v8371_v8 }
 0x343   : > { %v3276_v18 = vpop.f32.mrf.mxu2  ;;  %v2891_v36 = vpop.f32.mrf.mxu0 }
 0x344   : > { %v2931_v38 = vadd.f32 %v2888_v7, %v2724_v48  ;;  %v9844_v48 = vld [vmem:[#allocation9_spill] sm:$0xff] }
 0x345   : > { %v3078_v39 = vpop.f32.mrf.mxu1 }
 0x346   : > { %3425 = vmatmul.bf16.gmra.mxu3 %v9840_v59  ;;  %3612 = vmatmul.bf16.gmra.mxu0 %v9841_v41  ;;  %v3118_v63 = vadd.f32 %v3075_v37, %v2931_v38 }
 0x348   : > { %3799 = vmatmul.bf16.gmra.mxu1 %v9777_v58  ;;  %4006 = vmatmul.bf16.gmra.mxu2 %v9842_v44  ;;  %v8668_v57 = vadd.f32 %v3276_v18, %v3118_v63  ;;  %v9845_v44 = vld [vmem:[#allocation59_spill] sm:$0xff]  ;;  %v9846_v18 = vld [vmem:[#allocation97_spill] sm:$0xff] }
 0x349   : > { %v2684_v29 = vpop.f32.mrf.mxu3 }
 0x34a   : > { %v2725_v33 = vadd.f32 %v2684_v29, %v9843_v1 }
 0x34b   : > { %v3279_v8 = vpop.f32.mrf.mxu2  ;;  %v2893_v12 = vpop.f32.mrf.mxu0 }
 0x34c   : > { %v2932_v46 = vadd.f32 %v2891_v36, %v2725_v33  ;;  %v6073_v36 = vld [vmem:[%s9123_s3 + $0x1d8] sm:$0xff]  ;;  %v9848_v33 = vld [vmem:[#allocation22_spill] sm:$0xff] }
 0x34d   : > { %v3080_v30 = vpop.f32.mrf.mxu1  ;;  %4164 = vmatpush.bf16.msra.mxu3 %v6073_v36 }
 0x34e   : > { %v3119_v7 = vadd.f32 %v3078_v39, %v2932_v46  ;;  %v9847_v39 = vld [vmem:[#allocation98_spill] sm:$0xff] }
 0x350   : > { %v8671_v20 = vadd.f32 %v3279_v8, %v3119_v7 }
 0x351   : > { %v2686_v49 = vpop.f32.mrf.mxu3 }
 0x352   : > { %v2726_v41 = vadd.f32 %v2686_v49, %v9844_v48 }
 0x353   : > { %v3281_v37 = vpop.f32.mrf.mxu2  ;;  %v2896_v38 = vpop.f32.mrf.mxu0 }
 0x354   : > { %v2933_v58 = vadd.f32 %v2893_v12, %v2726_v41 }
 0x355   : > { %v3083_v23 = vpop.f32.mrf.mxu1 }
 0x356   : > { %3430 = vmatmul.bf16.gmra.mxu3 %v9845_v44  ;;  %3617 = vmatmul.bf16.gmra.mxu0 %v9846_v18  ;;  %v3120_v63 = vadd.f32 %v3080_v30, %v2933_v58  ;;  %v6081_v30 = vld [vmem:[%s9122_s2 + $0x218] sm:$0xff] }
 0x357   : > { %4365 = vmatpush.bf16.msra.mxu0 %v6081_v30  ;;  %v9850_v58 = vld [vmem:[#allocation23_spill] sm:$0xff]  ;;  %v9855_v30 = vld [vmem:[#allocation85_spill] sm:$0xff] }
 0x358   : > { %3804 = vmatmul.bf16.gmra.mxu1 %v9785_v31  ;;  %4011 = vmatmul.bf16.gmra.mxu2 %v9847_v39  ;;  %v8681_v29 = vadd.f32 %v3281_v37, %v3120_v63  ;;  %v6089_v31 = vld [vmem:[%s9123_s3 + $0x218] sm:$0xff] }
 0x359   : > { %v2689_v1 = vpop.f32.mrf.mxu3  ;;  %4552 = vmatpush.bf16.msra.mxu1 %v6089_v31 }
 0x35a   : > { %v2727_v8 = vadd.f32 %v2689_v1, %v9848_v33  ;;  %v9851_v1 = vld [vmem:[#allocation71_spill] sm:$0xff]  ;;  %v9852_v33 = vld [vmem:[#allocation113_spill] sm:$0xff] }
 0x35b   : > { %v3284_v12 = vpop.f32.mrf.mxu2  ;;  %v2898_v46 = vpop.f32.mrf.mxu0 }
 0x35c   : > { %v2934_v7 = vadd.f32 %v2896_v38, %v2727_v8  ;;  %v9853_v8 = vld [vmem:[#allocation114_spill] sm:$0xff] }
 0x35d   : > { %v3085_v49 = vpop.f32.mrf.mxu1 }
 0x35e   : > { %v3121_v48 = vadd.f32 %v3083_v23, %v2934_v7 }
 0x360   : > { %v8687_v41 = vadd.f32 %v3284_v12, %v3121_v48 }
 0x361   : > { %v2691_v37 = vpop.f32.mrf.mxu3 }
 0x362   : > { %9849 = vst [vmem:[#allocation108_spill] sm:$0xff] %v8687_v41  ;;  %v2728_v18 = vadd.f32 %v2691_v37, %v9850_v58 }
 0x363   : > { %v3286_v63 = vpop.f32.mrf.mxu2  ;;  %v2901_v36 = vpop.f32.mrf.mxu0 }
 0x364   : > { %v2935_v38 = vadd.f32 %v2898_v46, %v2728_v18  ;;  %v6101_v46 = vld [vmem:[#allocation2 + $0x38] sm:$0xff] }
 0x365   : > { %v3088_v39 = vpop.f32.mrf.mxu1  ;;  %4785 = vmatpush.bf16.msra.mxu2 %v6101_v46 }
 0x366   : > { %3435 = vmatmul.bf16.gmra.mxu3 %v9851_v1  ;;  %3622 = vmatmul.bf16.gmra.mxu0 %v9852_v33  ;;  %v3122_v23 = vadd.f32 %v3085_v49, %v2935_v38  ;;  %v9856_v49 = vld [vmem:[#allocation92_spill] sm:$0xff] }
 0x368   : > { %3809 = vmatmul.bf16.gmra.mxu1 %v9793_v0  ;;  %4016 = vmatmul.bf16.gmra.mxu2 %v9853_v8  ;;  %v8697_v12 = vadd.f32 %v3286_v63, %v3122_v23  ;;  %v9857_v23 = vld [vmem:[#allocation79_spill] sm:$0xff] }
 0x369   : > { %v2694_v7 = vpop.f32.mrf.mxu3 }
 0x36a   : > { %9854 = vst [vmem:[#allocation16_spill] sm:$0xff] %v8697_v12  ;;  %v2729_v48 = vadd.f32 %v2694_v7, %v9855_v30  ;;  %v9858_v12 = vld [vmem:[#allocation123_spill] sm:$0xff] }
 0x36b   : > { %v3289_v37 = vpop.f32.mrf.mxu2  ;;  %v2903_v58 = vpop.f32.mrf.mxu0 }
 0x36c   : > { %v2936_v31 = vadd.f32 %v2901_v36, %v2729_v48  ;;  %v6072_v36 = vld [vmem:[%s9123_s3 + $0x1d0] sm:$0xff] }
 0x36d   : > { %v3090_v10 = vpop.f32.mrf.mxu1  ;;  %4165 = vmatpush.bf16.msra.mxu3 %v6072_v36 }
 0x36e   : > { %v3123_v18 = vadd.f32 %v3088_v39, %v2936_v31 }
 0x370   : > { %v8700_v41 = vadd.f32 %v3289_v37, %v3123_v18 }
 0x371   : > { %v2696_v33 = vpop.f32.mrf.mxu3 }
 0x372   : > { %v2730_v38 = vadd.f32 %v2696_v33, %v9856_v49  ;;  %v9859_v33 = vld [vmem:[#allocation91_spill] sm:$0xff] }
 0x373   : > { %v3291_v0 = vpop.f32.mrf.mxu2  ;;  %v3588_v1 = vpop.f32.mrf.mxu0 }
 0x374   : > { %v2937_v8 = vadd.f32 %v2903_v58, %v2730_v38 }
 0x375   : > { %v3775_v63 = vpop.f32.mrf.mxu1 }
 0x376   : > { %3440 = vmatmul.bf16.gmra.mxu3 %v9857_v23  ;;  %3627 = vmatmul.bf16.gmra.mxu0 %v9858_v12  ;;  %v3124_v7 = vadd.f32 %v3090_v10, %v2937_v8  ;;  %v6080_v10 = vld [vmem:[%s9122_s2 + $0x210] sm:$0xff]  ;;  %v9860_v8 = vld [vmem:[#allocation87_spill] sm:$0xff] }
 0x377   : > { %4366 = vmatpush.bf16.msra.mxu0 %v6080_v10 }
 0x378   : > { %3814 = vmatmul.bf16.gmra.mxu1 %v9800_v24  ;;  %4021 = vmatmul.bf16.gmra.mxu2 %v9801_v32  ;;  %v8710_v39 = vadd.f32 %v3291_v0, %v3124_v7  ;;  %v6088_v24 = vld [vmem:[%s9123_s3 + $0x210] sm:$0xff]  ;;  %v9861_v7 = vld [vmem:[#allocation129_spill] sm:$0xff] }
 0x379   : > { %v3401_v30 = vpop.f32.mrf.mxu3  ;;  %4553 = vmatpush.bf16.msra.mxu1 %v6088_v24 }
 0x37a   : > { %v3481_v48 = vadd.f32 %v3401_v30, %v8422_v17 }
 0x37b   : > { %v3982_v37 = vpop.f32.mrf.mxu2  ;;  %v3590_v58 = vpop.f32.mrf.mxu0 }
 0x37c   : > { %v3668_v31 = vadd.f32 %v3588_v1, %v3481_v48 }
 0x37d   : > { %v3777_v46 = vpop.f32.mrf.mxu1 }
 0x37e   : > { %v3855_v12 = vadd.f32 %v3775_v63, %v3668_v31 }
 0x380   : > { %v8716_v18 = vadd.f32 %v3982_v37, %v3855_v12 }
 0x381   : > { %v3403_v32 = vpop.f32.mrf.mxu3 }
 0x382   : > { %v3482_v49 = vadd.f32 %v3403_v32, %v9859_v33 }
 0x383   : > { %v3984_v17 = vpop.f32.mrf.mxu2  ;;  %v3593_v38 = vpop.f32.mrf.mxu0 }
 0x384   : > { %v3669_v1 = vadd.f32 %v3590_v58, %v3482_v49  ;;  %v6100_v58 = vld [vmem:[#allocation2 + $0x30] sm:$0xff] }
 0x385   : > { %v3780_v0 = vpop.f32.mrf.mxu1  ;;  %4786 = vmatpush.bf16.msra.mxu2 %v6100_v58 }
 0x386   : > { %3445 = vmatmul.bf16.gmra.mxu3 %v9860_v8  ;;  %3632 = vmatmul.bf16.gmra.mxu0 %v9861_v7  ;;  %v3856_v63 = vadd.f32 %v3777_v46, %v3669_v1  ;;  %v9862_v1 = vld [vmem:[#allocation93_spill] sm:$0xff] }
 0x387   : > { %v9863_v7 = vld [vmem:[#allocation45_spill] sm:$0xff] }
 0x388   : > { %3819 = vmatmul.bf16.gmra.mxu1 %v9803_v16  ;;  %4026 = vmatmul.bf16.gmra.mxu2 %v9804_v43  ;;  %v8726_v36 = vadd.f32 %v3984_v17, %v3856_v63 }
 0x389   : > { %v3406_v30 = vpop.f32.mrf.mxu3 }
 0x38a   : > { %v3483_v48 = vadd.f32 %v3406_v30, %v8438_v34 }
 0x38b   : > { %v3987_v37 = vpop.f32.mrf.mxu2  ;;  %v3595_v31 = vpop.f32.mrf.mxu0 }
 0x38c   : > { %v3670_v10 = vadd.f32 %v3593_v38, %v3483_v48  ;;  %v6071_v38 = vld [vmem:[%s9123_s3 + $0x1c8] sm:$0xff] }
 0x38d   : > { %v3782_v12 = vpop.f32.mrf.mxu1  ;;  %4166 = vmatpush.bf16.msra.mxu3 %v6071_v38 }
 0x38e   : > { %v3857_v24 = vadd.f32 %v3780_v0, %v3670_v10  ;;  %v6079_v10 = vld [vmem:[%s9122_s2 + $0x208] sm:$0xff] }
 0x38f   : > { %4367 = vmatpush.bf16.msra.mxu0 %v6079_v10 }
 0x390   : > { %v8729_v32 = vadd.f32 %v3987_v37, %v3857_v24 }
 0x391   : > { %v3408_v33 = vpop.f32.mrf.mxu3 }
 0x392   : > { %v3484_v46 = vadd.f32 %v3408_v33, %v8448_v9 }
 0x393   : > { %v3989_v16 = vpop.f32.mrf.mxu2  ;;  %v3598_v49 = vpop.f32.mrf.mxu0 }
 0x394   : > { %v3671_v43 = vadd.f32 %v3595_v31, %v3484_v46 }
 0x395   : > { %v3785_v17 = vpop.f32.mrf.mxu1 }
 0x396   : > { %3450 = vmatmul.bf16.gmra.mxu3 %v9862_v1  ;;  %3637 = vmatmul.bf16.gmra.mxu0 %v9863_v7  ;;  %v3858_v34 = vadd.f32 %v3782_v12, %v3671_v43  ;;  %v9865_v43 = vld [vmem:[#allocation57_spill] sm:$0xff] }
 0x398   : > { %3824 = vmatmul.bf16.gmra.mxu1 %v9805_v19  ;;  %4031 = vmatmul.bf16.gmra.mxu2 %v9806_v40  ;;  %v8739_v0 = vadd.f32 %v3989_v16, %v3858_v34  ;;  %v6087_v40 = vld [vmem:[%s9123_s3 + $0x208] sm:$0xff] }
 0x399   : > { %v3411_v9 = vpop.f32.mrf.mxu3  ;;  %4554 = vmatpush.bf16.msra.mxu1 %v6087_v40 }
 0x39a   : > { %v3485_v63 = vadd.f32 %v3411_v9, %v8454_v4 }
 0x39b   : > { %v3992_v30 = vpop.f32.mrf.mxu2  ;;  %v3600_v48 = vpop.f32.mrf.mxu0 }
 0x39c   : > { %v3672_v37 = vadd.f32 %v3598_v49, %v3485_v63  ;;  %v9864_v49 = vld [vmem:[#allocation105_spill] sm:$0xff] }
 0x39d   : > { %v3787_v31 = vpop.f32.mrf.mxu1 }
 0x39e   : > { %v3859_v12 = vadd.f32 %v3785_v17, %v3672_v37 }
 0x3a0   : > { %v8745_v58 = vadd.f32 %v3992_v30, %v3859_v12 }
 0x3a1   : > { %v3413_v19 = vpop.f32.mrf.mxu3 }
 0x3a2   : > { %v3486_v24 = vadd.f32 %v3413_v19, %v8464_v45 }
 0x3a3   : > { %v3994_v4 = vpop.f32.mrf.mxu2  ;;  %v3603_v33 = vpop.f32.mrf.mxu0 }
 0x3a4   : > { %v3673_v46 = vadd.f32 %v3600_v48, %v3486_v24  ;;  %v6099_v48 = vld [vmem:[#allocation2 + $0x28] sm:$0xff]  ;;  %v9866_v24 = vld [vmem:[#allocation102_spill] sm:$0xff] }
 0x3a5   : > { %v3790_v16 = vpop.f32.mrf.mxu1  ;;  %4787 = vmatpush.bf16.msra.mxu2 %v6099_v48 }
 0x3a6   : > { %3455 = vmatmul.bf16.gmra.mxu3 %v9864_v49  ;;  %3642 = vmatmul.bf16.gmra.mxu0 %v9865_v43  ;;  %v3860_v17 = vadd.f32 %v3787_v31, %v3673_v46  ;;  %v9868_v46 = vld [vmem:[#allocation125_spill] sm:$0xff]  ;;  %v9870_v43 = vld [vmem:[#allocation11_spill] sm:$0xff] }
 0x3a8   : > { %3829 = vmatmul.bf16.gmra.mxu1 %v9807_v15  ;;  %4036 = vmatmul.bf16.gmra.mxu2 %v9808_v27  ;;  %v8755_v7 = vadd.f32 %v3994_v4, %v3860_v17  ;;  %v9867_v4 = vld [vmem:[#allocation69_spill] sm:$0xff] }
 0x3a9   : > { %v3416_v34 = vpop.f32.mrf.mxu3 }
 0x3aa   : > { %v3487_v38 = vadd.f32 %v3416_v34, %v8470_v47 }
 0x3ab   : > { %v3997_v45 = vpop.f32.mrf.mxu2  ;;  %v3605_v9 = vpop.f32.mrf.mxu0 }
 0x3ac   : > { %v3674_v63 = vadd.f32 %v3603_v33, %v3487_v38  ;;  %v6070_v33 = vld [vmem:[%s9123_s3 + $0x1c0] sm:$0xff] }
 0x3ad   : > { %v3792_v30 = vpop.f32.mrf.mxu1  ;;  %4167 = vmatpush.bf16.msra.mxu3 %v6070_v33  ;;  %v9875_v33 = vld [vmem:[#allocation83_spill] sm:$0xff] }
 0x3ae   : > { %v3861_v37 = vadd.f32 %v3790_v16, %v3674_v63  ;;  %v6078_v63 = vld [vmem:[%s9122_s2 + $0x200] sm:$0xff] }
 0x3af   : > { %4368 = vmatpush.bf16.msra.mxu0 %v6078_v63 }
 0x3b0   : > { %v8758_v10 = vadd.f32 %v3997_v45, %v3861_v37 }
 0x3b1   : > { %v3418_v12 = vpop.f32.mrf.mxu3 }
 0x3b2   : > { %v3488_v31 = vadd.f32 %v3418_v12, %v8480_v50  ;;  %v9872_v12 = vld [vmem:[#allocation12_spill] sm:$0xff] }
 0x3b3   : > { %v3999_v15 = vpop.f32.mrf.mxu2  ;;  %v3608_v40 = vpop.f32.mrf.mxu0 }
 0x3b4   : > { %v3675_v27 = vadd.f32 %v3605_v9, %v3488_v31 }
 0x3b5   : > { %v3795_v19 = vpop.f32.mrf.mxu1 }
 0x3b6   : > { %3460 = vmatmul.bf16.gmra.mxu3 %v9866_v24  ;;  %3647 = vmatmul.bf16.gmra.mxu0 %v9867_v4  ;;  %v3862_v47 = vadd.f32 %v3792_v30, %v3675_v27 }
 0x3b8   : > { %3834 = vmatmul.bf16.gmra.mxu1 %v9810_v5  ;;  %4041 = vmatmul.bf16.gmra.mxu2 %v9868_v46  ;;  %v8768_v16 = vadd.f32 %v3999_v15, %v3862_v47  ;;  %v6086_v5 = vld [vmem:[%s9123_s3 + $0x200] sm:$0xff]  ;;  %v9874_v47 = vld [vmem:[#allocation106_spill] sm:$0xff]  ;;  %v9877_v46 = vld [vmem:[#allocation31_spill] sm:$0xff] }
 0x3b9   : > { %v3421_v50 = vpop.f32.mrf.mxu3  ;;  %4555 = vmatpush.bf16.msra.mxu1 %v6086_v5  ;;  %v6098_v5 = vld [vmem:[#allocation2 + $0x20] sm:$0xff] }
 0x3ba   : > { %9869 = vst [vmem:[#allocation17_spill] sm:$0xff] %v8768_v16  ;;  %v3489_v17 = vadd.f32 %v3421_v50, %v9870_v43  ;;  %v9878_v50 = vld [vmem:[#allocation128_spill] sm:$0xff]  ;;  %4788 = vmatpush.bf16.msra.mxu2 %v6098_v5 }
 0x3bb   : > { %v4002_v34 = vpop.f32.mrf.mxu2  ;;  %v3610_v38 = vpop.f32.mrf.mxu0  ;;  %v9886_v5 = vld [vmem:[#allocation116_spill] sm:$0xff] }
 0x3bc   : > { %v3676_v45 = vadd.f32 %v3608_v40, %v3489_v17  ;;  %v9879_v17 = vld [vmem:[#allocation34_spill] sm:$0xff] }
 0x3bd   : > { %v3797_v9 = vpop.f32.mrf.mxu1 }
 0x3be   : > { %v3863_v30 = vadd.f32 %v3795_v19, %v3676_v45 }
 0x3c0   : > { %v8774_v48 = vadd.f32 %v4002_v34, %v3863_v30 }
 0x3c1   : > { %v3423_v37 = vpop.f32.mrf.mxu3 }
 0x3c2   : > { %9871 = vst [vmem:[#allocation64_spill] sm:$0xff] %v8774_v48  ;;  %v3490_v31 = vadd.f32 %v3423_v37, %v9872_v12 }
 0x3c3   : > { %v8780_v15 = vpop.f32.mrf.mxu2  ;;  %v3613_v40 = vpop.f32.mrf.mxu0 }
 0x3c4   : > { %9873 = vst [vmem:[#allocation47_spill] sm:$0xff] %v8780_v15  ;;  %v3677_v27 = vadd.f32 %v3610_v38, %v3490_v31  ;;  %v8792_v31 = vld [vmem:[%s6610_s29 + $0xd4] sm:$0x1]  ;;  %v446_v15 = vld [vmem:[%s6615_s11 + $0xcc] sm:$0xff]  }
 0x3c5   : > { %v3800_v4 = vpop.f32.mrf.mxu1  ;;  %9881 = vst [vmem:[#allocation27_spill] sm:$0xff] %v8792_v31 }
 0x3c6   : > { %3465 = vmatmul.bf16.gmra.mxu3 %v9874_v47  ;;  %3652 = vmatmul.bf16.gmra.mxu0 %v9875_v33  ;;  %v8784_v19 = vadd.f32 %v3797_v9, %v3677_v27  ;;  %v8795_v27 = vld [vmem:[%s6615_s11 + $0xd4] sm:$0x1]  ;;  %v9883_v33 = vld [vmem:[#allocation35_spill] sm:$0xff] }
 0x3c7   : > { %9882 = vst [vmem:[#allocation76_spill] sm:$0xff] %v8795_v27 }
 0x3c8   : > { %9876 = vst [vmem:[#allocation118_spill] sm:$0xff] %v8784_v19  ;;  %3839 = vmatmul.bf16.gmra.mxu1 %v9877_v46  ;;  %4046 = vmatmul.bf16.gmra.mxu2 %v9878_v50 }
 0x3c9   : > { %v3426_v43 = vpop.f32.mrf.mxu3 }
 0x3ca   : > { %v3491_v34 = vadd.f32 %v3426_v43, %v9879_v17  ;;  %v338_v43 = vld [vmem:[%s6610_s29 + $0xcc] sm:$0xff]   ;;  %s6416_s29 = scalar_lea.hbm %s9126_s6, 256 }
 0x3cb   : > { %v4007_v45 = vpop.f32.mrf.mxu2  ;;  %v3615_v38 = vpop.f32.mrf.mxu0  ;;  %p6418_p4 = scmp.lt.s32.totalorder %s6416_s29, %s6412_s19 }
 0x3cc   : > { %v3678_v63 = vadd.f32 %v3613_v40, %v3491_v34  ;;  %v9418_v34 = vunpack.c.l.bf16 %v8792_v31 }
 0x3cd   : > { %v3802_v30 = vpop.f32.mrf.mxu1  ;;  %p6419_p7 = por %p6418_p4, %p6417_p3 }
 0x3ce   : > { %v3865_v37 = vadd.f32 %v3800_v4, %v3678_v63  ;;  %v9419_v4 = vunpack.c.l.bf16 %v8795_v27  ;;  %v9885_v63 = vld [vmem:[#allocation115_spill] sm:$0xff] }
 0x3cf   : > { %p6420_p8 = pnand %p6419_p7, %p6415_p2 }
 0x3d0   : > { %v8789_v12 = vadd.f32 %v4007_v45, %v3865_v37  ;;  %v392_v45 = vunpack.c.l.bf16 %v338_v43 }
 0x3d1   : > { %v3428_v9 = vpop.f32.mrf.mxu3 }
 0x3d2   : > { %9880 = vst [vmem:[#allocation26_spill] sm:$0xff] %v8789_v12  ;;  %v3492_v46 = vadd.f32 %v3428_v9, %v9883_v33  ;;  %v393_v12 = vunpack.c.h.bf16 %v338_v43  ;;  %v500_v9 = vunpack.c.l.bf16 %v446_v15  ;;  %v501_v33 = vunpack.c.h.bf16 %v446_v15 }
 0x3d3   : > { %v8798_v50 = vpop.f32.mrf.mxu2  ;;  %v3618_v17 = vpop.f32.mrf.mxu0 }
 0x3d4   : > { %9884 = vst [vmem:[#allocation126_spill] sm:$0xff] %v8798_v50  ;;  %v3679_v19 = vadd.f32 %v3615_v38, %v3492_v46  ;;  %v8814_v38 = vadd.f32 %v9419_v4, %v9418_v34  ;;  %v8820_v43 = vadd.f32 %v501_v33, %v393_v12  ;;  %v608_v31 = vsub.f32 %v392_v45, %v500_v9 }
 0x3d5   : > { %v3805_v40 = vpop.f32.mrf.mxu1  ;;  %v609_v27 = vsub.f32 %v393_v12, %v501_v33 }
 0x3d6   : > { %3470 = vmatmul.bf16.gmra.mxu3 %v9885_v63  ;;  %3657 = vmatmul.bf16.gmra.mxu0 %v9886_v5  ;;  %v8806_v37 = vadd.f32 %v3802_v30, %v3679_v19  ;;  %v3132_v19 = vrot.slane %v8533_v60, 2  ;;  %v8818_v30 = vadd.f32 %v500_v9, %v392_v45  ;;  %v3893_v60 = vrot.slane %v8814_v38, 1 }
 0x3d7   : > { %v8830_v16 = vand.u32 2147483647, %v608_v31 }
 0x3d8   : > { %9887 = vst [vmem:[#allocation13_spill] sm:$0xff] %v8806_v37  ;;  %3844 = vmatmul.bf16.gmra.mxu1 %v8569_v2  ;;  %4051 = vmatmul.bf16.gmra.mxu2 %v8571_v53  ;;  %v3133_v2 = vrot.slane %v8535_v56, 2  ;;  %v9888_v53 = vand.u32 2147483647, %v8521_v14  ;;  %v3890_v37 = vrot.slane %v8818_v30, 1 }
 0x3d9   : > { %v3431_v46 = vpop.f32.mrf.mxu3  ;;  %v8832_v56 = vand.u32 2147483647, %v609_v27 }
 0x3da   : > { %v3493_v50 = vadd.f32 %v3431_v46, %v8558_v61  ;;  %v3135_v5 = vrot.slane %v9888_v53, 2  ;;  %v3891_v61 = vrot.slane %v8820_v43, 1  ;;  %v3134_v48 = vsel %vm1728_vm1, %v3132_v19, %v3133_v2 }
 0x3db   : > { %v4012_v63 = vpop.f32.mrf.mxu2  ;;  %v3620_v15 = vpop.f32.mrf.mxu0  ;;  %v3700_v27 = vpack.c.bf16 %v8832_v56, %v8830_v16 }
 0x3dc   : > { %v3680_v34 = vadd.f32 %v3618_v17, %v3493_v50  ;;  %v3136_v47 = vsel %vm1728_vm1, %v3133_v2, %v3135_v5  ;;  %v3892_v12 = vsel %vm1051_vm0, %v3890_v37, %v3891_v61  ;;  %v3894_v50 = vsel %vm1051_vm0, %v3891_v61, %v3893_v60  ;;  %v6097_v61 = vld [vmem:[#allocation2 + $0x18] sm:$0xff] }
 0x3dd   : > { %v3807_v4 = vpop.f32.mrf.mxu1  ;;  %v8839_v9 = vpack.c.bf16 %v3136_v47, %v3134_v48  ;;  %4789 = vmatpush.bf16.msra.mxu2 %v6097_v61 }
 0x3de   : > { %v3867_v46 = vadd.f32 %v3805_v40, %v3680_v34  ;;  %v3513_v40 = vpack.c.bf16 %v8820_v43, %v8818_v30 }
 0x3e0   : > { %v8834_v14 = vadd.f32 %v4012_v63, %v3867_v46  ;;  %v3907_v63 = vpack.c.bf16 %v3894_v50, %v3892_v12 }
 0x3e1   : > { %v3433_v17 = vpop.f32.mrf.mxu3 }
 0x3e2   : > { %v3494_v45 = vadd.f32 %v3433_v17, %v8581_v35 }
 0x3e3   : > { %v8843_v34 = vpop.f32.mrf.mxu2  ;;  %v3623_v31 = vpop.f32.mrf.mxu0 }
 0x3e4   : > { %v3681_v33 = vadd.f32 %v3620_v15, %v3494_v45 }
 0x3e5   : > { %v3810_v19 = vpop.f32.mrf.mxu1 }
 0x3e6   : > { %3475 = vmatmul.bf16.gmra.mxu3 %v8839_v9  ;;  %3662 = vmatmul.bf16.gmra.mxu0 %v3513_v40  ;;  %v8848_v37 = vadd.f32 %v3807_v4, %v3681_v33  ;;  %v9889_v40 = vld [vmem:[#allocation132_spill] sm:$0xff] }
 0x3e8   : > { %3849 = vmatmul.bf16.gmra.mxu1 %v3700_v27  ;;  %4056 = vmatmul.bf16.gmra.mxu2 %v3907_v63 }
 0x3e9   : > { %v3436_v35 = vpop.f32.mrf.mxu3 }
 0x3ea   : > { %v3495_v48 = vadd.f32 %v3436_v35, %v8584_v25  ;;  %v9890_v25 = vld [vmem:[#allocation133_spill] sm:$0xff] }
 0x3eb   : > { %v4017_v47 = vpop.f32.mrf.mxu2  ;;  %v3625_v2 = vpop.f32.mrf.mxu0 }
 0x3ec   : > { %v3682_v53 = vadd.f32 %v3623_v31, %v3495_v48 }
 0x3ed   : > { %v3812_v5 = vpop.f32.mrf.mxu1 }
 0x3ee   : > { %v3869_v60 = vadd.f32 %v3810_v19, %v3682_v53 }
 0x3f0   : > { %v8851_v46 = vadd.f32 %v4017_v47, %v3869_v60 }
 0x3f1   : > { %v3438_v15 = vpop.f32.mrf.mxu3 }
 0x3f2   : > { %v3496_v12 = vadd.f32 %v3438_v15, %v8594_v21 }
 0x3f3   : > { %v8854_v50 = vpop.f32.mrf.mxu2  ;;  %v3628_v4 = vpop.f32.mrf.mxu0 }
 0x3f4   : > { %v3683_v17 = vadd.f32 %v3625_v2, %v3496_v12  ;;  %v9891_v12 = vld [vmem:[#allocation24_spill] sm:$0xff] }
 0x3f5   : > { %v3815_v45 = vpop.f32.mrf.mxu1 }
 0x3f6   : > { %4168 = vmatmul.bf16.vlgmr.msra.gmra.mxu3 %v9889_v40  ;;  %4369 = vmatmul.bf16.vlgmr.msra.gmra.mxu0 %v9890_v25  ;;  %v8858_v27 = vadd.f32 %v3812_v5, %v3683_v17 }
 0x3f8   : > { %4556 = vmatmul.bf16.vlgmr.msra.gmra.mxu1 %v9826_v11  ;;  %v9892_v11 = vld [vmem:[#allocation25_spill] sm:$0xff] }
 0x3f9   : > { %v3441_v31 = vpop.f32.mrf.mxu3 }
 0x3fa   : > { %v3497_v63 = vadd.f32 %v3441_v31, %v8600_v28  ;;  %v6096_v31 = vld [vmem:[#allocation2 + $0x10] sm:$0xff] }
 0x3fb   : > { %v4022_v33 = vpop.f32.mrf.mxu2  ;;  %v3630_v19 = vpop.f32.mrf.mxu0  ;;  %4790 = vmatpush.bf16.msra.mxu2 %v6096_v31 }
 0x3fc   : > { %v3684_v35 = vadd.f32 %v3628_v4, %v3497_v63 }
 0x3fd   : > { %v3817_v21 = vpop.f32.mrf.mxu1 }
 0x3fe   : > { %v3871_v48 = vadd.f32 %v3815_v45, %v3684_v35 }
 0x400   : > { %v8862_v47 = vadd.f32 %v4022_v33, %v3871_v48 }
 0x401   : > { %v3443_v2 = vpop.f32.mrf.mxu3 }
 0x402   : > { %v3498_v53 = vadd.f32 %v3443_v2, %v8610_v3 }
 0x403   : > { %v8865_v61 = vpop.f32.mrf.mxu2  ;;  %v3633_v60 = vpop.f32.mrf.mxu0 }
 0x404   : > { %v3685_v5 = vadd.f32 %v3630_v19, %v3498_v53  ;;  %v9893_v53 = vld [vmem:[#allocation28_spill] sm:$0xff] }
 0x405   : > { %v3820_v15 = vpop.f32.mrf.mxu1 }
 0x406   : > { %4173 = vmatmul.bf16.gmra.mxu3 %v9891_v12  ;;  %4374 = vmatmul.bf16.gmra.mxu0 %v9892_v11  ;;  %v8869_v28 = vadd.f32 %v3817_v21, %v3685_v5 }
 0x408   : > { %4561 = vmatmul.bf16.gmra.mxu1 %v9828_v52 }
 0x409   : > { %v3446_v4 = vpop.f32.mrf.mxu3 }
 0x40a   : > { %v3499_v17 = vadd.f32 %v3446_v4, %v8613_v6  ;;  %v9894_v6 = vld [vmem:[#allocation39_spill] sm:$0xff] }
 0x40b   : > { %v4027_v45 = vpop.f32.mrf.mxu2  ;;  %v3635_v40 = vpop.f32.mrf.mxu0 }
 0x40c   : > { %v3686_v25 = vadd.f32 %v3633_v60, %v3499_v17 }
 0x40d   : > { %v3822_v3 = vpop.f32.mrf.mxu1 }
 0x40e   : > { %v3873_v63 = vadd.f32 %v3820_v15, %v3686_v25 }
 0x410   : > { %v8873_v33 = vadd.f32 %v4027_v45, %v3873_v63 }
 0x411   : > { %v3448_v19 = vpop.f32.mrf.mxu3 }
 0x412   : > { %v3500_v35 = vadd.f32 %v3448_v19, %v8623_v42 }
 0x413   : > { %v8876_v48 = vpop.f32.mrf.mxu2  ;;  %v3638_v21 = vpop.f32.mrf.mxu0 }
 0x414   : > { %v3687_v2 = vadd.f32 %v3635_v40, %v3500_v35  ;;  %v9895_v35 = vld [vmem:[#allocation38_spill] sm:$0xff] }
 0x415   : > { %v3825_v52 = vpop.f32.mrf.mxu1 }
 0x416   : > { %4178 = vmatmul.bf16.gmra.mxu3 %v9893_v53  ;;  %4379 = vmatmul.bf16.gmra.mxu0 %v9894_v6  ;;  %v8880_v5 = vadd.f32 %v3822_v3, %v3687_v2 }
 0x418   : > { %4566 = vmatmul.bf16.gmra.mxu1 %v9830_v62  ;;  %v9896_v62 = vld [vmem:[#allocation42_spill] sm:$0xff] }
 0x419   : > { %v3451_v60 = vpop.f32.mrf.mxu3 }
 0x41a   : > { %v3501_v15 = vadd.f32 %v3451_v60, %v8629_v13  ;;  %v6095_v60 = vld [vmem:[#allocation2 + $0x8] sm:$0xff] }
 0x41b   : > { %v4032_v12 = vpop.f32.mrf.mxu2  ;;  %v3640_v11 = vpop.f32.mrf.mxu0  ;;  %4791 = vmatpush.bf16.msra.mxu2 %v6095_v60 }
 0x41c   : > { %v3688_v4 = vadd.f32 %v3638_v21, %v3501_v15 }
 0x41d   : > { %v3827_v42 = vpop.f32.mrf.mxu1 }
 0x41e   : > { %v3875_v17 = vadd.f32 %v3825_v52, %v3688_v4 }
 0x420   : > { %v8884_v45 = vadd.f32 %v4032_v12, %v3875_v17 }
 0x421   : > { %v3453_v40 = vpop.f32.mrf.mxu3 }
 0x422   : > { %v3502_v25 = vadd.f32 %v3453_v40, %v8639_v26 }
 0x423   : > { %v8887_v31 = vpop.f32.mrf.mxu2  ;;  %v3643_v63 = vpop.f32.mrf.mxu0 }
 0x424   : > { %v3689_v3 = vadd.f32 %v3640_v11, %v3502_v25  ;;  %v9897_v25 = vld [vmem:[#allocation48_spill] sm:$0xff] }
 0x425   : > { %v3830_v19 = vpop.f32.mrf.mxu1 }
 0x426   : > { %4183 = vmatmul.bf16.gmra.mxu3 %v9895_v35  ;;  %4384 = vmatmul.bf16.gmra.mxu0 %v9896_v62  ;;  %v8891_v13 = vadd.f32 %v3827_v42, %v3689_v3 }
 0x428   : > { %4571 = vmatmul.bf16.gmra.mxu1 %v9835_v51 }
 0x429   : > { %v3456_v21 = vpop.f32.mrf.mxu3 }
 0x42a   : > { %v3503_v2 = vadd.f32 %v3456_v21, %v8642_v22  ;;  %v9898_v22 = vld [vmem:[#allocation49_spill] sm:$0xff] }
 0x42b   : > { %v4037_v52 = vpop.f32.mrf.mxu2  ;;  %v3645_v53 = vpop.f32.mrf.mxu0 }
 0x42c   : > { %v3690_v6 = vadd.f32 %v3643_v63, %v3503_v2 }
 0x42d   : > { %v3832_v26 = vpop.f32.mrf.mxu1 }
 0x42e   : > { %v3877_v15 = vadd.f32 %v3830_v19, %v3690_v6 }
 0x430   : > { %v8895_v12 = vadd.f32 %v4037_v52, %v3877_v15 }
 0x431   : > { %v3458_v11 = vpop.f32.mrf.mxu3 }
 0x432   : > { %v3504_v4 = vadd.f32 %v3458_v11, %v8652_v54 }
 0x433   : > { %v8898_v17 = vpop.f32.mrf.mxu2  ;;  %v3648_v42 = vpop.f32.mrf.mxu0 }
 0x434   : > { %v3691_v40 = vadd.f32 %v3645_v53, %v3504_v4  ;;  %v9899_v4 = vld [vmem:[#allocation62_spill] sm:$0xff] }
 0x435   : > { %v3835_v51 = vpop.f32.mrf.mxu1 }
 0x436   : > { %4188 = vmatmul.bf16.gmra.mxu3 %v9897_v25  ;;  %4389 = vmatmul.bf16.gmra.mxu0 %v9898_v22  ;;  %v8902_v3 = vadd.f32 %v3832_v26, %v3691_v40 }
 0x438   : > { %4576 = vmatmul.bf16.gmra.mxu1 %v9840_v59  ;;  %v9900_v59 = vld [vmem:[#allocation63_spill] sm:$0xff] }
 0x439   : > { %v3461_v63 = vpop.f32.mrf.mxu3 }
 0x43a   : > { %v3505_v19 = vadd.f32 %v3461_v63, %v8658_v55  ;;  %v6094_v63 = vld [vmem:[#allocation2] sm:$0xff] }
 0x43b   : > { %v4042_v35 = vpop.f32.mrf.mxu2  ;;  %v3650_v62 = vpop.f32.mrf.mxu0  ;;  %4792 = vmatpush.bf16.msra.mxu2 %v6094_v63 }
 0x43c   : > { %v3692_v21 = vadd.f32 %v3648_v42, %v3505_v19 }
 0x43d   : > { %v3837_v54 = vpop.f32.mrf.mxu1 }
 0x43e   : > { %v3879_v2 = vadd.f32 %v3835_v51, %v3692_v21 }
 0x440   : > { %v8906_v52 = vadd.f32 %v4042_v35, %v3879_v2 }
 0x441   : > { %v3463_v53 = vpop.f32.mrf.mxu3 }
 0x442   : > { %v3506_v6 = vadd.f32 %v3463_v53, %v8668_v57 }
 0x443   : > { %v8909_v60 = vpop.f32.mrf.mxu2  ;;  %v3653_v15 = vpop.f32.mrf.mxu0 }
 0x444   : > { %v3693_v26 = vadd.f32 %v3650_v62, %v3506_v6  ;;  %v9901_v6 = vld [vmem:[#allocation65_spill] sm:$0xff] }
 0x445   : > { %v3840_v11 = vpop.f32.mrf.mxu1 }
 0x446   : > { %4193 = vmatmul.bf16.gmra.mxu3 %v9899_v4  ;;  %4394 = vmatmul.bf16.gmra.mxu0 %v9900_v59  ;;  %v8913_v55 = vadd.f32 %v3837_v54, %v3693_v26  ;;  %v9904_v4 = vld [vmem:[#allocation108_spill] sm:$0xff] }
 0x448   : > { %4581 = vmatmul.bf16.gmra.mxu1 %v9845_v44 }
 0x449   : > { %v3466_v42 = vpop.f32.mrf.mxu3 }
 0x44a   : > { %v3507_v40 = vadd.f32 %v3466_v42, %v8671_v20  ;;  %v9902_v20 = vld [vmem:[#allocation74_spill] sm:$0xff] }
 0x44b   : > { %v4047_v51 = vpop.f32.mrf.mxu2  ;;  %v3655_v25 = vpop.f32.mrf.mxu0 }
 0x44c   : > { %v3694_v22 = vadd.f32 %v3653_v15, %v3507_v40  ;;  %v9903_v15 = vld [vmem:[#allocation71_spill] sm:$0xff] }
 0x44d   : > { %v3842_v57 = vpop.f32.mrf.mxu1 }
 0x44e   : > { %v3881_v19 = vadd.f32 %v3840_v11, %v3694_v22 }
 0x450   : > { %v8917_v35 = vadd.f32 %v4047_v51, %v3881_v19  ;;  %v9905_v19 = vld [vmem:[#allocation16_spill] sm:$0xff] }
 0x451   : > { %v3468_v62 = vpop.f32.mrf.mxu3 }
 0x452   : > { %v3508_v21 = vadd.f32 %v3468_v62, %v8681_v29 }
 0x453   : > { %v8920_v2 = vpop.f32.mrf.mxu2  ;;  %v3658_v54 = vpop.f32.mrf.mxu0 }
 0x454   : > { %v3695_v53 = vadd.f32 %v3655_v25, %v3508_v21 }
 0x455   : > { %v3845_v44 = vpop.f32.mrf.mxu1 }
 0x456   : > { %4198 = vmatmul.bf16.gmra.mxu3 %v9901_v6  ;;  %4399 = vmatmul.bf16.gmra.mxu0 %v9902_v20  ;;  %v8924_v26 = vadd.f32 %v3842_v57, %v3695_v53  ;;  %v9906_v20 = vld [vmem:[#allocation73_spill] sm:$0xff] }
 0x458   : > { %4586 = vmatmul.bf16.gmra.mxu1 %v9903_v15  ;;  %v9907_v15 = vld [vmem:[#allocation80_spill] sm:$0xff] }
 0x459   : > { %v3471_v11 = vpop.f32.mrf.mxu3 }
 0x45a   : > { %v3509_v59 = vadd.f32 %v3471_v11, %v9904_v4 }
 0x45b   : > { %v4052_v42 = vpop.f32.mrf.mxu2  ;;  %v3660_v40 = vpop.f32.mrf.mxu0 }
 0x45c   : > { %v3696_v51 = vadd.f32 %v3658_v54, %v3509_v59 }
 0x45d   : > { %v3847_v29 = vpop.f32.mrf.mxu1 }
 0x45e   : > { %v3883_v22 = vadd.f32 %v3845_v44, %v3696_v51 }
 0x460   : > { %v8928_v63 = vadd.f32 %v4052_v42, %v3883_v22 }
 0x461   : > { %v3473_v25 = vpop.f32.mrf.mxu3 }
 0x462   : > { %v3510_v62 = vadd.f32 %v3473_v25, %v9905_v19 }
 0x463   : > { %v3663_v21 = vpop.f32.mrf.mxu0  ;;  %v8931_v6 = vpop.f32.mrf.mxu2 }
 0x464   : > { %v3697_v57 = vadd.f32 %v3660_v40, %v3510_v62 }
 0x465   : > { %v3850_v53 = vpop.f32.mrf.mxu1 }
 0x466   : > { %4203 = vmatmul.bf16.gmra.mxu3 %v9906_v20  ;;  %4404 = vmatmul.bf16.gmra.mxu0 %v9907_v15  ;;  %v8935_v11 = vadd.f32 %v3847_v29, %v3697_v57  ;;  %v9908_v29 = vld [vmem:[#allocation90_spill] sm:$0xff] }
 0x467   : > { %v9909_v57 = vld [vmem:[#allocation86_spill] sm:$0xff] }
 0x468   : > { %4591 = vmatmul.bf16.gmra.mxu1 %v9857_v23 }
 0x469   : > { %v3476_v54 = vpop.f32.mrf.mxu3 }
 0x46a   : > { %v3511_v44 = vadd.f32 %v3476_v54, %v8700_v41 }
 0x46b   : > { %v3665_v4 = vpop.f32.mrf.mxu0  ;;  %v4057_v51 = vpop.f32.mrf.mxu2 }
 0x46c   : > { %v3698_v59 = vadd.f32 %v3663_v21, %v3511_v44 }
 0x46d   : > { %v3852_v42 = vpop.f32.mrf.mxu1 }
 0x46e   : > { %v3885_v22 = vadd.f32 %v3850_v53, %v3698_v59 }
 0x470   : > { %v8939_v25 = vadd.f32 %v4057_v51, %v3885_v22 }
 0x471   : > { %v3478_v40 = vpop.f32.mrf.mxu3 }
 0x472   : > { %v3512_v19 = vadd.f32 %v3478_v40, %v8710_v39 }
 0x473   : > { %v4370_v62 = vpop.f32.mrf.mxu0 }
 0x474   : > { %v3699_v20 = vadd.f32 %v3665_v4, %v3512_v19 }
 0x475   : > { %v4557_v15 = vpop.f32.mrf.mxu1 }
 0x476   : > { %4208 = vmatmul.bf16.gmra.mxu3 %v9908_v29  ;;  %4409 = vmatmul.bf16.gmra.mxu0 %v9909_v57  ;;  %v8944_v23 = vadd.f32 %v3852_v42, %v3699_v20  ;;  %v9910_v29 = vld [vmem:[#allocation88_spill] sm:$0xff]  ;;  %v9911_v42 = vld [vmem:[#allocation94_spill] sm:$0xff] }
 0x478   : > { %4596 = vmatmul.bf16.gmra.mxu1 %v9860_v8 }
 0x479   : > { %v4169_v41 = vpop.f32.mrf.mxu3 }
 0x47a   : > { %v4249_v53 = vadd.f32 %v4169_v41, %v8716_v18 }
 0x47b   : > { %v4372_v21 = vpop.f32.mrf.mxu0 }
 0x47c   : > { %v4450_v44 = vadd.f32 %v4370_v62, %v4249_v53 }
 0x47d   : > { %v4559_v54 = vpop.f32.mrf.mxu1 }
 0x47e   : > { %v4637_v4 = vadd.f32 %v4557_v15, %v4450_v44 }
 0x480   : > { %v4669_v8 = vmax.f32 %v4637_v4, 0.0 }
 0x481   : > { %v4171_v59 = vpop.f32.mrf.mxu3 }
 0x482   : > { %v4250_v39 = vadd.f32 %v4171_v59, %v8726_v36 }
 0x483   : > { %v4375_v51 = vpop.f32.mrf.mxu0 }
 0x484   : > { %v4451_v22 = vadd.f32 %v4372_v21, %v4250_v39 }
 0x485   : > { %v4562_v40 = vpop.f32.mrf.mxu1 }
 0x486   : > { %v4638_v19 = vadd.f32 %v4559_v54, %v4451_v22  ;;  %4213 = vmatmul.bf16.gmra.mxu3 %v9910_v29  ;;  %4414 = vmatmul.bf16.gmra.mxu0 %v9911_v42  ;;  %v9912_v29 = vld [vmem:[#allocation103_spill] sm:$0xff] }
 0x488   : > { %4601 = vmatmul.bf16.gmra.mxu1 %v9862_v1  ;;  %v4670_v20 = vmax.f32 %v4638_v19, 0.0  ;;  %v9913_v1 = vld [vmem:[#allocation104_spill] sm:$0xff] }
 0x489   : > { %v4174_v57 = vpop.f32.mrf.mxu3 }
 0x48a   : > { %v4701_v18 = vpack.c.bf16 %v4670_v20, %v4669_v8  ;;  %v4251_v62 = vadd.f32 %v4174_v57, %v8729_v32 }
 0x48b   : > { %v4377_v41 = vpop.f32.mrf.mxu0 }
 0x48c   : > { %4793 = vmatmul.bf16.vlgmr.msra.gmra.mxu2 %v4701_v18  ;;  %v4452_v53 = vadd.f32 %v4375_v51, %v4251_v62 }
 0x48d   : > { %v4564_v36 = vpop.f32.mrf.mxu1 }
 0x48e   : > { %v4639_v44 = vadd.f32 %v4562_v40, %v4452_v53 }
 0x490   : > { %v4671_v4 = vmax.f32 %v4639_v44, 0.0 }
 0x491   : > { %v4176_v15 = vpop.f32.mrf.mxu3 }
 0x492   : > { %v4252_v21 = vadd.f32 %v4176_v15, %v8739_v0  ;;  %v9914_v15 = vld [vmem:[#allocation100_spill] sm:$0xff] }
 0x493   : > { %v4380_v54 = vpop.f32.mrf.mxu0 }
 0x494   : > { %v4453_v59 = vadd.f32 %v4377_v41, %v4252_v21 }
 0x495   : > { %v4567_v39 = vpop.f32.mrf.mxu1 }
 0x496   : > { %v4640_v22 = vadd.f32 %v4564_v36, %v4453_v59  ;;  %4218 = vmatmul.bf16.gmra.mxu3 %v9912_v29  ;;  %4419 = vmatmul.bf16.gmra.mxu0 %v9913_v1  ;;  %v9916_v1 = vld [vmem:[#allocation17_spill] sm:$0xff] }
 0x498   : > { %4606 = vmatmul.bf16.gmra.mxu1 %v9864_v49  ;;  %v4672_v19 = vmax.f32 %v4640_v22, 0.0  ;;  %v9915_v49 = vld [vmem:[#allocation101_spill] sm:$0xff] }
 0x499   : > { %v4179_v32 = vpop.f32.mrf.mxu3 }
 0x49a   : > { %v4702_v42 = vpack.c.bf16 %v4672_v19, %v4671_v4  ;;  %v4253_v51 = vadd.f32 %v4179_v32, %v8745_v58 }
 0x49b   : > { %v4382_v8 = vpop.f32.mrf.mxu0 }
 0x49c   : > { %4798 = vmatmul.bf16.gmra.mxu2 %v4702_v42  ;;  %v4454_v20 = vadd.f32 %v4380_v54, %v4253_v51 }
 0x49d   : > { %v4569_v0 = vpop.f32.mrf.mxu1 }
 0x49e   : > { %v4641_v41 = vadd.f32 %v4567_v39, %v4454_v20  ;;  %v9919_v20 = vld [vmem:[#allocation106_spill] sm:$0xff] }
 0x4a0   : > { %v4673_v21 = vmax.f32 %v4641_v41, 0.0 }
 0x4a1   : > { %v4181_v40 = vpop.f32.mrf.mxu3 }
 0x4a2   : > { %v4254_v57 = vadd.f32 %v4181_v40, %v8755_v7 }
 0x4a3   : > { %v4385_v18 = vpop.f32.mrf.mxu0 }
 0x4a4   : > { %v4455_v62 = vadd.f32 %v4382_v8, %v4254_v57 }
 0x4a5   : > { %v4572_v36 = vpop.f32.mrf.mxu1 }
 0x4a6   : > { %v4642_v53 = vadd.f32 %v4569_v0, %v4455_v62  ;;  %4223 = vmatmul.bf16.gmra.mxu3 %v9914_v15  ;;  %4424 = vmatmul.bf16.gmra.mxu0 %v9915_v49  ;;  %v9917_v0 = vld [vmem:[#allocation112_spill] sm:$0xff]  ;;  %v9921_v49 = vld [vmem:[#allocation118_spill] sm:$0xff] }
 0x4a8   : > { %4611 = vmatmul.bf16.gmra.mxu1 %v9866_v24  ;;  %v4674_v44 = vmax.f32 %v4642_v53, 0.0  ;;  %v9918_v24 = vld [vmem:[#allocation107_spill] sm:$0xff] }
 0x4a9   : > { %v4184_v58 = vpop.f32.mrf.mxu3 }
 0x4aa   : > { %v4703_v59 = vpack.c.bf16 %v4674_v44, %v4673_v21  ;;  %v4255_v54 = vadd.f32 %v4184_v58, %v8758_v10 }
 0x4ab   : > { %v4387_v22 = vpop.f32.mrf.mxu0 }
 0x4ac   : > { %4803 = vmatmul.bf16.gmra.mxu2 %v4703_v59  ;;  %v4456_v29 = vadd.f32 %v4385_v18, %v4255_v54  ;;  %v9920_v18 = vld [vmem:[#allocation64_spill] sm:$0xff] }
 0x4ad   : > { %v4574_v7 = vpop.f32.mrf.mxu1 }
 0x4ae   : > { %v4643_v32 = vadd.f32 %v4572_v36, %v4456_v29  ;;  %v9922_v36 = vld [vmem:[#allocation47_spill] sm:$0xff] }
 0x4af   : > { %v4071_v21 = vadd.f32 %v9922_v36, %v9921_v49  ;;  %v9929_v49 = vld [vmem:[#allocation76_spill] sm:$0xff] }
 0x4b0   : > { %v4675_v40 = vmax.f32 %v4643_v32, 0.0  ;;  %v9925_v32 = vld [vmem:[#allocation115_spill] sm:$0xff]  ;;  %v9930_v36 = vunpack.c.l.bf16 %v9929_v49 }
 0x4b1   : > { %v4186_v39 = vpop.f32.mrf.mxu3 }
 0x4b2   : > { %v4256_v4 = vadd.f32 %v4186_v39, %v9916_v1  ;;  %v9923_v1 = vld [vmem:[#allocation120_spill] sm:$0xff] }
 0x4b3   : > { %v4390_v19 = vpop.f32.mrf.mxu0 }
 0x4b4   : > { %v4457_v42 = vadd.f32 %v4387_v22, %v4256_v4  ;;  %v9924_v4 = vld [vmem:[#allocation121_spill] sm:$0xff] }
 0x4b5   : > { %v4577_v8 = vpop.f32.mrf.mxu1 }
 0x4b6   : > { %v4644_v51 = vadd.f32 %v4574_v7, %v4457_v42  ;;  %4228 = vmatmul.bf16.gmra.mxu3 %v9917_v0  ;;  %4429 = vmatmul.bf16.gmra.mxu0 %v9918_v24 }
 0x4b8   : > { %4616 = vmatmul.bf16.gmra.mxu1 %v9919_v20  ;;  %v4676_v57 = vmax.f32 %v4644_v51, 0.0 }
 0x4b9   : > { %v4189_v10 = vpop.f32.mrf.mxu3 }
 0x4ba   : > { %v4704_v41 = vpack.c.bf16 %v4676_v57, %v4675_v40  ;;  %v4257_v53 = vadd.f32 %v4189_v10, %v9920_v18  ;;  %v9926_v40 = vld [vmem:[#allocation26_spill] sm:$0xff]  ;;  %v9927_v10 = vld [vmem:[#allocation13_spill] sm:$0xff] }
 0x4bb   : > { %v4392_v62 = vpop.f32.mrf.mxu0 }
 0x4bc   : > { %4808 = vmatmul.bf16.gmra.mxu2 %v4704_v41  ;;  %v4458_v44 = vadd.f32 %v4390_v19, %v4257_v53 }
 0x4bd   : > { %v4579_v15 = vpop.f32.mrf.mxu1 }
 0x4be   : > { %v4645_v54 = vadd.f32 %v4577_v8, %v4458_v44  ;;  %v9928_v8 = vld [vmem:[#allocation126_spill] sm:$0xff] }
 0x4bf   : > { %v4073_v41 = vadd.f32 %v9928_v8, %v9927_v10  ;;  %v4284_v10 = vrot.slane %v8814_v38, 2  ;;  %v4075_v38 = vadd.f32 %v8843_v34, %v8848_v37 }
 0x4c0   : > { %v4677_v42 = vmax.f32 %v4645_v54, 0.0 }
 0x4c1   : > { %v4191_v58 = vpop.f32.mrf.mxu3 }
 0x4c2   : > { %v4258_v59 = vadd.f32 %v4191_v58, %v4071_v21  ;;  %v9931_v21 = vld [vmem:[#allocation27_spill] sm:$0xff] }
 0x4c3   : > { %v4395_v22 = vpop.f32.mrf.mxu0  ;;  %v9932_v44 = vunpack.c.l.bf16 %v9931_v21 }
 0x4c4   : > { %v4459_v7 = vadd.f32 %v4392_v62, %v4258_v59 }
 0x4c5   : > { %v4582_v29 = vpop.f32.mrf.mxu1  ;;  %v610_v58 = vsub.f32 %v9932_v44, %v9930_v36 }
 0x4c6   : > { %v4646_v39 = vadd.f32 %v4579_v15, %v4459_v7  ;;  %4233 = vmatmul.bf16.gmra.mxu3 %v9923_v1  ;;  %4434 = vmatmul.bf16.gmra.mxu0 %v9924_v4  ;;  %v9933_v1 = vld [vmem:[#allocation99_spill] sm:$0xff]  ;;  %v9934_v4 = vld [vmem:[#allocation109_spill] sm:$0xff] }
 0x4c8   : > { %4621 = vmatmul.bf16.gmra.mxu1 %v9925_v32  ;;  %v4678_v51 = vmax.f32 %v4646_v39, 0.0  ;;  %v664_v32 = vand.u32 2147483647, %v610_v58 }
 0x4c9   : > { %v4194_v0 = vpop.f32.mrf.mxu3 }
 0x4ca   : > { %v4705_v24 = vpack.c.bf16 %v4678_v51, %v4677_v42  ;;  %v4259_v19 = vadd.f32 %v4194_v0, %v9926_v40  ;;  %v3901_v40 = vrot.slane %v8832_v56, 1 }
 0x4cb   : > { %v4397_v20 = vpop.f32.mrf.mxu0 }
 0x4cc   : > { %4813 = vmatmul.bf16.gmra.mxu2 %v4705_v24  ;;  %v4460_v62 = vadd.f32 %v4395_v22, %v4259_v19  ;;  %v3900_v24 = vrot.slane %v8830_v16, 1 }
 0x4cd   : > { %v4584_v57 = vpop.f32.mrf.mxu1 }
 0x4ce   : > { %v4647_v59 = vadd.f32 %v4582_v29, %v4460_v62  ;;  %v3903_v29 = vrot.slane %v664_v32, 1  ;;  %v4289_v62 = vrot.slane %v8832_v56, 2 }
 0x4d0   : > { %v4679_v22 = vmax.f32 %v4647_v59, 0.0  ;;  %v3904_v49 = vsel %vm1051_vm0, %v3901_v40, %v3903_v29 }
 0x4d1   : > { %v4196_v18 = vpop.f32.mrf.mxu3 }
 0x4d2   : > { %v4260_v53 = vadd.f32 %v4196_v18, %v4073_v41  ;;  %v4288_v41 = vrot.slane %v8830_v16, 2  ;;  %v4291_v18 = vrot.slane %v664_v32, 2 }
 0x4d3   : > { %v4400_v15 = vpop.f32.mrf.mxu0 }
 0x4d4   : > { %v4461_v54 = vadd.f32 %v4397_v20, %v4260_v53  ;;  %v4281_v20 = vrot.slane %v8818_v30, 2  ;;  %v3902_v53 = vsel %vm1051_vm0, %v3900_v24, %v3901_v40  ;;  %v4292_v21 = vsel %vm1728_vm1, %v4289_v62, %v4291_v18 }
 0x4d5   : > { %v4587_v7 = vpop.f32.mrf.mxu1  ;;  %v4094_v56 = vpack.c.bf16 %v3904_v49, %v3902_v53  ;;  %v4077_v24 = vadd.f32 %v8854_v50, %v8858_v27  ;;  %v4079_v50 = vadd.f32 %v8865_v61, %v8869_v28 }
 0x4d6   : > { %v4648_v39 = vadd.f32 %v4584_v57, %v4461_v54  ;;  %4238 = vmatmul.bf16.gmra.mxu3 %v9933_v1  ;;  %4439 = vmatmul.bf16.gmra.mxu0 %v9934_v4  ;;  %v4282_v57 = vrot.slane %v8820_v43, 2 }
 0x4d8   : > { %4626 = vmatmul.bf16.gmra.mxu1 %v8839_v9  ;;  %v4680_v42 = vmax.f32 %v4648_v39, 0.0  ;;  %v4283_v36 = vsel %vm1728_vm1, %v4281_v20, %v4282_v57  ;;  %v4285_v30 = vsel %vm1728_vm1, %v4282_v57, %v4284_v10 }
 0x4d9   : > { %v4199_v51 = vpop.f32.mrf.mxu3  ;;  %v4295_v58 = vpack.c.bf16 %v4285_v30, %v4283_v36 }
 0x4da   : > { %v4706_v0 = vpack.c.bf16 %v4680_v42, %v4679_v22  ;;  %v4261_v8 = vadd.f32 %v4199_v51, %v8834_v14  ;;  %v4290_v14 = vsel %vm1728_vm1, %v4288_v41, %v4289_v62 }
 0x4db   : > { %v4402_v19 = vpop.f32.mrf.mxu0  ;;  %v4482_v54 = vpack.c.bf16 %v4292_v21, %v4290_v14 }
 0x4dc   : > { %4818 = vmatmul.bf16.gmra.mxu2 %v4706_v0  ;;  %v4462_v43 = vadd.f32 %v4400_v15, %v4261_v8 }
 0x4dd   : > { %v4589_v9 = vpop.f32.mrf.mxu1 }
 0x4de   : > { %v4649_v39 = vadd.f32 %v4587_v7, %v4462_v43 }
 0x4e0   : > { %v4681_v22 = vmax.f32 %v4649_v39, 0.0 }
 0x4e1   : > { %v4201_v16 = vpop.f32.mrf.mxu3 }
 0x4e2   : > { %v4262_v44 = vadd.f32 %v4201_v16, %v4075_v38 }
 0x4e3   : > { %v4405_v59 = vpop.f32.mrf.mxu0 }
 0x4e4   : > { %v4463_v1 = vadd.f32 %v4402_v19, %v4262_v44  ;;  %v9005_v44 = vpop.f32.mrf.mxu2 }
 0x4e5   : > { %v4592_v4 = vpop.f32.mrf.mxu1 }
 0x4e6   : > { %v4650_v32 = vadd.f32 %v4589_v9, %v4463_v1  ;;  %4243 = vmatmul.bf16.gmra.mxu3 %v4094_v56  ;;  %4444 = vmatmul.bf16.gmra.mxu0 %v4295_v58  ;;  %v4081_v1 = vadd.f32 %v8876_v48, %v8880_v5 }
 0x4e8   : > { %4631 = vmatmul.bf16.gmra.mxu1 %v4482_v54  ;;  %v4682_v34 = vmax.f32 %v4650_v32, 0.0 }
 0x4e9   : > { %v4204_v37 = vpop.f32.mrf.mxu3 }
 0x4ea   : > { %v4707_v15 = vpack.c.bf16 %v4682_v34, %v4681_v22  ;;  %v4263_v51 = vadd.f32 %v4204_v37, %v8851_v46  ;;  %v9013_v22 = vld [vmem:[%s9125_s5] ss:$0 sm:$0xff] }
 0x4eb   : > { %v4407_v42 = vpop.f32.mrf.mxu0 }
 0x4ec   : > { %4823 = vmatmul.bf16.gmra.mxu2 %v4707_v15  ;;  %v4464_v40 = vadd.f32 %v4405_v59, %v4263_v51 }
 0x4ed   : > { %v4594_v0 = vpop.f32.mrf.mxu1 }
 0x4ee   : > { %v4651_v20 = vadd.f32 %v4592_v4, %v4464_v40 }
 0x4f0   : > { %v4683_v9 = vmax.f32 %v4651_v20, 0.0 }
 0x4f1   : > { %v4206_v7 = vpop.f32.mrf.mxu3 }
 0x4f2   : > { %v4264_v19 = vadd.f32 %v4206_v7, %v4077_v24 }
 0x4f3   : > { %v4410_v29 = vpop.f32.mrf.mxu0 }
 0x4f4   : > { %v4465_v57 = vadd.f32 %v4407_v42, %v4264_v19 }
 0x4f5   : > { %v4597_v10 = vpop.f32.mrf.mxu1 }
 0x4f6   : > { %v4652_v8 = vadd.f32 %v4594_v0, %v4465_v57 }
 0x4f8   : > { %v4684_v41 = vmax.f32 %v4652_v8, 0.0 }
 0x4f9   : > { %v4209_v62 = vpop.f32.mrf.mxu3 }
 0x4fa   : > { %v4708_v18 = vpack.c.bf16 %v4684_v41, %v4683_v9  ;;  %v4265_v46 = vadd.f32 %v4209_v62, %v8862_v47  ;;  %v4083_v62 = vadd.f32 %v8887_v31, %v8891_v13 }
 0x4fb   : > { %v4412_v53 = vpop.f32.mrf.mxu0 }
 0x4fc   : > { %4828 = vmatmul.bf16.gmra.mxu2 %v4708_v18  ;;  %v4466_v27 = vadd.f32 %v4410_v29, %v4265_v46 }
 0x4fd   : > { %v4599_v49 = vpop.f32.mrf.mxu1 }
 0x4fe   : > { %v4653_v43 = vadd.f32 %v4597_v10, %v4466_v27 }
 0x500   : > { %v4685_v56 = vmax.f32 %v4653_v43, 0.0 }
 0x501   : > { %v4211_v36 = vpop.f32.mrf.mxu3 }
 0x502   : > { %v4266_v30 = vadd.f32 %v4211_v36, %v4079_v50 }
 0x503   : > { %v4415_v38 = vpop.f32.mrf.mxu0 }
 0x504   : > { %v4467_v14 = vadd.f32 %v4412_v53, %v4266_v30 }
 0x505   : > { %v4602_v21 = vpop.f32.mrf.mxu1 }
 0x506   : > { %v4654_v16 = vadd.f32 %v4599_v49, %v4467_v14 }
 0x508   : > { %v4686_v58 = vmax.f32 %v4654_v16, 0.0 }
 0x509   : > { %v4214_v59 = vpop.f32.mrf.mxu3 }
 0x50a   : > { %v4709_v47 = vpack.c.bf16 %v4686_v58, %v4685_v56  ;;  %v4267_v39 = vadd.f32 %v4214_v59, %v8873_v33 }
 0x50b   : > { %v4417_v54 = vpop.f32.mrf.mxu0 }
 0x50c   : > { %4833 = vmatmul.bf16.gmra.mxu2 %v4709_v47  ;;  %v4468_v4 = vadd.f32 %v4415_v38, %v4267_v39 }
 0x50d   : > { %v4604_v61 = vpop.f32.mrf.mxu1 }
 0x50e   : > { %v4655_v15 = vadd.f32 %v4602_v21, %v4468_v4 }
 0x50f   : > { %v4794_v28 = vpop.f32.mrf.mxu2 }
 0x510   : > { %v4795_v33 = vadd.f32 %v9013_v22, %v4794_v28  ;;  %v4687_v40 = vmax.f32 %v4655_v15, 0.0 }
 0x511   : > { %v4216_v32 = vpop.f32.mrf.mxu3 }
 0x512   : > { %v4268_v34 = vadd.f32 %v4216_v32, %v4081_v1  ;;  %v4874_v19 = vmax.f32 %v4795_v33, 0.0 }
 0x513   : > { %v4420_v37 = vpop.f32.mrf.mxu0 }
 0x514   : > { %v4469_v42 = vadd.f32 %v4417_v54, %v4268_v34 }
 0x515   : > { %v4607_v51 = vpop.f32.mrf.mxu1 }
 0x516   : > { %v4656_v0 = vadd.f32 %v4604_v61, %v4469_v42  ;;  %v4085_v61 = vadd.f32 %v8898_v17, %v8902_v3 }
 0x517   : > { %v4796_v24 = vpop.f32.mrf.mxu2 }
 0x518   : > { %v4688_v7 = vmax.f32 %v4656_v0, 0.0  ;;  %v4797_v48 = vadd.f32 %v9013_v22, %v4796_v24 }
 0x519   : > { %v4219_v5 = vpop.f32.mrf.mxu3 }
 0x51a   : > { %v4875_v29 = vmax.f32 %v4797_v48, 0.0  ;;  %v4710_v20 = vpack.c.bf16 %v4688_v7, %v4687_v40  ;;  %v4269_v8 = vadd.f32 %v4219_v5, %v8884_v45 }
 0x51b   : > { %v4422_v57 = vpop.f32.mrf.mxu0 }
 0x51c   : > { %v6178_v10 = vpack.c.bf16 %v4875_v29, %v4874_v19  ;;  %4838 = vmatmul.bf16.gmra.mxu2 %v4710_v20  ;;  %v4470_v18 = vadd.f32 %v4420_v37, %v4269_v8 }
 0x51d   : > { %v4609_v9 = vpop.f32.mrf.mxu1 }
 0x51e   : > { %6179 = vst [vmem:[%s9021_s10] sm:$0xff] %v6178_v10   ;;  %v4657_v50 = vadd.f32 %v4607_v51, %v4470_v18 }
 0x51f   : > { %v4799_v41 = vpop.f32.mrf.mxu2 }
 0x520   : > { %v4800_v45 = vadd.f32 %v9013_v22, %v4799_v41  ;;  %v4689_v43 = vmax.f32 %v4657_v50, 0.0 }
 0x521   : > { %v4221_v53 = vpop.f32.mrf.mxu3 }
 0x522   : > { %v4270_v46 = vadd.f32 %v4221_v53, %v4083_v62  ;;  %v4876_v56 = vmax.f32 %v4800_v45, 0.0 }
 0x523   : > { %v4425_v49 = vpop.f32.mrf.mxu0 }
 0x524   : > { %v4471_v27 = vadd.f32 %v4422_v57, %v4270_v46  ;;  %v4087_v57 = vadd.f32 %v8909_v60, %v8913_v55 }
 0x525   : > { %v4612_v36 = vpop.f32.mrf.mxu1 }
 0x526   : > { %v4658_v30 = vadd.f32 %v4609_v9, %v4471_v27 }
 0x527   : > { %v4801_v38 = vpop.f32.mrf.mxu2 }
 0x528   : > { %v4690_v14 = vmax.f32 %v4658_v30, 0.0  ;;  %v4802_v21 = vadd.f32 %v9013_v22, %v4801_v38 }
 0x529   : > { %v4224_v16 = vpop.f32.mrf.mxu3 }
 0x52a   : > { %v4877_v58 = vmax.f32 %v4802_v21, 0.0  ;;  %v4711_v31 = vpack.c.bf16 %v4690_v14, %v4689_v43  ;;  %v4271_v47 = vadd.f32 %v4224_v16, %v8895_v12 }
 0x52b   : > { %v4427_v13 = vpop.f32.mrf.mxu0 }
 0x52c   : > { %v6183_v59 = vpack.c.bf16 %v4877_v58, %v4876_v56  ;;  %4843 = vmatmul.bf16.gmra.mxu2 %v4711_v31  ;;  %v4472_v28 = vadd.f32 %v4425_v49, %v4271_v47  ;;  %v4089_v56 = vadd.f32 %v8920_v2, %v8924_v26 }
 0x52d   : > { %v4614_v54 = vpop.f32.mrf.mxu1 }
 0x52e   : > { %6271 = vst [vmem:[%s9021_s10 + $0x8] sm:$0xff] %v6183_v59   ;;  %v4659_v34 = vadd.f32 %v4612_v36, %v4472_v28 }
 0x52f   : > { %v4804_v39 = vpop.f32.mrf.mxu2 }
 0x530   : > { %v4805_v42 = vadd.f32 %v9013_v22, %v4804_v39  ;;  %v4691_v12 = vmax.f32 %v4659_v34, 0.0 }
 0x531   : > { %v4226_v1 = vpop.f32.mrf.mxu3 }
 0x532   : > { %v4272_v4 = vadd.f32 %v4226_v1, %v4085_v61  ;;  %v4878_v7 = vmax.f32 %v4805_v42, 0.0 }
 0x533   : > { %v4430_v32 = vpop.f32.mrf.mxu0 }
 0x534   : > { %v4473_v37 = vadd.f32 %v4427_v13, %v4272_v4 }
 0x535   : > { %v4617_v15 = vpop.f32.mrf.mxu1 }
 0x536   : > { %v4660_v51 = vadd.f32 %v4614_v54, %v4473_v37 }
 0x537   : > { %v4806_v33 = vpop.f32.mrf.mxu2 }
 0x538   : > { %v4692_v0 = vmax.f32 %v4660_v51, 0.0  ;;  %v4807_v24 = vadd.f32 %v9013_v22, %v4806_v33 }
 0x539   : > { %v4229_v40 = vpop.f32.mrf.mxu3 }
 0x53a   : > { %v4879_v48 = vmax.f32 %v4807_v24, 0.0  ;;  %v4712_v17 = vpack.c.bf16 %v4692_v0, %v4691_v12  ;;  %v4273_v19 = vadd.f32 %v4229_v40, %v8906_v52  ;;  %v4091_v12 = vadd.f32 %v8931_v6, %v8935_v11 }
 0x53b   : > { %v4432_v3 = vpop.f32.mrf.mxu0 }
 0x53c   : > { %v6188_v5 = vpack.c.bf16 %v4879_v48, %v4878_v7  ;;  %4848 = vmatmul.bf16.gmra.mxu2 %v4712_v17  ;;  %v4474_v10 = vadd.f32 %v4430_v32, %v4273_v19 }
 0x53d   : > { %v4619_v29 = vpop.f32.mrf.mxu1 }
 0x53e   : > { %6272 = vst [vmem:[%s9021_s10 + $0x10] sm:$0xff] %v6188_v5   ;;  %v4661_v62 = vadd.f32 %v4617_v15, %v4474_v10 }
 0x53f   : > { %v4809_v20 = vpop.f32.mrf.mxu2 }
 0x540   : > { %v4810_v46 = vadd.f32 %v9013_v22, %v4809_v20  ;;  %v4693_v52 = vmax.f32 %v4661_v62, 0.0 }
 0x541   : > { %v4231_v8 = vpop.f32.mrf.mxu3 }
 0x542   : > { %v4274_v9 = vadd.f32 %v4231_v8, %v4087_v57  ;;  %v4880_v30 = vmax.f32 %v4810_v46, 0.0 }
 0x543   : > { %v4435_v41 = vpop.f32.mrf.mxu0 }
 0x544   : > { %v4475_v18 = vadd.f32 %v4432_v3, %v4274_v9 }
 0x545   : > { %v4622_v53 = vpop.f32.mrf.mxu1 }
 0x546   : > { %v4662_v49 = vadd.f32 %v4619_v29, %v4475_v18 }
 0x547   : > { %v4811_v50 = vpop.f32.mrf.mxu2 }
 0x548   : > { %v4694_v27 = vmax.f32 %v4662_v49, 0.0  ;;  %v4812_v36 = vadd.f32 %v9013_v22, %v4811_v50 }
 0x549   : > { %v4234_v45 = vpop.f32.mrf.mxu3 }
 0x54a   : > { %v4881_v38 = vmax.f32 %v4812_v36, 0.0  ;;  %v4713_v60 = vpack.c.bf16 %v4694_v27, %v4693_v52  ;;  %v4275_v14 = vadd.f32 %v4234_v45, %v8917_v35 }
 0x54b   : > { %v4437_v55 = vpop.f32.mrf.mxu0 }
 0x54c   : > { %v6193_v43 = vpack.c.bf16 %v4881_v38, %v4880_v30  ;;  %4853 = vmatmul.bf16.gmra.mxu2 %v4713_v60  ;;  %v4476_v58 = vadd.f32 %v4435_v41, %v4275_v14 }
 0x54d   : > { %v4624_v21 = vpop.f32.mrf.mxu1 }
 0x54e   : > { %6273 = vst [vmem:[%s9021_s10 + $0x18] sm:$0xff] %v6193_v43   ;;  %v4663_v59 = vadd.f32 %v4622_v53, %v4476_v58  ;;  %v4093_v53 = vadd.f32 %v9005_v44, %v8944_v23 }
 0x54f   : > { %v4814_v16 = vpop.f32.mrf.mxu2 }
 0x550   : > { %v4815_v39 = vadd.f32 %v9013_v22, %v4814_v16  ;;  %v4695_v35 = vmax.f32 %v4663_v59, 0.0 }
 0x551   : > { %v4236_v31 = vpop.f32.mrf.mxu3 }
 0x552   : > { %v4276_v13 = vadd.f32 %v4236_v31, %v4089_v56  ;;  %v4882_v37 = vmax.f32 %v4815_v39, 0.0 }
 0x553   : > { %v4440_v54 = vpop.f32.mrf.mxu0 }
 0x554   : > { %v4477_v47 = vadd.f32 %v4437_v55, %v4276_v13 }
 0x555   : > { %v4627_v28 = vpop.f32.mrf.mxu1 }
 0x556   : > { %v4664_v61 = vadd.f32 %v4624_v21, %v4477_v47 }
 0x557   : > { %v4816_v1 = vpop.f32.mrf.mxu2 }
 0x558   : > { %v4696_v4 = vmax.f32 %v4664_v61, 0.0  ;;  %v4817_v32 = vadd.f32 %v9013_v22, %v4816_v1 }
 0x559   : > { %v4239_v34 = vpop.f32.mrf.mxu3 }
 0x55a   : > { %v4883_v15 = vmax.f32 %v4817_v32, 0.0  ;;  %v4714_v2 = vpack.c.bf16 %v4696_v4, %v4695_v35  ;;  %v4277_v42 = vadd.f32 %v4239_v34, %v8928_v63 }
 0x55b   : > { %v4442_v51 = vpop.f32.mrf.mxu0 }
 0x55c   : > { %v6198_v26 = vpack.c.bf16 %v4883_v15, %v4882_v37  ;;  %4858 = vmatmul.bf16.gmra.mxu2 %v4714_v2  ;;  %v4478_v0 = vadd.f32 %v4440_v54, %v4277_v42 }
 0x55d   : > { %v4629_v24 = vpop.f32.mrf.mxu1 }
 0x55e   : > { %6274 = vst [vmem:[%s9021_s10 + $0x20] sm:$0xff] %v6198_v26   ;;  %v4665_v48 = vadd.f32 %v4627_v28, %v4478_v0 }
 0x55f   : > { %v4819_v33 = vpop.f32.mrf.mxu2 }
 0x560   : > { %v4820_v3 = vadd.f32 %v9013_v22, %v4819_v33  ;;  %v4697_v29 = vmax.f32 %v4665_v48, 0.0 }
 0x561   : > { %v4241_v40 = vpop.f32.mrf.mxu3 }
 0x562   : > { %v4278_v7 = vadd.f32 %v4241_v40, %v4091_v12  ;;  %v4884_v8 = vmax.f32 %v4820_v3, 0.0 }
 0x563   : > { %v4445_v57 = vpop.f32.mrf.mxu0 }
 0x564   : > { %v4479_v17 = vadd.f32 %v4442_v51, %v4278_v7 }
 0x565   : > { %v4632_v11 = vpop.f32.mrf.mxu1 }
 0x566   : > { %v4666_v5 = vadd.f32 %v4629_v24, %v4479_v17 }
 0x567   : > { %v4821_v19 = vpop.f32.mrf.mxu2 }
 0x568   : > { %v4698_v63 = vmax.f32 %v4666_v5, 0.0  ;;  %v4822_v20 = vadd.f32 %v9013_v22, %v4821_v19 }
 0x569   : > { %v4244_v10 = vpop.f32.mrf.mxu3 }
 0x56a   : > { %v4885_v9 = vmax.f32 %v4822_v20, 0.0  ;;  %v4715_v6 = vpack.c.bf16 %v4698_v63, %v4697_v29  ;;  %v4279_v62 = vadd.f32 %v4244_v10, %v8939_v25 }
 0x56b   : > { %v4447_v52 = vpop.f32.mrf.mxu0 }
 0x56c   : > { %v6203_v41 = vpack.c.bf16 %v4885_v9, %v4884_v8  ;;  %4863 = vmatmul.bf16.gmra.mxu2 %v4715_v6  ;;  %v4480_v46 = vadd.f32 %v4445_v57, %v4279_v62 }
 0x56d   : > { %v4634_v45 = vpop.f32.mrf.mxu1 }
 0x56e   : > { %6275 = vst [vmem:[%s9021_s10 + $0x28] sm:$0xff] %v6203_v41   ;;  %v4667_v27 = vadd.f32 %v4632_v11, %v4480_v46 }
 0x56f   : > { %v4824_v18 = vpop.f32.mrf.mxu2 }
 0x570   : > { %v4825_v30 = vadd.f32 %v9013_v22, %v4824_v18  ;;  %v4699_v55 = vmax.f32 %v4667_v27, 0.0 }
 0x571   : > { %v4246_v49 = vpop.f32.mrf.mxu3 }
 0x572   : > { %v4280_v50 = vadd.f32 %v4246_v49, %v4093_v53  ;;  %v4886_v14 = vmax.f32 %v4825_v30, 0.0 }
 0x574   : > { %v4481_v36 = vadd.f32 %v4447_v52, %v4280_v50 }
 0x576   : > { %v4668_v38 = vadd.f32 %v4634_v45, %v4481_v36 }
 0x577   : > { %v4826_v60 = vpop.f32.mrf.mxu2 }
 0x578   : > { %v4700_v25 = vmax.f32 %v4668_v38, 0.0  ;;  %v4827_v43 = vadd.f32 %v9013_v22, %v4826_v60 }
 0x57a   : > { %v4887_v21 = vmax.f32 %v4827_v43, 0.0  ;;  %v4716_v23 = vpack.c.bf16 %v4700_v25, %v4699_v55 }
 0x57c   : > { %v6208_v44 = vpack.c.bf16 %v4887_v21, %v4886_v14  ;;  %4868 = vmatmul.bf16.gmra.mxu2 %v4716_v23 }
 0x57e   : > { %6276 = vst [vmem:[%s9021_s10 + $0x30] sm:$0xff] %v6208_v44  }
 0x57f   : > { %v4829_v16 = vpop.f32.mrf.mxu2 }
 0x580   : > { %v4830_v56 = vadd.f32 %v9013_v22, %v4829_v16 }
 0x582   : > { %v4888_v13 = vmax.f32 %v4830_v56, 0.0 }
 0x587   : > { %v4831_v58 = vpop.f32.mrf.mxu2 }
 0x588   : > { %v4832_v31 = vadd.f32 %v9013_v22, %v4831_v58 }
 0x58a   : > { %v4889_v59 = vmax.f32 %v4832_v31, 0.0 }
 0x58c   : > { %v6213_v47 = vpack.c.bf16 %v4889_v59, %v4888_v13 }
 0x58e   : > { %6277 = vst [vmem:[%s9021_s10 + $0x38] sm:$0xff] %v6213_v47  }
 0x58f   : > { %v4834_v54 = vpop.f32.mrf.mxu2 }
 0x590   : > { %v4835_v39 = vadd.f32 %v9013_v22, %v4834_v54 }
 0x592   : > { %v4890_v1 = vmax.f32 %v4835_v39, 0.0 }
 0x597   : > { %v4836_v61 = vpop.f32.mrf.mxu2 }
 0x598   : > { %v4837_v28 = vadd.f32 %v9013_v22, %v4836_v61 }
 0x59a   : > { %v4891_v35 = vmax.f32 %v4837_v28, 0.0 }
 0x59c   : > { %v6218_v4 = vpack.c.bf16 %v4891_v35, %v4890_v1 }
 0x59e   : > { %6278 = vst [vmem:[%s9021_s10 + $0x40] sm:$0xff] %v6218_v4  }
 0x59f   : > { %v4839_v32 = vpop.f32.mrf.mxu2 }
 0x5a0   : > { %v4840_v34 = vadd.f32 %v9013_v22, %v4839_v32 }
 0x5a2   : > { %v4892_v2 = vmax.f32 %v4840_v34, 0.0 }
 0x5a7   : > { %v4841_v37 = vpop.f32.mrf.mxu2 }
 0x5a8   : > { %v4842_v15 = vadd.f32 %v9013_v22, %v4841_v37 }
 0x5aa   : > { %v4893_v26 = vmax.f32 %v4842_v15, 0.0 }
 0x5ac   : > { %v6223_v42 = vpack.c.bf16 %v4893_v26, %v4892_v2 }
 0x5ae   : > { %6279 = vst [vmem:[%s9021_s10 + $0x48] sm:$0xff] %v6223_v42  }
 0x5af   : > { %v4844_v51 = vpop.f32.mrf.mxu2 }
 0x5b0   : > { %v4845_v33 = vadd.f32 %v9013_v22, %v4844_v51 }
 0x5b2   : > { %v4894_v24 = vmax.f32 %v4845_v33, 0.0 }
 0x5b7   : > { %v4846_v12 = vpop.f32.mrf.mxu2 }
 0x5b8   : > { %v4847_v0 = vadd.f32 %v9013_v22, %v4846_v12 }
 0x5ba   : > { %v4895_v40 = vmax.f32 %v4847_v0, 0.0 }
 0x5bc   : > { %v6228_v7 = vpack.c.bf16 %v4895_v40, %v4894_v24 }
 0x5be   : > { %6280 = vst [vmem:[%s9021_s10 + $0x50] sm:$0xff] %v6228_v7  }
 0x5bf   : > { %v4849_v48 = vpop.f32.mrf.mxu2 }
 0x5c0   : > { %v4850_v17 = vadd.f32 %v9013_v22, %v4849_v48 }
 0x5c2   : > { %v4896_v19 = vmax.f32 %v4850_v17, 0.0 }
 0x5c7   : > { %v4851_v3 = vpop.f32.mrf.mxu2 }
 0x5c8   : > { %v4852_v5 = vadd.f32 %v9013_v22, %v4851_v3 }
 0x5ca   : > { %v4897_v29 = vmax.f32 %v4852_v5, 0.0 }
 0x5cc   : > { %v6233_v63 = vpack.c.bf16 %v4897_v29, %v4896_v19 }
 0x5ce   : > { %6281 = vst [vmem:[%s9021_s10 + $0x58] sm:$0xff] %v6233_v63  }
 0x5cf   : > { %v4854_v20 = vpop.f32.mrf.mxu2 }
 0x5d0   : > { %v4855_v57 = vadd.f32 %v9013_v22, %v4854_v20 }
 0x5d2   : > { %v4898_v9 = vmax.f32 %v4855_v57, 0.0 }
 0x5d7   : > { %v4856_v10 = vpop.f32.mrf.mxu2 }
 0x5d8   : > { %v4857_v8 = vadd.f32 %v9013_v22, %v4856_v10 }
 0x5da   : > { %v4899_v6 = vmax.f32 %v4857_v8, 0.0 }
 0x5dc   : > { %v6238_v11 = vpack.c.bf16 %v4899_v6, %v4898_v9 }
 0x5de   : > { %6282 = vst [vmem:[%s9021_s10 + $0x60] sm:$0xff] %v6238_v11  }
 0x5df   : > { %v4859_v41 = vpop.f32.mrf.mxu2 }
 0x5e0   : > { %v4860_v62 = vadd.f32 %v9013_v22, %v4859_v41 }
 0x5e2   : > { %v4900_v46 = vmax.f32 %v4860_v62, 0.0 }
 0x5e7   : > { %v4861_v18 = vpop.f32.mrf.mxu2 }
 0x5e8   : > { %v4862_v53 = vadd.f32 %v9013_v22, %v4861_v18 }
 0x5ea   : > { %v4901_v49 = vmax.f32 %v4862_v53, 0.0 }
 0x5ec   : > { %v6243_v50 = vpack.c.bf16 %v4901_v49, %v4900_v46 }
 0x5ee   : > { %6283 = vst [vmem:[%s9021_s10 + $0x68] sm:$0xff] %v6243_v50  }
 0x5ef   : > { %v4864_v52 = vpop.f32.mrf.mxu2 }
 0x5f0   : > { %v4865_v27 = vadd.f32 %v9013_v22, %v4864_v52 }
 0x5f2   : > { %v4902_v30 = vmax.f32 %v4865_v27, 0.0 }
 0x5f7   : > { %v4866_v36 = vpop.f32.mrf.mxu2 }
 0x5f8   : > { %v4867_v45 = vadd.f32 %v9013_v22, %v4866_v36 }
 0x5fa   : > { %v4903_v38 = vmax.f32 %v4867_v45, 0.0 }
 0x5fc   : > { %v6248_v60 = vpack.c.bf16 %v4903_v38, %v4902_v30 }
 0x5fe   : > { %6284 = vst [vmem:[%s9021_s10 + $0x70] sm:$0xff] %v6248_v60  }
 0x5ff   : > { %v4869_v55 = vpop.f32.mrf.mxu2 }
 0x600   : > { %v4870_v25 = vadd.f32 %v9013_v22, %v4869_v55 }
 0x602   : > { %v4904_v21 = vmax.f32 %v4870_v25, 0.0 }
 0x607   : > { %v4871_v43 = vpop.f32.mrf.mxu2 }
 0x608   : > { %v4872_v14 = vadd.f32 %v9013_v22, %v4871_v43 }
 0x60a   : > { %v4905_v23 = vmax.f32 %v4872_v14, 0.0 }
 0x60c   : > { %v6253_v44 = vpack.c.bf16 %v4905_v23, %v4904_v21 }
 0x60e   : > { %6285 = vst [vmem:[%s9021_s10 + $0x78] sm:$0xff] %v6253_v44  }
 0x60f   : > { %6423 = shalt.err (!%p6420_p8)
}
 0x610   : > { %s6467_s28 = smov 64   ;;  %s6468_s10 = smov 4  }
 0x611   : > { %6315 = dma.vmem_to_hbm [thread:$0]  (%p6542_p5), %s4984_s14, 2048, %s4986_s17, %s4971_s25, %s6467_s28, %s6467_s28, %s6468_s10  }
 0x612 PF: > { %p6327_p9 = scmp.ge.s32.totalorder %s6462_s24, 2  ;;  %s5000_s12 = sand.u32 1, %s6450_s21  }
 0x613   : > { %s5001_s13 = scalar_lea.sflag [#allocation4], %s5000_s12 }
 0x614   : > { %p6322_p10 = pnand %p6327_p9, %p6546_p6 }
 0x616   : > { %p6323_p11 = pneg %p6322_p10 }
 0x618   : > { %6445 = dma.done.wait (%p6323_p11), %s5001_s13, 2048  }
 0x619   : > { %6447 = vsyncadd (%p6323_p11), %s5001_s13, 4294965248  ;;  %p17_p12 = scmp.ge.s32.totalorder %s6529_s27, 4   ;;  %s9935_s21 = smov %s6454_s22 }
 0x61a   : > { %s9936_s22 = smov %s6458_s23  ;;  %s9937_s23 = smov %s6540_s30 }
 0x61b   : > { %s9938_s24 = smov %s6529_s27  ;;  %19 = sbr.rel (!%p17_p12) target bundleno = 4 (0x4), region = 103 }
 0x620   :  { %5007 = vsyncpa [#allocation3], 1 }
 0x621   :  { %5009 = vsyncpa [#allocation3 + $0x1], 1 }
 0x622   :  { %5010 = vsyncpa [#allocation4], 1 }
 0x623   :  { %5012 = vsyncpa [#allocation4 + $0x1], 1 }

</bundles_post_ra>
